<compile_context>
chip_gen: v7x
topology: tpu7x:2x2x1
jax: 0.10.0
libtpu: 0.0.40
codegen_flags: <defaults>
</compile_context>

<pallas_src>
import math
import functools

import jax
import jax.numpy as jnp
from jax import lax
from jax.experimental import pallas as pl
from jax.experimental.pallas import tpu as pltpu


# --------------------------------------------------------------------------
# Fused HM-LSTM recurrence.  One grid step == one (batch-block, time-chunk).
# The chunk-start input projection is off the serial chain; the per-step loop
# runs as lax.fori_loop with the recurrent state carried in registers and
# persisted across chunks in VMEM scratch.
# --------------------------------------------------------------------------
def hm_lstm_chunk_kernel(a, unroll,
                         # inputs
                         x_ref, w1xg_ref, b1g_ref, w1xz_ref,
                         u1g_ref, u2g_ref, b2g_ref, uz_ref, bz_ref,
                         # outputs
                         seq_ref, c1f_ref, c2f_ref,
                         # scratch
                         sxg_s, sxz_s, h1_s, c1_s, z1_s, h2_s, c2_s, z2_s):
    Tt, Bt, G = seq_ref.shape
    H = G // 4
    tc = pl.program_id(1)

    @pl.when(tc == 0)
    def _():
        # hidden == None in the reference -> zero initial state (per batch block)
        h1_s[...] = jnp.zeros_like(h1_s)
        c1_s[...] = jnp.zeros_like(c1_s)
        z1_s[...] = jnp.zeros_like(z1_s)
        h2_s[...] = jnp.zeros_like(h2_s)
        c2_s[...] = jnp.zeros_like(c2_s)
        z2_s[...] = jnp.zeros_like(z2_s)

    # fused recurrent weights / small constants (resident for the whole chunk)
    u1g = u1g_ref[...]                      # (2H, 4H) = [U11_g ; U21_g]      (cell 1)
    u2g = u2g_ref[...]                      # (2H, 4H) = [W01_g ; U11_g]      (cell 2)
    b2g = b2g_ref[...]                      # (1, 4H)
    uz = uz_ref[...]                        # (2, 2H) fused z columns
    bz = bz_ref[...]                        # (1, 2)  [b1_z, b2_z]
    uz1, uz2 = uz[0:1, :], uz[1:2, :]
    b1z, b2z = bz[0:1, 0:1], bz[0:1, 1:2]

    # ---- chunk-start input projection (off the per-step critical path) ----
    # x_ref is the whole chunk, rows ordered time-major: row = t_local*Bt + b_local.
    x2d = x_ref[...]                                                    # (Tt*Bt, E)
    sxg_s[...] = (jnp.dot(x2d, w1xg_ref[...],
                          preferred_element_type=jnp.float32) + b1g_ref[...])
    sxz_s[...] = jnp.sum(x2d * w1xz_ref[...], axis=-1, keepdims=True) + b1z

    def cell1(gates, z_pre, c, z):
        # z_bottom == 1 for the first layer -> formulas simplify exactly (z binary).
        s = jax.nn.sigmoid(gates)                                       # full 4H width
        t = jnp.tanh(gates)
        f, i, o, g = s[:, 0:H], s[:, H:2 * H], s[:, 2 * H:3 * H], t[:, 3 * H:4 * H]
        ig = i * g
        c_new = z * ig + (1.0 - z) * (f * c + ig)
        h_new = o * jnp.tanh(c_new)
        z_new = ((a * z_pre) > 0.0).astype(jnp.float32)                 # == bound(hard_sigm)
        return h_new, c_new, z_new

    def cell2(gates, z_pre, c, h, z, zb):
        s = jax.nn.sigmoid(gates)
        t = jnp.tanh(gates)
        f, i, o, g = s[:, 0:H], s[:, H:2 * H], s[:, 2 * H:3 * H], t[:, 3 * H:4 * H]
        ig = i * g
        nz = 1.0 - z
        c_new = z * ig + nz * (1.0 - zb) * c + nz * zb * (f * c + ig)
        otc = o * jnp.tanh(c_new)
        h_new = z * otc + nz * (1.0 - zb) * h + nz * zb * otc
        z_new = ((a * z_pre) > 0.0).astype(jnp.float32)
        return h_new, c_new, z_new

    def step(tl, carry):
        h1, c1, z1, h2, c2, z2 = carry
        row = pl.multiple_of(tl * Bt, 8)

        # ---- cell 1: bottom-up = precomputed x projection, top-down gated by z1 ----
        hcat1 = jnp.concatenate([h1, z1 * h2], axis=-1)                 # (Bt, 2H)
        g1 = sxg_s[pl.ds(row, Bt), :] + jnp.dot(
            hcat1, u1g, preferred_element_type=jnp.float32)
        zp1 = sxz_s[pl.ds(row, Bt), :] + jnp.sum(hcat1 * uz1, axis=-1, keepdims=True)
        h1n, c1n, z1n = cell1(g1, zp1, c1, z1)

        # ---- cell 2 (last layer): bottom-up = new h1 (z_bottom = new z1) ----
        hcat2 = jnp.concatenate([h1n, z1n * h2], axis=-1)
        g2 = jnp.dot(hcat2, u2g, preferred_element_type=jnp.float32) + b2g
        zp2 = jnp.sum(hcat2 * uz2, axis=-1, keepdims=True) + b2z
        h2n, c2n, z2n = cell2(g2, zp2, c2, h2, z2, z1n)

        # lane-dense packed row [h1 | h2 | z1(bcast) | z2(bcast)]: one full-tile,
        # time-major, unmasked (Bt, 128) store per step.
        packed = jnp.concatenate(
            [h1n, h2n,
             jnp.broadcast_to(z1n, (Bt, H)),
             jnp.broadcast_to(z2n, (Bt, H))], axis=-1)
        seq_ref[tl] = packed
        return (h1n, c1n, z1n, h2n, c2n, z2n)

    carry0 = (h1_s[...], c1_s[...], z1_s[...], h2_s[...], c2_s[...], z2_s[...])
    h1, c1, z1, h2, c2, z2 = lax.fori_loop(0, Tt, step, carry0, unroll=unroll)

    # carry recurrent state to the next time chunk
    h1_s[...], c1_s[...], z1_s[...] = h1, c1, z1
    h2_s[...], c2_s[...], z2_s[...] = h2, c2, z2

    # only c1/c2 need dedicated final outputs (final h/z come from the sequence)
    @pl.when(tc == pl.num_programs(1) - 1)
    def _():
        c1f_ref[...] = c1
        c2f_ref[...] = c2


# --------------------------------------------------------------------------
# Parameters.  PyTorch stores W as (4H+1, in); here they are pre-transposed and
# split into a 4H-wide gate block (in, 4H) plus a separate z column.
# --------------------------------------------------------------------------
def make_params(key, H, E):
    G = 4 * H
    stdv = 1.0 / math.sqrt(H)
    ks = jax.random.split(key, 14)
    u = lambda k, shape: jax.random.uniform(k, shape, jnp.float32, -stdv, stdv)
    return dict(
        # cell 1
        w1x_g=u(ks[0], (E, G)), w1x_z=u(ks[1], (1, E)),
        u11_g=u(ks[2], (H, G)), u11_z=u(ks[3], (H,)),
        u21_g=u(ks[4], (H, G)), u21_z=u(ks[5], (H,)),
        b1_g=u(ks[6], (1, G)), b1_z=u(ks[7], (1,)),
        # cell 2 (last layer: no U_21)
        w2x_g=u(ks[8], (H, G)), w2x_z=u(ks[9], (H,)),
        u12_g=u(ks[10], (H, G)), u12_z=u(ks[11], (H,)),
        b2_g=u(ks[12], (1, G)), b2_z=u(ks[13], (1,)),
    )


def _largest_divisor(n, cap):
    for d in range(min(n, cap), 0, -1):
        if n % d == 0:
            return d
    return 1


# --------------------------------------------------------------------------
# Wrapper: one fused recurrent pallas_call -> PyTorch-layout outputs.
# --------------------------------------------------------------------------
@functools.partial(jax.jit, static_argnames=("a",))
def hm_lstm_forward(inputs, params, a=1.0):
    B, T, E = inputs.shape
    H = params["u11_g"].shape[0]
    G = 4 * H

    # ---- tiling: large batch tile (multiple of 8, capped at 128 so nb >= 2 for big
    # batches -> both v7x TensorCores via the "parallel" axis), time chunks <= 64 ----
    Bt = min(128, ((B + 7) // 8) * 8)
    B_pad = ((B + Bt - 1) // Bt) * Bt
    nb = B_pad // Bt
    Tt = _largest_divisor(T, 64)
    nt = T // Tt
    unroll = next(u for u in (8, 4, 2, 1) if Tt % u == 0)

    x = inputs.astype(jnp.float32)
    if B_pad != B:
        x = jnp.pad(x, ((0, B_pad - B), (0, 0), (0, 0)))
    # (B_pad, T, E) -> (nb, nt, Tt*Bt, E): one time-major slab per (batch-block,
    # time-chunk), consumed whole by the in-kernel projection (no in-kernel reshapes).
    x_blk = (x.reshape(nb, Bt, nt, Tt, E)
              .transpose(0, 2, 3, 1, 4)
              .reshape(nb, nt, Tt * Bt, E))

    # fused recurrent weights: one K=2H matmul / one z reduce per cell per step
    u1g_cat = jnp.concatenate([params["u11_g"], params["u21_g"]], axis=0)   # (2H, 4H)
    u2g_cat = jnp.concatenate([params["w2x_g"], params["u12_g"]], axis=0)   # (2H, 4H)
    uz = jnp.stack([jnp.concatenate([params["u11_z"], params["u21_z"]]),
                    jnp.concatenate([params["w2x_z"], params["u12_z"]])],
                   axis=0)                                                  # (2, 2H)
    bz = jnp.concatenate([params["b1_z"], params["b2_z"]])[None, :]         # (1, 2)

    kernel = functools.partial(hm_lstm_chunk_kernel, float(a), unroll)
    seq, c1f, c2f = pl.pallas_call(
        kernel,
        out_shape=(jax.ShapeDtypeStruct((T, B_pad, G), jnp.float32),
                   jax.ShapeDtypeStruct((B_pad, H), jnp.float32),
                   jax.ShapeDtypeStruct((B_pad, H), jnp.float32)),
        grid_spec=pltpu.PrefetchScalarGridSpec(
            num_scalar_prefetch=0,
            grid=(nb, nt),
            in_specs=[
                pl.BlockSpec((None, None, Tt * Bt, E),
                             lambda bi, tc: (bi, tc, 0, 0)),              # x chunk
                pl.BlockSpec((E, G), lambda bi, tc: (0, 0)),              # W01_1 gates
                pl.BlockSpec((1, G), lambda bi, tc: (0, 0)),              # b1 gates
                pl.BlockSpec((1, E), lambda bi, tc: (0, 0)),              # W01_1 z column
                pl.BlockSpec((2 * H, G), lambda bi, tc: (0, 0)),          # [U11;U21] gates
                pl.BlockSpec((2 * H, G), lambda bi, tc: (0, 0)),          # [W01;U11] gates (cell 2)
                pl.BlockSpec((1, G), lambda bi, tc: (0, 0)),              # b2 gates
                pl.BlockSpec((2, 2 * H), lambda bi, tc: (0, 0)),          # fused z columns
                pl.BlockSpec((1, 2), lambda bi, tc: (0, 0)),              # z biases
            ],
            out_specs=(
                pl.BlockSpec((Tt, Bt, G), lambda bi, tc: (tc, bi, 0)),    # packed sequence
                pl.BlockSpec((Bt, H), lambda bi, tc: (bi, 0)),            # final c1
                pl.BlockSpec((Bt, H), lambda bi, tc: (bi, 0)),            # final c2
            ),
            scratch_shapes=[
                pltpu.VMEM((Tt * Bt, G), jnp.float32),    # precomputed x gate projection
                pltpu.VMEM((Tt * Bt, 1), jnp.float32),    # precomputed x z-pre term
                pltpu.VMEM((Bt, H), jnp.float32), pltpu.VMEM((Bt, H), jnp.float32),
                pltpu.VMEM((Bt, 1), jnp.float32),
                pltpu.VMEM((Bt, H), jnp.float32), pltpu.VMEM((Bt, H), jnp.float32),
                pltpu.VMEM((Bt, 1), jnp.float32),
            ]),
        compiler_params=pltpu.CompilerParams(
            dimension_semantics=("parallel", "arbitrary"),
            vmem_limit_bytes=32 * 1024 * 1024),
    )(x_blk, params["w1x_g"], params["b1_g"], params["w1x_z"],
      u1g_cat, u2g_cat, params["b2_g"], uz, bz)

    # unpack the lane-dense slab; single transpose back to PyTorch (B, T, .) layout
    seq = jnp.transpose(seq[:, :B], (1, 0, 2))                # (B, T, 4H)
    h1_seq = seq[:, :, 0:H]
    h2_seq = seq[:, :, H:2 * H]
    z1_seq = seq[:, :, 2 * H:2 * H + 1]
    z2_seq = seq[:, :, 3 * H:3 * H + 1]
    hidden = (h1_seq[:, -1, :].T, c1f[:B].T, z1_seq[:, -1, :].T,
              h2_seq[:, -1, :].T, c2f[:B].T, z2_seq[:, -1, :].T)
    return h1_seq, h2_seq, z1_seq, z2_seq, hidden


# --------------------------------------------------------------------------
# Pure-JAX reference (same math as the PyTorch module, hidden=None).
# --------------------------------------------------------------------------
def reference_forward(x, params, a):
    B, T, _ = x.shape
    H = params["u11_g"].shape[0]
    p = params

    def cell(fs_g, fs_z, c, h, z, z_bottom):
        f = jax.nn.sigmoid(fs_g[:, 0:H])
        i = jax.nn.sigmoid(fs_g[:, H:2 * H])
        o = jax.nn.sigmoid(fs_g[:, 2 * H:3 * H])
        g = jnp.tanh(fs_g[:, 3 * H:4 * H])
        z_hat = jnp.clip((a * fs_z + 1.0) / 2.0, 0.0, 1.0)
        c_new = (z * (i * g) + (1 - z) * (1 - z_bottom) * c
                 + (1 - z) * z_bottom * (f * c + i * g))
        h_new = (z * o * jnp.tanh(c_new) + (1 - z) * (1 - z_bottom) * h
                 + (1 - z) * z_bottom * o * jnp.tanh(c_new))
        z_new = (z_hat > 0.5).astype(jnp.float32)
        return h_new, c_new, z_new

    h1 = jnp.zeros((B, H), jnp.float32); c1 = jnp.zeros((B, H), jnp.float32)
    z1 = jnp.zeros((B, 1), jnp.float32)
    h2 = jnp.zeros((B, H), jnp.float32); c2 = jnp.zeros((B, H), jnp.float32)
    z2 = jnp.zeros((B, 1), jnp.float32)
    hs1, hs2, zs1, zs2 = [], [], [], []
    for t in range(T):
        xt = x[:, t, :]
        fs1_g = xt @ p["w1x_g"] + z1 * (h2 @ p["u21_g"]) + h1 @ p["u11_g"] + p["b1_g"]
        fs1_z = (xt @ p["w1x_z"].T + z1 * (h2 @ p["u21_z"][:, None])
                 + h1 @ p["u11_z"][:, None] + p["b1_z"])
        h1, c1, z1 = cell(fs1_g, fs1_z, c1, h1, z1, 1.0)
        fs2_g = h1 @ p["w2x_g"] + z1 * (h2 @ p["u12_g"]) + p["b2_g"]
        fs2_z = (h1 @ p["w2x_z"][:, None] + z1 * (h2 @ p["u12_z"][:, None])
                 + p["b2_z"])
        h2, c2, z2 = cell(fs2_g, fs2_z, c2, h2, z2, z1)
        hs1.append(h1); hs2.append(h2); zs1.append(z1); zs2.append(z2)
    hidden = (h1.T, c1.T, z1.T, h2.T, c2.T, z2.T)
    return (jnp.stack(hs1, axis=1), jnp.stack(hs2, axis=1),
            jnp.stack(zs1, axis=1), jnp.stack(zs2, axis=1), hidden)


if __name__ == "__main__":
    # small shapes: batch=2, time/seq=8, input(embed)=16, hidden=32 (size_list=[32, 32])
    B, T, E, H = 2, 8, 16, 32
    a = 1.0
    key = jax.random.PRNGKey(0)
    kp, kx = jax.random.split(key)
    params = make_params(kp, H, E)
    x = jax.random.normal(kx, (B, T, E), dtype=jnp.float32)

    h1_seq, h2_seq, z1_seq, z2_seq, hidden = hm_lstm_forward(x, params, a=a)
    jax.block_until_ready((h1_seq, h2_seq, z1_seq, z2_seq, hidden))

    # shape checks (PyTorch conventions)
    assert h1_seq.shape == (B, T, H) and h2_seq.shape == (B, T, H)
    assert z1_seq.shape == (B, T, 1) and z2_seq.shape == (B, T, 1)
    assert hidden[0].shape == (H, B) and hidden[1].shape == (H, B)
    assert hidden[2].shape == (1, B)

    # correctness vs. a pure-JAX reference of the same recurrence
    r_h1, r_h2, r_z1, r_z2, r_hidden = reference_forward(x, params, a)
    for got, ref in [(h1_seq, r_h1), (h2_seq, r_h2),
                     (z1_seq, r_z1), (z2_seq, r_z2)] + list(zip(hidden, r_hidden)):
        assert got.shape == ref.shape
        assert bool(jnp.all(jnp.isfinite(got)))
        assert bool(jnp.allclose(got, ref, atol=2e-3, rtol=2e-3)), \
            float(jnp.max(jnp.abs(got - ref)))

    print("KERNEL_OK")
</pallas_src>

<mosaic_0001>
module attributes {stable_mosaic.version = 11 : i64} {
  func.func @hm_lstm_chunk_kernel(%arg0: i32, %arg1: i32, %arg2: memref<1x1x64x16xf32, #tpu.memory_space<vmem>>, %arg3: memref<16x128xf32, #tpu.memory_space<vmem>>, %arg4: memref<1x128xf32, #tpu.memory_space<vmem>>, %arg5: memref<1x16xf32, #tpu.memory_space<vmem>>, %arg6: memref<64x128xf32, #tpu.memory_space<vmem>>, %arg7: memref<64x128xf32, #tpu.memory_space<vmem>>, %arg8: memref<1x128xf32, #tpu.memory_space<vmem>>, %arg9: memref<2x64xf32, #tpu.memory_space<vmem>>, %arg10: memref<1x2xf32, #tpu.memory_space<vmem>>, %arg11: memref<8x8x128xf32, #tpu.memory_space<vmem>>, %arg12: memref<8x32xf32, #tpu.memory_space<vmem>>, %arg13: memref<8x32xf32, #tpu.memory_space<vmem>>, %arg14: memref<64x128xf32, #tpu.memory_space<vmem>>, %arg15: memref<64x1xf32, #tpu.memory_space<vmem>>, %arg16: memref<8x32xf32, #tpu.memory_space<vmem>>, %arg17: memref<8x32xf32, #tpu.memory_space<vmem>>, %arg18: memref<8x1xf32, #tpu.memory_space<vmem>>, %arg19: memref<8x32xf32, #tpu.memory_space<vmem>>, %arg20: memref<8x32xf32, #tpu.memory_space<vmem>>, %arg21: memref<8x1xf32, #tpu.memory_space<vmem>>) attributes {dimension_semantics = [#tpu.dimension_semantics<parallel>, #tpu.dimension_semantics<arbitrary>], iteration_bounds = array<i64: 1, 1>, scalar_prefetch = 0 : i64, scratch_operands = 8 : i64, tpu.core_type = #tpu.core_type<tc>, window_params = [{transform_indices = @transform_0, window_bounds = array<i64: 1, 1, 64, 16>}, {pipeline_mode = #tpu.pipeline_mode<synchronous>, transform_indices = @transform_1, window_bounds = array<i64: 16, 128>}, {pipeline_mode = #tpu.pipeline_mode<synchronous>, transform_indices = @transform_2, window_bounds = array<i64: 1, 128>}, {pipeline_mode = #tpu.pipeline_mode<synchronous>, transform_indices = @transform_3, window_bounds = array<i64: 1, 16>}, {pipeline_mode = #tpu.pipeline_mode<synchronous>, transform_indices = @transform_4, window_bounds = array<i64: 64, 128>}, {pipeline_mode = #tpu.pipeline_mode<synchronous>, transform_indices = @transform_5, window_bounds = array<i64: 64, 128>}, {pipeline_mode = #tpu.pipeline_mode<synchronous>, transform_indices = @transform_6, window_bounds = array<i64: 1, 128>}, {pipeline_mode = #tpu.pipeline_mode<synchronous>, transform_indices = @transform_7, window_bounds = array<i64: 2, 64>}, {pipeline_mode = #tpu.pipeline_mode<synchronous>, transform_indices = @transform_8, window_bounds = array<i64: 1, 2>}, {transform_indices = @transform_9, window_bounds = array<i64: 8, 8, 128>}, {transform_indices = @transform_10, window_bounds = array<i64: 8, 32>}, {transform_indices = @transform_11, window_bounds = array<i64: 8, 32>}]} {
    %c0_i32 = arith.constant 0 : i32
    %0 = arith.cmpi eq, %arg1, %c0_i32 : i32
    %1 = arith.extui %0 : i1 to i32
    %c0_i32_0 = arith.constant 0 : i32
    %2 = arith.cmpi ne, %1, %c0_i32_0 : i32
    scf.if %2 {
      %cst_204 = arith.constant 0.000000e+00 : f32
      %939 = vector.broadcast %cst_204 : f32 to vector<8x32xf32>
      %c0_205 = arith.constant 0 : index
      %c0_206 = arith.constant 0 : index
      %940 = vector.load %arg16[%c0_205, %c0_206] : memref<8x32xf32, #tpu.memory_space<vmem>>, vector<8x32xf32>
      tpu.vector_store %arg16[%c0_205, %c0_206], %939 {strides = array<i32>} : memref<8x32xf32, #tpu.memory_space<vmem>>, vector<8x32xf32>,
      %cst_207 = arith.constant 0.000000e+00 : f32
      %941 = vector.broadcast %cst_207 : f32 to vector<8x32xf32>
      %c0_208 = arith.constant 0 : index
      %c0_209 = arith.constant 0 : index
      %942 = vector.load %arg17[%c0_208, %c0_209] : memref<8x32xf32, #tpu.memory_space<vmem>>, vector<8x32xf32>
      tpu.vector_store %arg17[%c0_208, %c0_209], %941 {strides = array<i32>} : memref<8x32xf32, #tpu.memory_space<vmem>>, vector<8x32xf32>,
      %cst_210 = arith.constant 0.000000e+00 : f32
      %943 = vector.broadcast %cst_210 : f32 to vector<8x1xf32>
      %c0_211 = arith.constant 0 : index
      %c0_212 = arith.constant 0 : index
      %944 = vector.load %arg18[%c0_211, %c0_212] : memref<8x1xf32, #tpu.memory_space<vmem>>, vector<8x1xf32>
      tpu.vector_store %arg18[%c0_211, %c0_212], %943 {strides = array<i32>} : memref<8x1xf32, #tpu.memory_space<vmem>>, vector<8x1xf32>,
      %cst_213 = arith.constant 0.000000e+00 : f32
      %945 = vector.broadcast %cst_213 : f32 to vector<8x32xf32>
      %c0_214 = arith.constant 0 : index
      %c0_215 = arith.constant 0 : index
      %946 = vector.load %arg19[%c0_214, %c0_215] : memref<8x32xf32, #tpu.memory_space<vmem>>, vector<8x32xf32>
      tpu.vector_store %arg19[%c0_214, %c0_215], %945 {strides = array<i32>} : memref<8x32xf32, #tpu.memory_space<vmem>>, vector<8x32xf32>,
      %cst_216 = arith.constant 0.000000e+00 : f32
      %947 = vector.broadcast %cst_216 : f32 to vector<8x32xf32>
      %c0_217 = arith.constant 0 : index
      %c0_218 = arith.constant 0 : index
      %948 = vector.load %arg20[%c0_217, %c0_218] : memref<8x32xf32, #tpu.memory_space<vmem>>, vector<8x32xf32>
      tpu.vector_store %arg20[%c0_217, %c0_218], %947 {strides = array<i32>} : memref<8x32xf32, #tpu.memory_space<vmem>>, vector<8x32xf32>,
      %cst_219 = arith.constant 0.000000e+00 : f32
      %949 = vector.broadcast %cst_219 : f32 to vector<8x1xf32>
      %c0_220 = arith.constant 0 : index
      %c0_221 = arith.constant 0 : index
      %950 = vector.load %arg21[%c0_220, %c0_221] : memref<8x1xf32, #tpu.memory_space<vmem>>, vector<8x1xf32>
      tpu.vector_store %arg21[%c0_220, %c0_221], %949 {strides = array<i32>} : memref<8x1xf32, #tpu.memory_space<vmem>>, vector<8x1xf32>,
    } else {
    }
    %c0 = arith.constant 0 : index
    %c0_1 = arith.constant 0 : index
    %3 = vector.load %arg6[%c0, %c0_1] : memref<64x128xf32, #tpu.memory_space<vmem>>, vector<64x128xf32>
    %c0_2 = arith.constant 0 : index
    %c0_3 = arith.constant 0 : index
    %4 = vector.load %arg7[%c0_2, %c0_3] : memref<64x128xf32, #tpu.memory_space<vmem>>, vector<64x128xf32>
    %c0_4 = arith.constant 0 : index
    %c0_5 = arith.constant 0 : index
    %5 = vector.load %arg8[%c0_4, %c0_5] : memref<1x128xf32, #tpu.memory_space<vmem>>, vector<1x128xf32>
    %c0_6 = arith.constant 0 : index
    %c0_7 = arith.constant 0 : index
    %6 = vector.load %arg9[%c0_6, %c0_7] : memref<2x64xf32, #tpu.memory_space<vmem>>, vector<2x64xf32>
    %c0_8 = arith.constant 0 : index
    %c0_9 = arith.constant 0 : index
    %7 = vector.load %arg10[%c0_8, %c0_9] : memref<1x2xf32, #tpu.memory_space<vmem>>, vector<1x2xf32>
    %8 = vector.extract_strided_slice %6 {offsets = [0, 0], sizes = [1, 64], strides = [1, 1]} : vector<2x64xf32> to vector<1x64xf32>
    %9 = vector.extract_strided_slice %6 {offsets = [1, 0], sizes = [1, 64], strides = [1, 1]} : vector<2x64xf32> to vector<1x64xf32>
    %10 = vector.extract_strided_slice %7 {offsets = [0, 0], sizes = [1, 1], strides = [1, 1]} : vector<1x2xf32> to vector<1x1xf32>
    %11 = vector.extract_strided_slice %7 {offsets = [0, 1], sizes = [1, 1], strides = [1, 1]} : vector<1x2xf32> to vector<1x1xf32>
    %c0_10 = arith.constant 0 : index
    %c0_11 = arith.constant 0 : index
    %c0_12 = arith.constant 0 : index
    %c0_13 = arith.constant 0 : index
    %12 = vector.load %arg2[%c0_10, %c0_11, %c0_12, %c0_13] : memref<1x1x64x16xf32, #tpu.memory_space<vmem>>, vector<1x1x64x16xf32>
    %13 = vector.shape_cast %12 : vector<1x1x64x16xf32> to vector<64x16xf32>
    %c0_14 = arith.constant 0 : index
    %c0_15 = arith.constant 0 : index
    %14 = vector.load %arg3[%c0_14, %c0_15] : memref<16x128xf32, #tpu.memory_space<vmem>>, vector<16x128xf32>
    %cst = arith.constant dense<0.000000e+00> : vector<64x128xf32>
    %15 = tpu.matmul %13, %14, %cst {dimension_numbers = #tpu.dot_dimension_numbers<[1], [0], [0], [1], [0, 0, 1, 1], [], []>} : vector<64x16xf32>, vector<16x128xf32>, vector<64x128xf32> -> vector<64x128xf32>
    %c0_16 = arith.constant 0 : index
    %c0_17 = arith.constant 0 : index
    %16 = vector.load %arg4[%c0_16, %c0_17] : memref<1x128xf32, #tpu.memory_space<vmem>>, vector<1x128xf32>
    %17 = vector.broadcast %16 : vector<1x128xf32> to vector<64x128xf32>
    %18 = arith.addf %15, %17 : vector<64x128xf32>
    %c0_18 = arith.constant 0 : index
    %c0_19 = arith.constant 0 : index
    %19 = vector.load %arg14[%c0_18, %c0_19] : memref<64x128xf32, #tpu.memory_space<vmem>>, vector<64x128xf32>
    tpu.vector_store %arg14[%c0_18, %c0_19], %18 {strides = array<i32>} : memref<64x128xf32, #tpu.memory_space<vmem>>, vector<64x128xf32>,
    %c0_20 = arith.constant 0 : index
    %c0_21 = arith.constant 0 : index
    %20 = vector.load %arg5[%c0_20, %c0_21] : memref<1x16xf32, #tpu.memory_space<vmem>>, vector<1x16xf32>
    %21 = vector.broadcast %20 : vector<1x16xf32> to vector<64x16xf32>
    %22 = arith.mulf %13, %21 : vector<64x16xf32>
    %cst_22 = arith.constant dense<0.000000e+00> : vector<64xf32>
    %23 = vector.multi_reduction <add>, %22, %cst_22 [1] : vector<64x16xf32> to vector<64xf32>
    %24 = vector.shape_cast %23 : vector<64xf32> to vector<64x1xf32>
    %25 = vector.broadcast %10 : vector<1x1xf32> to vector<64x1xf32>
    %26 = arith.addf %24, %25 : vector<64x1xf32>
    %c0_23 = arith.constant 0 : index
    %c0_24 = arith.constant 0 : index
    %27 = vector.load %arg15[%c0_23, %c0_24] : memref<64x1xf32, #tpu.memory_space<vmem>>, vector<64x1xf32>
    tpu.vector_store %arg15[%c0_23, %c0_24], %26 {strides = array<i32>} : memref<64x1xf32, #tpu.memory_space<vmem>>, vector<64x1xf32>,
    %c0_25 = arith.constant 0 : index
    %c0_26 = arith.constant 0 : index
    %28 = vector.load %arg16[%c0_25, %c0_26] : memref<8x32xf32, #tpu.memory_space<vmem>>, vector<8x32xf32>
    %c0_27 = arith.constant 0 : index
    %c0_28 = arith.constant 0 : index
    %29 = vector.load %arg17[%c0_27, %c0_28] : memref<8x32xf32, #tpu.memory_space<vmem>>, vector<8x32xf32>
    %c0_29 = arith.constant 0 : index
    %c0_30 = arith.constant 0 : index
    %30 = vector.load %arg18[%c0_29, %c0_30] : memref<8x1xf32, #tpu.memory_space<vmem>>, vector<8x1xf32>
    %c0_31 = arith.constant 0 : index
    %c0_32 = arith.constant 0 : index
    %31 = vector.load %arg19[%c0_31, %c0_32] : memref<8x32xf32, #tpu.memory_space<vmem>>, vector<8x32xf32>
    %c0_33 = arith.constant 0 : index
    %c0_34 = arith.constant 0 : index
    %32 = vector.load %arg20[%c0_33, %c0_34] : memref<8x32xf32, #tpu.memory_space<vmem>>, vector<8x32xf32>
    %c0_35 = arith.constant 0 : index
    %c0_36 = arith.constant 0 : index
    %33 = vector.load %arg21[%c0_35, %c0_36] : memref<8x1xf32, #tpu.memory_space<vmem>>, vector<8x1xf32>
    %c0_i32_37 = arith.constant 0 : i32
    %c8_i32 = arith.constant 8 : i32
    %34 = arith.muli %c0_i32_37, %c8_i32 : i32
    %35 = tpu.assume_multiple %34, 8 : i32
    %36 = vector.broadcast %30 : vector<8x1xf32> to vector<8x32xf32>
    %37 = arith.mulf %36, %31 : vector<8x32xf32>
    %38 = tpu.concatenate %28, %37 in 1 : vector<8x32xf32>, vector<8x32xf32> -> vector<8x64xf32>
    %39 = arith.index_cast %35 : i32 to index
    %c0_38 = arith.constant 0 : index
    %40 = vector.load %arg14[%39, %c0_38] : memref<64x128xf32, #tpu.memory_space<vmem>>, vector<8x128xf32>
    %cst_39 = arith.constant dense<0.000000e+00> : vector<8x128xf32>
    %41 = tpu.matmul %38, %3, %cst_39 {dimension_numbers = #tpu.dot_dimension_numbers<[1], [0], [0], [1], [0, 0, 1, 1], [], []>} : vector<8x64xf32>, vector<64x128xf32>, vector<8x128xf32> -> vector<8x128xf32>
    %42 = arith.addf %40, %41 : vector<8x128xf32>
    %43 = arith.index_cast %35 : i32 to index
    %c0_40 = arith.constant 0 : index
    %44 = vector.load %arg15[%43, %c0_40] : memref<64x1xf32, #tpu.memory_space<vmem>>, vector<8x1xf32>
    %45 = vector.broadcast %8 : vector<1x64xf32> to vector<8x64xf32>
    %46 = arith.mulf %38, %45 : vector<8x64xf32>
    %cst_41 = arith.constant dense<0.000000e+00> : vector<8xf32>
    %47 = vector.multi_reduction <add>, %46, %cst_41 [1] : vector<8x64xf32> to vector<8xf32>
    %48 = vector.shape_cast %47 : vector<8xf32> to vector<8x1xf32>
    %49 = arith.addf %44, %48 : vector<8x1xf32>
    %50 = arith.negf %42 : vector<8x128xf32>
    %51 = math.exp %50 : vector<8x128xf32>
    %cst_42 = arith.constant 1.000000e+00 : f32
    %52 = vector.broadcast %cst_42 : f32 to vector<8x128xf32>
    %53 = arith.addf %52, %51 : vector<8x128xf32>
    %54 = arith.divf %52, %53 : vector<8x128xf32>
    %55 = math.tanh %42 : vector<8x128xf32>
    %56 = vector.extract_strided_slice %54 {offsets = [0, 0], sizes = [8, 32], strides = [1, 1]} : vector<8x128xf32> to vector<8x32xf32>
    %57 = vector.extract_strided_slice %54 {offsets = [0, 32], sizes = [8, 32], strides = [1, 1]} : vector<8x128xf32> to vector<8x32xf32>
    %58 = vector.extract_strided_slice %54 {offsets = [0, 64], sizes = [8, 32], strides = [1, 1]} : vector<8x128xf32> to vector<8x32xf32>
    %59 = vector.extract_strided_slice %55 {offsets = [0, 96], sizes = [8, 32], strides = [1, 1]} : vector<8x128xf32> to vector<8x32xf32>
    %60 = arith.mulf %57, %59 : vector<8x32xf32>
    %61 = vector.broadcast %30 : vector<8x1xf32> to vector<8x32xf32>
    %62 = arith.mulf %61, %60 : vector<8x32xf32>
    %cst_43 = arith.constant 1.000000e+00 : f32
    %63 = vector.broadcast %cst_43 : f32 to vector<8x1xf32>
    %64 = arith.subf %63, %30 : vector<8x1xf32>
    %65 = arith.mulf %56, %29 : vector<8x32xf32>
    %66 = arith.addf %65, %60 : vector<8x32xf32>
    %67 = vector.broadcast %64 : vector<8x1xf32> to vector<8x32xf32>
    %68 = arith.mulf %67, %66 : vector<8x32xf32>
    %69 = arith.addf %62, %68 : vector<8x32xf32>
    %70 = math.tanh %69 : vector<8x32xf32>
    %71 = arith.mulf %58, %70 : vector<8x32xf32>
    %cst_44 = arith.constant 1.000000e+00 : f32
    %72 = vector.broadcast %cst_44 : f32 to vector<8x1xf32>
    %73 = arith.mulf %72, %49 : vector<8x1xf32>
    %cst_45 = arith.constant 0.000000e+00 : f32
    %74 = vector.broadcast %cst_45 : f32 to vector<8x1xf32>
    %75 = arith.cmpf ogt, %73, %74 : vector<8x1xf32>
    %76 = arith.extui %75 : vector<8x1xi1> to vector<8x1xi32>
    %77 = arith.sitofp %76 : vector<8x1xi32> to vector<8x1xf32>
    %78 = vector.broadcast %77 : vector<8x1xf32> to vector<8x32xf32>
    %79 = arith.mulf %78, %31 : vector<8x32xf32>
    %80 = tpu.concatenate %71, %79 in 1 : vector<8x32xf32>, vector<8x32xf32> -> vector<8x64xf32>
    %cst_46 = arith.constant dense<0.000000e+00> : vector<8x128xf32>
    %81 = tpu.matmul %80, %4, %cst_46 {dimension_numbers = #tpu.dot_dimension_numbers<[1], [0], [0], [1], [0, 0, 1, 1], [], []>} : vector<8x64xf32>, vector<64x128xf32>, vector<8x128xf32> -> vector<8x128xf32>
    %82 = vector.broadcast %5 : vector<1x128xf32> to vector<8x128xf32>
    %83 = arith.addf %81, %82 : vector<8x128xf32>
    %84 = vector.broadcast %9 : vector<1x64xf32> to vector<8x64xf32>
    %85 = arith.mulf %80, %84 : vector<8x64xf32>
    %cst_47 = arith.constant dense<0.000000e+00> : vector<8xf32>
    %86 = vector.multi_reduction <add>, %85, %cst_47 [1] : vector<8x64xf32> to vector<8xf32>
    %87 = vector.shape_cast %86 : vector<8xf32> to vector<8x1xf32>
    %88 = vector.broadcast %11 : vector<1x1xf32> to vector<8x1xf32>
    %89 = arith.addf %87, %88 : vector<8x1xf32>
    %90 = arith.negf %83 : vector<8x128xf32>
    %91 = math.exp %90 : vector<8x128xf32>
    %cst_48 = arith.constant 1.000000e+00 : f32
    %92 = vector.broadcast %cst_48 : f32 to vector<8x128xf32>
    %93 = arith.addf %92, %91 : vector<8x128xf32>
    %94 = arith.divf %92, %93 : vector<8x128xf32>
    %95 = math.tanh %83 : vector<8x128xf32>
    %96 = vector.extract_strided_slice %94 {offsets = [0, 0], sizes = [8, 32], strides = [1, 1]} : vector<8x128xf32> to vector<8x32xf32>
    %97 = vector.extract_strided_slice %94 {offsets = [0, 32], sizes = [8, 32], strides = [1, 1]} : vector<8x128xf32> to vector<8x32xf32>
    %98 = vector.extract_strided_slice %94 {offsets = [0, 64], sizes = [8, 32], strides = [1, 1]} : vector<8x128xf32> to vector<8x32xf32>
    %99 = vector.extract_strided_slice %95 {offsets = [0, 96], sizes = [8, 32], strides = [1, 1]} : vector<8x128xf32> to vector<8x32xf32>
    %100 = arith.mulf %97, %99 : vector<8x32xf32>
    %cst_49 = arith.constant 1.000000e+00 : f32
    %101 = vector.broadcast %cst_49 : f32 to vector<8x1xf32>
    %102 = arith.subf %101, %33 : vector<8x1xf32>
    %103 = vector.broadcast %33 : vector<8x1xf32> to vector<8x32xf32>
    %104 = arith.mulf %103, %100 : vector<8x32xf32>
    %cst_50 = arith.constant 1.000000e+00 : f32
    %105 = vector.broadcast %cst_50 : f32 to vector<8x1xf32>
    %106 = arith.subf %105, %77 : vector<8x1xf32>
    %107 = arith.mulf %102, %106 : vector<8x1xf32>
    %108 = vector.broadcast %107 : vector<8x1xf32> to vector<8x32xf32>
    %109 = arith.mulf %108, %32 : vector<8x32xf32>
    %110 = arith.addf %104, %109 : vector<8x32xf32>
    %111 = arith.mulf %102, %77 : vector<8x1xf32>
    %112 = arith.mulf %96, %32 : vector<8x32xf32>
    %113 = arith.addf %112, %100 : vector<8x32xf32>
    %114 = vector.broadcast %111 : vector<8x1xf32> to vector<8x32xf32>
    %115 = arith.mulf %114, %113 : vector<8x32xf32>
    %116 = arith.addf %110, %115 : vector<8x32xf32>
    %117 = math.tanh %116 : vector<8x32xf32>
    %118 = arith.mulf %98, %117 : vector<8x32xf32>
    %119 = vector.broadcast %33 : vector<8x1xf32> to vector<8x32xf32>
    %120 = arith.mulf %119, %118 : vector<8x32xf32>
    %cst_51 = arith.constant 1.000000e+00 : f32
    %121 = vector.broadcast %cst_51 : f32 to vector<8x1xf32>
    %122 = arith.subf %121, %77 : vector<8x1xf32>
    %123 = arith.mulf %102, %122 : vector<8x1xf32>
    %124 = vector.broadcast %123 : vector<8x1xf32> to vector<8x32xf32>
    %125 = arith.mulf %124, %31 : vector<8x32xf32>
    %126 = arith.addf %120, %125 : vector<8x32xf32>
    %127 = arith.mulf %102, %77 : vector<8x1xf32>
    %128 = vector.broadcast %127 : vector<8x1xf32> to vector<8x32xf32>
    %129 = arith.mulf %128, %118 : vector<8x32xf32>
    %130 = arith.addf %126, %129 : vector<8x32xf32>
    %cst_52 = arith.constant 1.000000e+00 : f32
    %131 = vector.broadcast %cst_52 : f32 to vector<8x1xf32>
    %132 = arith.mulf %131, %89 : vector<8x1xf32>
    %cst_53 = arith.constant 0.000000e+00 : f32
    %133 = vector.broadcast %cst_53 : f32 to vector<8x1xf32>
    %134 = arith.cmpf ogt, %132, %133 : vector<8x1xf32>
    %135 = arith.extui %134 : vector<8x1xi1> to vector<8x1xi32>
    %136 = arith.sitofp %135 : vector<8x1xi32> to vector<8x1xf32>
    %137 = vector.shape_cast %77 : vector<8x1xf32> to vector<8x1xf32>
    %138 = vector.broadcast %137 : vector<8x1xf32> to vector<8x32xf32>
    %139 = vector.shape_cast %136 : vector<8x1xf32> to vector<8x1xf32>
    %140 = vector.broadcast %139 : vector<8x1xf32> to vector<8x32xf32>
    %141 = tpu.concatenate %71, %130, %138, %140 in 1 : vector<8x32xf32>, vector<8x32xf32>, vector<8x32xf32>, vector<8x32xf32> -> vector<8x128xf32>
    %142 = arith.index_cast %c0_i32_37 : i32 to index
    %c0_54 = arith.constant 0 : index
    %c0_55 = arith.constant 0 : index
    %143 = vector.load %arg11[%142, %c0_54, %c0_55] : memref<8x8x128xf32, #tpu.memory_space<vmem>>, vector<1x8x128xf32>
    %144 = vector.shape_cast %143 : vector<1x8x128xf32> to vector<8x128xf32>
    %145 = vector.shape_cast %141 : vector<8x128xf32> to vector<1x8x128xf32>
    tpu.vector_store %arg11[%142, %c0_54, %c0_55], %145 {strides = array<i32>} : memref<8x8x128xf32, #tpu.memory_space<vmem>>, vector<1x8x128xf32>,
    %c1_i32 = arith.constant 1 : i32
    %c8_i32_56 = arith.constant 8 : i32
    %146 = arith.muli %c1_i32, %c8_i32_56 : i32
    %147 = tpu.assume_multiple %146, 8 : i32
    %148 = vector.broadcast %77 : vector<8x1xf32> to vector<8x32xf32>
    %149 = arith.mulf %148, %130 : vector<8x32xf32>
    %150 = tpu.concatenate %71, %149 in 1 : vector<8x32xf32>, vector<8x32xf32> -> vector<8x64xf32>
    %151 = arith.index_cast %147 : i32 to index
    %c0_57 = arith.constant 0 : index
    %152 = vector.load %arg14[%151, %c0_57] : memref<64x128xf32, #tpu.memory_space<vmem>>, vector<8x128xf32>
    %cst_58 = arith.constant dense<0.000000e+00> : vector<8x128xf32>
    %153 = tpu.matmul %150, %3, %cst_58 {dimension_numbers = #tpu.dot_dimension_numbers<[1], [0], [0], [1], [0, 0, 1, 1], [], []>} : vector<8x64xf32>, vector<64x128xf32>, vector<8x128xf32> -> vector<8x128xf32>
    %154 = arith.addf %152, %153 : vector<8x128xf32>
    %155 = arith.index_cast %147 : i32 to index
    %c0_59 = arith.constant 0 : index
    %156 = vector.load %arg15[%155, %c0_59] : memref<64x1xf32, #tpu.memory_space<vmem>>, vector<8x1xf32>
    %157 = vector.broadcast %8 : vector<1x64xf32> to vector<8x64xf32>
    %158 = arith.mulf %150, %157 : vector<8x64xf32>
    %cst_60 = arith.constant dense<0.000000e+00> : vector<8xf32>
    %159 = vector.multi_reduction <add>, %158, %cst_60 [1] : vector<8x64xf32> to vector<8xf32>
    %160 = vector.shape_cast %159 : vector<8xf32> to vector<8x1xf32>
    %161 = arith.addf %156, %160 : vector<8x1xf32>
    %162 = arith.negf %154 : vector<8x128xf32>
    %163 = math.exp %162 : vector<8x128xf32>
    %cst_61 = arith.constant 1.000000e+00 : f32
    %164 = vector.broadcast %cst_61 : f32 to vector<8x128xf32>
    %165 = arith.addf %164, %163 : vector<8x128xf32>
    %166 = arith.divf %164, %165 : vector<8x128xf32>
    %167 = math.tanh %154 : vector<8x128xf32>
    %168 = vector.extract_strided_slice %166 {offsets = [0, 0], sizes = [8, 32], strides = [1, 1]} : vector<8x128xf32> to vector<8x32xf32>
    %169 = vector.extract_strided_slice %166 {offsets = [0, 32], sizes = [8, 32], strides = [1, 1]} : vector<8x128xf32> to vector<8x32xf32>
    %170 = vector.extract_strided_slice %166 {offsets = [0, 64], sizes = [8, 32], strides = [1, 1]} : vector<8x128xf32> to vector<8x32xf32>
    %171 = vector.extract_strided_slice %167 {offsets = [0, 96], sizes = [8, 32], strides = [1, 1]} : vector<8x128xf32> to vector<8x32xf32>
    %172 = arith.mulf %169, %171 : vector<8x32xf32>
    %173 = vector.broadcast %77 : vector<8x1xf32> to vector<8x32xf32>
    %174 = arith.mulf %173, %172 : vector<8x32xf32>
    %cst_62 = arith.constant 1.000000e+00 : f32
    %175 = vector.broadcast %cst_62 : f32 to vector<8x1xf32>
    %176 = arith.subf %175, %77 : vector<8x1xf32>
    %177 = arith.mulf %168, %69 : vector<8x32xf32>
    %178 = arith.addf %177, %172 : vector<8x32xf32>
    %179 = vector.broadcast %176 : vector<8x1xf32> to vector<8x32xf32>
    %180 = arith.mulf %179, %178 : vector<8x32xf32>
    %181 = arith.addf %174, %180 : vector<8x32xf32>
    %182 = math.tanh %181 : vector<8x32xf32>
    %183 = arith.mulf %170, %182 : vector<8x32xf32>
    %cst_63 = arith.constant 1.000000e+00 : f32
    %184 = vector.broadcast %cst_63 : f32 to vector<8x1xf32>
    %185 = arith.mulf %184, %161 : vector<8x1xf32>
    %cst_64 = arith.constant 0.000000e+00 : f32
    %186 = vector.broadcast %cst_64 : f32 to vector<8x1xf32>
    %187 = arith.cmpf ogt, %185, %186 : vector<8x1xf32>
    %188 = arith.extui %187 : vector<8x1xi1> to vector<8x1xi32>
    %189 = arith.sitofp %188 : vector<8x1xi32> to vector<8x1xf32>
    %190 = vector.broadcast %189 : vector<8x1xf32> to vector<8x32xf32>
    %191 = arith.mulf %190, %130 : vector<8x32xf32>
    %192 = tpu.concatenate %183, %191 in 1 : vector<8x32xf32>, vector<8x32xf32> -> vector<8x64xf32>
    %cst_65 = arith.constant dense<0.000000e+00> : vector<8x128xf32>
    %193 = tpu.matmul %192, %4, %cst_65 {dimension_numbers = #tpu.dot_dimension_numbers<[1], [0], [0], [1], [0, 0, 1, 1], [], []>} : vector<8x64xf32>, vector<64x128xf32>, vector<8x128xf32> -> vector<8x128xf32>
    %194 = vector.broadcast %5 : vector<1x128xf32> to vector<8x128xf32>
    %195 = arith.addf %193, %194 : vector<8x128xf32>
    %196 = vector.broadcast %9 : vector<1x64xf32> to vector<8x64xf32>
    %197 = arith.mulf %192, %196 : vector<8x64xf32>
    %cst_66 = arith.constant dense<0.000000e+00> : vector<8xf32>
    %198 = vector.multi_reduction <add>, %197, %cst_66 [1] : vector<8x64xf32> to vector<8xf32>
    %199 = vector.shape_cast %198 : vector<8xf32> to vector<8x1xf32>
    %200 = vector.broadcast %11 : vector<1x1xf32> to vector<8x1xf32>
    %201 = arith.addf %199, %200 : vector<8x1xf32>
    %202 = arith.negf %195 : vector<8x128xf32>
    %203 = math.exp %202 : vector<8x128xf32>
    %cst_67 = arith.constant 1.000000e+00 : f32
    %204 = vector.broadcast %cst_67 : f32 to vector<8x128xf32>
    %205 = arith.addf %204, %203 : vector<8x128xf32>
    %206 = arith.divf %204, %205 : vector<8x128xf32>
    %207 = math.tanh %195 : vector<8x128xf32>
    %208 = vector.extract_strided_slice %206 {offsets = [0, 0], sizes = [8, 32], strides = [1, 1]} : vector<8x128xf32> to vector<8x32xf32>
    %209 = vector.extract_strided_slice %206 {offsets = [0, 32], sizes = [8, 32], strides = [1, 1]} : vector<8x128xf32> to vector<8x32xf32>
    %210 = vector.extract_strided_slice %206 {offsets = [0, 64], sizes = [8, 32], strides = [1, 1]} : vector<8x128xf32> to vector<8x32xf32>
    %211 = vector.extract_strided_slice %207 {offsets = [0, 96], sizes = [8, 32], strides = [1, 1]} : vector<8x128xf32> to vector<8x32xf32>
    %212 = arith.mulf %209, %211 : vector<8x32xf32>
    %cst_68 = arith.constant 1.000000e+00 : f32
    %213 = vector.broadcast %cst_68 : f32 to vector<8x1xf32>
    %214 = arith.subf %213, %136 : vector<8x1xf32>
    %215 = vector.broadcast %136 : vector<8x1xf32> to vector<8x32xf32>
    %216 = arith.mulf %215, %212 : vector<8x32xf32>
    %cst_69 = arith.constant 1.000000e+00 : f32
    %217 = vector.broadcast %cst_69 : f32 to vector<8x1xf32>
    %218 = arith.subf %217, %189 : vector<8x1xf32>
    %219 = arith.mulf %214, %218 : vector<8x1xf32>
    %220 = vector.broadcast %219 : vector<8x1xf32> to vector<8x32xf32>
    %221 = arith.mulf %220, %116 : vector<8x32xf32>
    %222 = arith.addf %216, %221 : vector<8x32xf32>
    %223 = arith.mulf %214, %189 : vector<8x1xf32>
    %224 = arith.mulf %208, %116 : vector<8x32xf32>
    %225 = arith.addf %224, %212 : vector<8x32xf32>
    %226 = vector.broadcast %223 : vector<8x1xf32> to vector<8x32xf32>
    %227 = arith.mulf %226, %225 : vector<8x32xf32>
    %228 = arith.addf %222, %227 : vector<8x32xf32>
    %229 = math.tanh %228 : vector<8x32xf32>
    %230 = arith.mulf %210, %229 : vector<8x32xf32>
    %231 = vector.broadcast %136 : vector<8x1xf32> to vector<8x32xf32>
    %232 = arith.mulf %231, %230 : vector<8x32xf32>
    %cst_70 = arith.constant 1.000000e+00 : f32
    %233 = vector.broadcast %cst_70 : f32 to vector<8x1xf32>
    %234 = arith.subf %233, %189 : vector<8x1xf32>
    %235 = arith.mulf %214, %234 : vector<8x1xf32>
    %236 = vector.broadcast %235 : vector<8x1xf32> to vector<8x32xf32>
    %237 = arith.mulf %236, %130 : vector<8x32xf32>
    %238 = arith.addf %232, %237 : vector<8x32xf32>
    %239 = arith.mulf %214, %189 : vector<8x1xf32>
    %240 = vector.broadcast %239 : vector<8x1xf32> to vector<8x32xf32>
    %241 = arith.mulf %240, %230 : vector<8x32xf32>
    %242 = arith.addf %238, %241 : vector<8x32xf32>
    %cst_71 = arith.constant 1.000000e+00 : f32
    %243 = vector.broadcast %cst_71 : f32 to vector<8x1xf32>
    %244 = arith.mulf %243, %201 : vector<8x1xf32>
    %cst_72 = arith.constant 0.000000e+00 : f32
    %245 = vector.broadcast %cst_72 : f32 to vector<8x1xf32>
    %246 = arith.cmpf ogt, %244, %245 : vector<8x1xf32>
    %247 = arith.extui %246 : vector<8x1xi1> to vector<8x1xi32>
    %248 = arith.sitofp %247 : vector<8x1xi32> to vector<8x1xf32>
    %249 = vector.shape_cast %189 : vector<8x1xf32> to vector<8x1xf32>
    %250 = vector.broadcast %249 : vector<8x1xf32> to vector<8x32xf32>
    %251 = vector.shape_cast %248 : vector<8x1xf32> to vector<8x1xf32>
    %252 = vector.broadcast %251 : vector<8x1xf32> to vector<8x32xf32>
    %253 = tpu.concatenate %183, %242, %250, %252 in 1 : vector<8x32xf32>, vector<8x32xf32>, vector<8x32xf32>, vector<8x32xf32> -> vector<8x128xf32>
    %254 = arith.index_cast %c1_i32 : i32 to index
    %c0_73 = arith.constant 0 : index
    %c0_74 = arith.constant 0 : index
    %255 = vector.load %arg11[%254, %c0_73, %c0_74] : memref<8x8x128xf32, #tpu.memory_space<vmem>>, vector<1x8x128xf32>
    %256 = vector.shape_cast %255 : vector<1x8x128xf32> to vector<8x128xf32>
    %257 = vector.shape_cast %253 : vector<8x128xf32> to vector<1x8x128xf32>
    tpu.vector_store %arg11[%254, %c0_73, %c0_74], %257 {strides = array<i32>} : memref<8x8x128xf32, #tpu.memory_space<vmem>>, vector<1x8x128xf32>,
    %c2_i32 = arith.constant 2 : i32
    %c8_i32_75 = arith.constant 8 : i32
    %258 = arith.muli %c2_i32, %c8_i32_75 : i32
    %259 = tpu.assume_multiple %258, 8 : i32
    %260 = vector.broadcast %189 : vector<8x1xf32> to vector<8x32xf32>
    %261 = arith.mulf %260, %242 : vector<8x32xf32>
    %262 = tpu.concatenate %183, %261 in 1 : vector<8x32xf32>, vector<8x32xf32> -> vector<8x64xf32>
    %263 = arith.index_cast %259 : i32 to index
    %c0_76 = arith.constant 0 : index
    %264 = vector.load %arg14[%263, %c0_76] : memref<64x128xf32, #tpu.memory_space<vmem>>, vector<8x128xf32>
    %cst_77 = arith.constant dense<0.000000e+00> : vector<8x128xf32>
    %265 = tpu.matmul %262, %3, %cst_77 {dimension_numbers = #tpu.dot_dimension_numbers<[1], [0], [0], [1], [0, 0, 1, 1], [], []>} : vector<8x64xf32>, vector<64x128xf32>, vector<8x128xf32> -> vector<8x128xf32>
    %266 = arith.addf %264, %265 : vector<8x128xf32>
    %267 = arith.index_cast %259 : i32 to index
    %c0_78 = arith.constant 0 : index
    %268 = vector.load %arg15[%267, %c0_78] : memref<64x1xf32, #tpu.memory_space<vmem>>, vector<8x1xf32>
    %269 = vector.broadcast %8 : vector<1x64xf32> to vector<8x64xf32>
    %270 = arith.mulf %262, %269 : vector<8x64xf32>
    %cst_79 = arith.constant dense<0.000000e+00> : vector<8xf32>
    %271 = vector.multi_reduction <add>, %270, %cst_79 [1] : vector<8x64xf32> to vector<8xf32>
    %272 = vector.shape_cast %271 : vector<8xf32> to vector<8x1xf32>
    %273 = arith.addf %268, %272 : vector<8x1xf32>
    %274 = arith.negf %266 : vector<8x128xf32>
    %275 = math.exp %274 : vector<8x128xf32>
    %cst_80 = arith.constant 1.000000e+00 : f32
    %276 = vector.broadcast %cst_80 : f32 to vector<8x128xf32>
    %277 = arith.addf %276, %275 : vector<8x128xf32>
    %278 = arith.divf %276, %277 : vector<8x128xf32>
    %279 = math.tanh %266 : vector<8x128xf32>
    %280 = vector.extract_strided_slice %278 {offsets = [0, 0], sizes = [8, 32], strides = [1, 1]} : vector<8x128xf32> to vector<8x32xf32>
    %281 = vector.extract_strided_slice %278 {offsets = [0, 32], sizes = [8, 32], strides = [1, 1]} : vector<8x128xf32> to vector<8x32xf32>
    %282 = vector.extract_strided_slice %278 {offsets = [0, 64], sizes = [8, 32], strides = [1, 1]} : vector<8x128xf32> to vector<8x32xf32>
    %283 = vector.extract_strided_slice %279 {offsets = [0, 96], sizes = [8, 32], strides = [1, 1]} : vector<8x128xf32> to vector<8x32xf32>
    %284 = arith.mulf %281, %283 : vector<8x32xf32>
    %285 = vector.broadcast %189 : vector<8x1xf32> to vector<8x32xf32>
    %286 = arith.mulf %285, %284 : vector<8x32xf32>
    %cst_81 = arith.constant 1.000000e+00 : f32
    %287 = vector.broadcast %cst_81 : f32 to vector<8x1xf32>
    %288 = arith.subf %287, %189 : vector<8x1xf32>
    %289 = arith.mulf %280, %181 : vector<8x32xf32>
    %290 = arith.addf %289, %284 : vector<8x32xf32>
    %291 = vector.broadcast %288 : vector<8x1xf32> to vector<8x32xf32>
    %292 = arith.mulf %291, %290 : vector<8x32xf32>
    %293 = arith.addf %286, %292 : vector<8x32xf32>
    %294 = math.tanh %293 : vector<8x32xf32>
    %295 = arith.mulf %282, %294 : vector<8x32xf32>
    %cst_82 = arith.constant 1.000000e+00 : f32
    %296 = vector.broadcast %cst_82 : f32 to vector<8x1xf32>
    %297 = arith.mulf %296, %273 : vector<8x1xf32>
    %cst_83 = arith.constant 0.000000e+00 : f32
    %298 = vector.broadcast %cst_83 : f32 to vector<8x1xf32>
    %299 = arith.cmpf ogt, %297, %298 : vector<8x1xf32>
    %300 = arith.extui %299 : vector<8x1xi1> to vector<8x1xi32>
    %301 = arith.sitofp %300 : vector<8x1xi32> to vector<8x1xf32>
    %302 = vector.broadcast %301 : vector<8x1xf32> to vector<8x32xf32>
    %303 = arith.mulf %302, %242 : vector<8x32xf32>
    %304 = tpu.concatenate %295, %303 in 1 : vector<8x32xf32>, vector<8x32xf32> -> vector<8x64xf32>
    %cst_84 = arith.constant dense<0.000000e+00> : vector<8x128xf32>
    %305 = tpu.matmul %304, %4, %cst_84 {dimension_numbers = #tpu.dot_dimension_numbers<[1], [0], [0], [1], [0, 0, 1, 1], [], []>} : vector<8x64xf32>, vector<64x128xf32>, vector<8x128xf32> -> vector<8x128xf32>
    %306 = vector.broadcast %5 : vector<1x128xf32> to vector<8x128xf32>
    %307 = arith.addf %305, %306 : vector<8x128xf32>
    %308 = vector.broadcast %9 : vector<1x64xf32> to vector<8x64xf32>
    %309 = arith.mulf %304, %308 : vector<8x64xf32>
    %cst_85 = arith.constant dense<0.000000e+00> : vector<8xf32>
    %310 = vector.multi_reduction <add>, %309, %cst_85 [1] : vector<8x64xf32> to vector<8xf32>
    %311 = vector.shape_cast %310 : vector<8xf32> to vector<8x1xf32>
    %312 = vector.broadcast %11 : vector<1x1xf32> to vector<8x1xf32>
    %313 = arith.addf %311, %312 : vector<8x1xf32>
    %314 = arith.negf %307 : vector<8x128xf32>
    %315 = math.exp %314 : vector<8x128xf32>
    %cst_86 = arith.constant 1.000000e+00 : f32
    %316 = vector.broadcast %cst_86 : f32 to vector<8x128xf32>
    %317 = arith.addf %316, %315 : vector<8x128xf32>
    %318 = arith.divf %316, %317 : vector<8x128xf32>
    %319 = math.tanh %307 : vector<8x128xf32>
    %320 = vector.extract_strided_slice %318 {offsets = [0, 0], sizes = [8, 32], strides = [1, 1]} : vector<8x128xf32> to vector<8x32xf32>
    %321 = vector.extract_strided_slice %318 {offsets = [0, 32], sizes = [8, 32], strides = [1, 1]} : vector<8x128xf32> to vector<8x32xf32>
    %322 = vector.extract_strided_slice %318 {offsets = [0, 64], sizes = [8, 32], strides = [1, 1]} : vector<8x128xf32> to vector<8x32xf32>
    %323 = vector.extract_strided_slice %319 {offsets = [0, 96], sizes = [8, 32], strides = [1, 1]} : vector<8x128xf32> to vector<8x32xf32>
    %324 = arith.mulf %321, %323 : vector<8x32xf32>
    %cst_87 = arith.constant 1.000000e+00 : f32
    %325 = vector.broadcast %cst_87 : f32 to vector<8x1xf32>
    %326 = arith.subf %325, %248 : vector<8x1xf32>
    %327 = vector.broadcast %248 : vector<8x1xf32> to vector<8x32xf32>
    %328 = arith.mulf %327, %324 : vector<8x32xf32>
    %cst_88 = arith.constant 1.000000e+00 : f32
    %329 = vector.broadcast %cst_88 : f32 to vector<8x1xf32>
    %330 = arith.subf %329, %301 : vector<8x1xf32>
    %331 = arith.mulf %326, %330 : vector<8x1xf32>
    %332 = vector.broadcast %331 : vector<8x1xf32> to vector<8x32xf32>
    %333 = arith.mulf %332, %228 : vector<8x32xf32>
    %334 = arith.addf %328, %333 : vector<8x32xf32>
    %335 = arith.mulf %326, %301 : vector<8x1xf32>
    %336 = arith.mulf %320, %228 : vector<8x32xf32>
    %337 = arith.addf %336, %324 : vector<8x32xf32>
    %338 = vector.broadcast %335 : vector<8x1xf32> to vector<8x32xf32>
    %339 = arith.mulf %338, %337 : vector<8x32xf32>
    %340 = arith.addf %334, %339 : vector<8x32xf32>
    %341 = math.tanh %340 : vector<8x32xf32>
    %342 = arith.mulf %322, %341 : vector<8x32xf32>
    %343 = vector.broadcast %248 : vector<8x1xf32> to vector<8x32xf32>
    %344 = arith.mulf %343, %342 : vector<8x32xf32>
    %cst_89 = arith.constant 1.000000e+00 : f32
    %345 = vector.broadcast %cst_89 : f32 to vector<8x1xf32>
    %346 = arith.subf %345, %301 : vector<8x1xf32>
    %347 = arith.mulf %326, %346 : vector<8x1xf32>
    %348 = vector.broadcast %347 : vector<8x1xf32> to vector<8x32xf32>
    %349 = arith.mulf %348, %242 : vector<8x32xf32>
    %350 = arith.addf %344, %349 : vector<8x32xf32>
    %351 = arith.mulf %326, %301 : vector<8x1xf32>
    %352 = vector.broadcast %351 : vector<8x1xf32> to vector<8x32xf32>
    %353 = arith.mulf %352, %342 : vector<8x32xf32>
    %354 = arith.addf %350, %353 : vector<8x32xf32>
    %cst_90 = arith.constant 1.000000e+00 : f32
    %355 = vector.broadcast %cst_90 : f32 to vector<8x1xf32>
    %356 = arith.mulf %355, %313 : vector<8x1xf32>
    %cst_91 = arith.constant 0.000000e+00 : f32
    %357 = vector.broadcast %cst_91 : f32 to vector<8x1xf32>
    %358 = arith.cmpf ogt, %356, %357 : vector<8x1xf32>
    %359 = arith.extui %358 : vector<8x1xi1> to vector<8x1xi32>
    %360 = arith.sitofp %359 : vector<8x1xi32> to vector<8x1xf32>
    %361 = vector.shape_cast %301 : vector<8x1xf32> to vector<8x1xf32>
    %362 = vector.broadcast %361 : vector<8x1xf32> to vector<8x32xf32>
    %363 = vector.shape_cast %360 : vector<8x1xf32> to vector<8x1xf32>
    %364 = vector.broadcast %363 : vector<8x1xf32> to vector<8x32xf32>
    %365 = tpu.concatenate %295, %354, %362, %364 in 1 : vector<8x32xf32>, vector<8x32xf32>, vector<8x32xf32>, vector<8x32xf32> -> vector<8x128xf32>
    %366 = arith.index_cast %c2_i32 : i32 to index
    %c0_92 = arith.constant 0 : index
    %c0_93 = arith.constant 0 : index
    %367 = vector.load %arg11[%366, %c0_92, %c0_93] : memref<8x8x128xf32, #tpu.memory_space<vmem>>, vector<1x8x128xf32>
    %368 = vector.shape_cast %367 : vector<1x8x128xf32> to vector<8x128xf32>
    %369 = vector.shape_cast %365 : vector<8x128xf32> to vector<1x8x128xf32>
    tpu.vector_store %arg11[%366, %c0_92, %c0_93], %369 {strides = array<i32>} : memref<8x8x128xf32, #tpu.memory_space<vmem>>, vector<1x8x128xf32>,
    %c3_i32 = arith.constant 3 : i32
    %c8_i32_94 = arith.constant 8 : i32
    %370 = arith.muli %c3_i32, %c8_i32_94 : i32
    %371 = tpu.assume_multiple %370, 8 : i32
    %372 = vector.broadcast %301 : vector<8x1xf32> to vector<8x32xf32>
    %373 = arith.mulf %372, %354 : vector<8x32xf32>
    %374 = tpu.concatenate %295, %373 in 1 : vector<8x32xf32>, vector<8x32xf32> -> vector<8x64xf32>
    %375 = arith.index_cast %371 : i32 to index
    %c0_95 = arith.constant 0 : index
    %376 = vector.load %arg14[%375, %c0_95] : memref<64x128xf32, #tpu.memory_space<vmem>>, vector<8x128xf32>
    %cst_96 = arith.constant dense<0.000000e+00> : vector<8x128xf32>
    %377 = tpu.matmul %374, %3, %cst_96 {dimension_numbers = #tpu.dot_dimension_numbers<[1], [0], [0], [1], [0, 0, 1, 1], [], []>} : vector<8x64xf32>, vector<64x128xf32>, vector<8x128xf32> -> vector<8x128xf32>
    %378 = arith.addf %376, %377 : vector<8x128xf32>
    %379 = arith.index_cast %371 : i32 to index
    %c0_97 = arith.constant 0 : index
    %380 = vector.load %arg15[%379, %c0_97] : memref<64x1xf32, #tpu.memory_space<vmem>>, vector<8x1xf32>
    %381 = vector.broadcast %8 : vector<1x64xf32> to vector<8x64xf32>
    %382 = arith.mulf %374, %381 : vector<8x64xf32>
    %cst_98 = arith.constant dense<0.000000e+00> : vector<8xf32>
    %383 = vector.multi_reduction <add>, %382, %cst_98 [1] : vector<8x64xf32> to vector<8xf32>
    %384 = vector.shape_cast %383 : vector<8xf32> to vector<8x1xf32>
    %385 = arith.addf %380, %384 : vector<8x1xf32>
    %386 = arith.negf %378 : vector<8x128xf32>
    %387 = math.exp %386 : vector<8x128xf32>
    %cst_99 = arith.constant 1.000000e+00 : f32
    %388 = vector.broadcast %cst_99 : f32 to vector<8x128xf32>
    %389 = arith.addf %388, %387 : vector<8x128xf32>
    %390 = arith.divf %388, %389 : vector<8x128xf32>
    %391 = math.tanh %378 : vector<8x128xf32>
    %392 = vector.extract_strided_slice %390 {offsets = [0, 0], sizes = [8, 32], strides = [1, 1]} : vector<8x128xf32> to vector<8x32xf32>
    %393 = vector.extract_strided_slice %390 {offsets = [0, 32], sizes = [8, 32], strides = [1, 1]} : vector<8x128xf32> to vector<8x32xf32>
    %394 = vector.extract_strided_slice %390 {offsets = [0, 64], sizes = [8, 32], strides = [1, 1]} : vector<8x128xf32> to vector<8x32xf32>
    %395 = vector.extract_strided_slice %391 {offsets = [0, 96], sizes = [8, 32], strides = [1, 1]} : vector<8x128xf32> to vector<8x32xf32>
    %396 = arith.mulf %393, %395 : vector<8x32xf32>
    %397 = vector.broadcast %301 : vector<8x1xf32> to vector<8x32xf32>
    %398 = arith.mulf %397, %396 : vector<8x32xf32>
    %cst_100 = arith.constant 1.000000e+00 : f32
    %399 = vector.broadcast %cst_100 : f32 to vector<8x1xf32>
    %400 = arith.subf %399, %301 : vector<8x1xf32>
    %401 = arith.mulf %392, %293 : vector<8x32xf32>
    %402 = arith.addf %401, %396 : vector<8x32xf32>
    %403 = vector.broadcast %400 : vector<8x1xf32> to vector<8x32xf32>
    %404 = arith.mulf %403, %402 : vector<8x32xf32>
    %405 = arith.addf %398, %404 : vector<8x32xf32>
    %406 = math.tanh %405 : vector<8x32xf32>
    %407 = arith.mulf %394, %406 : vector<8x32xf32>
    %cst_101 = arith.constant 1.000000e+00 : f32
    %408 = vector.broadcast %cst_101 : f32 to vector<8x1xf32>
    %409 = arith.mulf %408, %385 : vector<8x1xf32>
    %cst_102 = arith.constant 0.000000e+00 : f32
    %410 = vector.broadcast %cst_102 : f32 to vector<8x1xf32>
    %411 = arith.cmpf ogt, %409, %410 : vector<8x1xf32>
    %412 = arith.extui %411 : vector<8x1xi1> to vector<8x1xi32>
    %413 = arith.sitofp %412 : vector<8x1xi32> to vector<8x1xf32>
    %414 = vector.broadcast %413 : vector<8x1xf32> to vector<8x32xf32>
    %415 = arith.mulf %414, %354 : vector<8x32xf32>
    %416 = tpu.concatenate %407, %415 in 1 : vector<8x32xf32>, vector<8x32xf32> -> vector<8x64xf32>
    %cst_103 = arith.constant dense<0.000000e+00> : vector<8x128xf32>
    %417 = tpu.matmul %416, %4, %cst_103 {dimension_numbers = #tpu.dot_dimension_numbers<[1], [0], [0], [1], [0, 0, 1, 1], [], []>} : vector<8x64xf32>, vector<64x128xf32>, vector<8x128xf32> -> vector<8x128xf32>
    %418 = vector.broadcast %5 : vector<1x128xf32> to vector<8x128xf32>
    %419 = arith.addf %417, %418 : vector<8x128xf32>
    %420 = vector.broadcast %9 : vector<1x64xf32> to vector<8x64xf32>
    %421 = arith.mulf %416, %420 : vector<8x64xf32>
    %cst_104 = arith.constant dense<0.000000e+00> : vector<8xf32>
    %422 = vector.multi_reduction <add>, %421, %cst_104 [1] : vector<8x64xf32> to vector<8xf32>
    %423 = vector.shape_cast %422 : vector<8xf32> to vector<8x1xf32>
    %424 = vector.broadcast %11 : vector<1x1xf32> to vector<8x1xf32>
    %425 = arith.addf %423, %424 : vector<8x1xf32>
    %426 = arith.negf %419 : vector<8x128xf32>
    %427 = math.exp %426 : vector<8x128xf32>
    %cst_105 = arith.constant 1.000000e+00 : f32
    %428 = vector.broadcast %cst_105 : f32 to vector<8x128xf32>
    %429 = arith.addf %428, %427 : vector<8x128xf32>
    %430 = arith.divf %428, %429 : vector<8x128xf32>
    %431 = math.tanh %419 : vector<8x128xf32>
    %432 = vector.extract_strided_slice %430 {offsets = [0, 0], sizes = [8, 32], strides = [1, 1]} : vector<8x128xf32> to vector<8x32xf32>
    %433 = vector.extract_strided_slice %430 {offsets = [0, 32], sizes = [8, 32], strides = [1, 1]} : vector<8x128xf32> to vector<8x32xf32>
    %434 = vector.extract_strided_slice %430 {offsets = [0, 64], sizes = [8, 32], strides = [1, 1]} : vector<8x128xf32> to vector<8x32xf32>
    %435 = vector.extract_strided_slice %431 {offsets = [0, 96], sizes = [8, 32], strides = [1, 1]} : vector<8x128xf32> to vector<8x32xf32>
    %436 = arith.mulf %433, %435 : vector<8x32xf32>
    %cst_106 = arith.constant 1.000000e+00 : f32
    %437 = vector.broadcast %cst_106 : f32 to vector<8x1xf32>
    %438 = arith.subf %437, %360 : vector<8x1xf32>
    %439 = vector.broadcast %360 : vector<8x1xf32> to vector<8x32xf32>
    %440 = arith.mulf %439, %436 : vector<8x32xf32>
    %cst_107 = arith.constant 1.000000e+00 : f32
    %441 = vector.broadcast %cst_107 : f32 to vector<8x1xf32>
    %442 = arith.subf %441, %413 : vector<8x1xf32>
    %443 = arith.mulf %438, %442 : vector<8x1xf32>
    %444 = vector.broadcast %443 : vector<8x1xf32> to vector<8x32xf32>
    %445 = arith.mulf %444, %340 : vector<8x32xf32>
    %446 = arith.addf %440, %445 : vector<8x32xf32>
    %447 = arith.mulf %438, %413 : vector<8x1xf32>
    %448 = arith.mulf %432, %340 : vector<8x32xf32>
    %449 = arith.addf %448, %436 : vector<8x32xf32>
    %450 = vector.broadcast %447 : vector<8x1xf32> to vector<8x32xf32>
    %451 = arith.mulf %450, %449 : vector<8x32xf32>
    %452 = arith.addf %446, %451 : vector<8x32xf32>
    %453 = math.tanh %452 : vector<8x32xf32>
    %454 = arith.mulf %434, %453 : vector<8x32xf32>
    %455 = vector.broadcast %360 : vector<8x1xf32> to vector<8x32xf32>
    %456 = arith.mulf %455, %454 : vector<8x32xf32>
    %cst_108 = arith.constant 1.000000e+00 : f32
    %457 = vector.broadcast %cst_108 : f32 to vector<8x1xf32>
    %458 = arith.subf %457, %413 : vector<8x1xf32>
    %459 = arith.mulf %438, %458 : vector<8x1xf32>
    %460 = vector.broadcast %459 : vector<8x1xf32> to vector<8x32xf32>
    %461 = arith.mulf %460, %354 : vector<8x32xf32>
    %462 = arith.addf %456, %461 : vector<8x32xf32>
    %463 = arith.mulf %438, %413 : vector<8x1xf32>
    %464 = vector.broadcast %463 : vector<8x1xf32> to vector<8x32xf32>
    %465 = arith.mulf %464, %454 : vector<8x32xf32>
    %466 = arith.addf %462, %465 : vector<8x32xf32>
    %cst_109 = arith.constant 1.000000e+00 : f32
    %467 = vector.broadcast %cst_109 : f32 to vector<8x1xf32>
    %468 = arith.mulf %467, %425 : vector<8x1xf32>
    %cst_110 = arith.constant 0.000000e+00 : f32
    %469 = vector.broadcast %cst_110 : f32 to vector<8x1xf32>
    %470 = arith.cmpf ogt, %468, %469 : vector<8x1xf32>
    %471 = arith.extui %470 : vector<8x1xi1> to vector<8x1xi32>
    %472 = arith.sitofp %471 : vector<8x1xi32> to vector<8x1xf32>
    %473 = vector.shape_cast %413 : vector<8x1xf32> to vector<8x1xf32>
    %474 = vector.broadcast %473 : vector<8x1xf32> to vector<8x32xf32>
    %475 = vector.shape_cast %472 : vector<8x1xf32> to vector<8x1xf32>
    %476 = vector.broadcast %475 : vector<8x1xf32> to vector<8x32xf32>
    %477 = tpu.concatenate %407, %466, %474, %476 in 1 : vector<8x32xf32>, vector<8x32xf32>, vector<8x32xf32>, vector<8x32xf32> -> vector<8x128xf32>
    %478 = arith.index_cast %c3_i32 : i32 to index
    %c0_111 = arith.constant 0 : index
    %c0_112 = arith.constant 0 : index
    %479 = vector.load %arg11[%478, %c0_111, %c0_112] : memref<8x8x128xf32, #tpu.memory_space<vmem>>, vector<1x8x128xf32>
    %480 = vector.shape_cast %479 : vector<1x8x128xf32> to vector<8x128xf32>
    %481 = vector.shape_cast %477 : vector<8x128xf32> to vector<1x8x128xf32>
    tpu.vector_store %arg11[%478, %c0_111, %c0_112], %481 {strides = array<i32>} : memref<8x8x128xf32, #tpu.memory_space<vmem>>, vector<1x8x128xf32>,
    %c4_i32 = arith.constant 4 : i32
    %c8_i32_113 = arith.constant 8 : i32
    %482 = arith.muli %c4_i32, %c8_i32_113 : i32
    %483 = tpu.assume_multiple %482, 8 : i32
    %484 = vector.broadcast %413 : vector<8x1xf32> to vector<8x32xf32>
    %485 = arith.mulf %484, %466 : vector<8x32xf32>
    %486 = tpu.concatenate %407, %485 in 1 : vector<8x32xf32>, vector<8x32xf32> -> vector<8x64xf32>
    %487 = arith.index_cast %483 : i32 to index
    %c0_114 = arith.constant 0 : index
    %488 = vector.load %arg14[%487, %c0_114] : memref<64x128xf32, #tpu.memory_space<vmem>>, vector<8x128xf32>
    %cst_115 = arith.constant dense<0.000000e+00> : vector<8x128xf32>
    %489 = tpu.matmul %486, %3, %cst_115 {dimension_numbers = #tpu.dot_dimension_numbers<[1], [0], [0], [1], [0, 0, 1, 1], [], []>} : vector<8x64xf32>, vector<64x128xf32>, vector<8x128xf32> -> vector<8x128xf32>
    %490 = arith.addf %488, %489 : vector<8x128xf32>
    %491 = arith.index_cast %483 : i32 to index
    %c0_116 = arith.constant 0 : index
    %492 = vector.load %arg15[%491, %c0_116] : memref<64x1xf32, #tpu.memory_space<vmem>>, vector<8x1xf32>
    %493 = vector.broadcast %8 : vector<1x64xf32> to vector<8x64xf32>
    %494 = arith.mulf %486, %493 : vector<8x64xf32>
    %cst_117 = arith.constant dense<0.000000e+00> : vector<8xf32>
    %495 = vector.multi_reduction <add>, %494, %cst_117 [1] : vector<8x64xf32> to vector<8xf32>
    %496 = vector.shape_cast %495 : vector<8xf32> to vector<8x1xf32>
    %497 = arith.addf %492, %496 : vector<8x1xf32>
    %498 = arith.negf %490 : vector<8x128xf32>
    %499 = math.exp %498 : vector<8x128xf32>
    %cst_118 = arith.constant 1.000000e+00 : f32
    %500 = vector.broadcast %cst_118 : f32 to vector<8x128xf32>
    %501 = arith.addf %500, %499 : vector<8x128xf32>
    %502 = arith.divf %500, %501 : vector<8x128xf32>
    %503 = math.tanh %490 : vector<8x128xf32>
    %504 = vector.extract_strided_slice %502 {offsets = [0, 0], sizes = [8, 32], strides = [1, 1]} : vector<8x128xf32> to vector<8x32xf32>
    %505 = vector.extract_strided_slice %502 {offsets = [0, 32], sizes = [8, 32], strides = [1, 1]} : vector<8x128xf32> to vector<8x32xf32>
    %506 = vector.extract_strided_slice %502 {offsets = [0, 64], sizes = [8, 32], strides = [1, 1]} : vector<8x128xf32> to vector<8x32xf32>
    %507 = vector.extract_strided_slice %503 {offsets = [0, 96], sizes = [8, 32], strides = [1, 1]} : vector<8x128xf32> to vector<8x32xf32>
    %508 = arith.mulf %505, %507 : vector<8x32xf32>
    %509 = vector.broadcast %413 : vector<8x1xf32> to vector<8x32xf32>
    %510 = arith.mulf %509, %508 : vector<8x32xf32>
    %cst_119 = arith.constant 1.000000e+00 : f32
    %511 = vector.broadcast %cst_119 : f32 to vector<8x1xf32>
    %512 = arith.subf %511, %413 : vector<8x1xf32>
    %513 = arith.mulf %504, %405 : vector<8x32xf32>
    %514 = arith.addf %513, %508 : vector<8x32xf32>
    %515 = vector.broadcast %512 : vector<8x1xf32> to vector<8x32xf32>
    %516 = arith.mulf %515, %514 : vector<8x32xf32>
    %517 = arith.addf %510, %516 : vector<8x32xf32>
    %518 = math.tanh %517 : vector<8x32xf32>
    %519 = arith.mulf %506, %518 : vector<8x32xf32>
    %cst_120 = arith.constant 1.000000e+00 : f32
    %520 = vector.broadcast %cst_120 : f32 to vector<8x1xf32>
    %521 = arith.mulf %520, %497 : vector<8x1xf32>
    %cst_121 = arith.constant 0.000000e+00 : f32
    %522 = vector.broadcast %cst_121 : f32 to vector<8x1xf32>
    %523 = arith.cmpf ogt, %521, %522 : vector<8x1xf32>
    %524 = arith.extui %523 : vector<8x1xi1> to vector<8x1xi32>
    %525 = arith.sitofp %524 : vector<8x1xi32> to vector<8x1xf32>
    %526 = vector.broadcast %525 : vector<8x1xf32> to vector<8x32xf32>
    %527 = arith.mulf %526, %466 : vector<8x32xf32>
    %528 = tpu.concatenate %519, %527 in 1 : vector<8x32xf32>, vector<8x32xf32> -> vector<8x64xf32>
    %cst_122 = arith.constant dense<0.000000e+00> : vector<8x128xf32>
    %529 = tpu.matmul %528, %4, %cst_122 {dimension_numbers = #tpu.dot_dimension_numbers<[1], [0], [0], [1], [0, 0, 1, 1], [], []>} : vector<8x64xf32>, vector<64x128xf32>, vector<8x128xf32> -> vector<8x128xf32>
    %530 = vector.broadcast %5 : vector<1x128xf32> to vector<8x128xf32>
    %531 = arith.addf %529, %530 : vector<8x128xf32>
    %532 = vector.broadcast %9 : vector<1x64xf32> to vector<8x64xf32>
    %533 = arith.mulf %528, %532 : vector<8x64xf32>
    %cst_123 = arith.constant dense<0.000000e+00> : vector<8xf32>
    %534 = vector.multi_reduction <add>, %533, %cst_123 [1] : vector<8x64xf32> to vector<8xf32>
    %535 = vector.shape_cast %534 : vector<8xf32> to vector<8x1xf32>
    %536 = vector.broadcast %11 : vector<1x1xf32> to vector<8x1xf32>
    %537 = arith.addf %535, %536 : vector<8x1xf32>
    %538 = arith.negf %531 : vector<8x128xf32>
    %539 = math.exp %538 : vector<8x128xf32>
    %cst_124 = arith.constant 1.000000e+00 : f32
    %540 = vector.broadcast %cst_124 : f32 to vector<8x128xf32>
    %541 = arith.addf %540, %539 : vector<8x128xf32>
    %542 = arith.divf %540, %541 : vector<8x128xf32>
    %543 = math.tanh %531 : vector<8x128xf32>
    %544 = vector.extract_strided_slice %542 {offsets = [0, 0], sizes = [8, 32], strides = [1, 1]} : vector<8x128xf32> to vector<8x32xf32>
    %545 = vector.extract_strided_slice %542 {offsets = [0, 32], sizes = [8, 32], strides = [1, 1]} : vector<8x128xf32> to vector<8x32xf32>
    %546 = vector.extract_strided_slice %542 {offsets = [0, 64], sizes = [8, 32], strides = [1, 1]} : vector<8x128xf32> to vector<8x32xf32>
    %547 = vector.extract_strided_slice %543 {offsets = [0, 96], sizes = [8, 32], strides = [1, 1]} : vector<8x128xf32> to vector<8x32xf32>
    %548 = arith.mulf %545, %547 : vector<8x32xf32>
    %cst_125 = arith.constant 1.000000e+00 : f32
    %549 = vector.broadcast %cst_125 : f32 to vector<8x1xf32>
    %550 = arith.subf %549, %472 : vector<8x1xf32>
    %551 = vector.broadcast %472 : vector<8x1xf32> to vector<8x32xf32>
    %552 = arith.mulf %551, %548 : vector<8x32xf32>
    %cst_126 = arith.constant 1.000000e+00 : f32
    %553 = vector.broadcast %cst_126 : f32 to vector<8x1xf32>
    %554 = arith.subf %553, %525 : vector<8x1xf32>
    %555 = arith.mulf %550, %554 : vector<8x1xf32>
    %556 = vector.broadcast %555 : vector<8x1xf32> to vector<8x32xf32>
    %557 = arith.mulf %556, %452 : vector<8x32xf32>
    %558 = arith.addf %552, %557 : vector<8x32xf32>
    %559 = arith.mulf %550, %525 : vector<8x1xf32>
    %560 = arith.mulf %544, %452 : vector<8x32xf32>
    %561 = arith.addf %560, %548 : vector<8x32xf32>
    %562 = vector.broadcast %559 : vector<8x1xf32> to vector<8x32xf32>
    %563 = arith.mulf %562, %561 : vector<8x32xf32>
    %564 = arith.addf %558, %563 : vector<8x32xf32>
    %565 = math.tanh %564 : vector<8x32xf32>
    %566 = arith.mulf %546, %565 : vector<8x32xf32>
    %567 = vector.broadcast %472 : vector<8x1xf32> to vector<8x32xf32>
    %568 = arith.mulf %567, %566 : vector<8x32xf32>
    %cst_127 = arith.constant 1.000000e+00 : f32
    %569 = vector.broadcast %cst_127 : f32 to vector<8x1xf32>
    %570 = arith.subf %569, %525 : vector<8x1xf32>
    %571 = arith.mulf %550, %570 : vector<8x1xf32>
    %572 = vector.broadcast %571 : vector<8x1xf32> to vector<8x32xf32>
    %573 = arith.mulf %572, %466 : vector<8x32xf32>
    %574 = arith.addf %568, %573 : vector<8x32xf32>
    %575 = arith.mulf %550, %525 : vector<8x1xf32>
    %576 = vector.broadcast %575 : vector<8x1xf32> to vector<8x32xf32>
    %577 = arith.mulf %576, %566 : vector<8x32xf32>
    %578 = arith.addf %574, %577 : vector<8x32xf32>
    %cst_128 = arith.constant 1.000000e+00 : f32
    %579 = vector.broadcast %cst_128 : f32 to vector<8x1xf32>
    %580 = arith.mulf %579, %537 : vector<8x1xf32>
    %cst_129 = arith.constant 0.000000e+00 : f32
    %581 = vector.broadcast %cst_129 : f32 to vector<8x1xf32>
    %582 = arith.cmpf ogt, %580, %581 : vector<8x1xf32>
    %583 = arith.extui %582 : vector<8x1xi1> to vector<8x1xi32>
    %584 = arith.sitofp %583 : vector<8x1xi32> to vector<8x1xf32>
    %585 = vector.shape_cast %525 : vector<8x1xf32> to vector<8x1xf32>
    %586 = vector.broadcast %585 : vector<8x1xf32> to vector<8x32xf32>
    %587 = vector.shape_cast %584 : vector<8x1xf32> to vector<8x1xf32>
    %588 = vector.broadcast %587 : vector<8x1xf32> to vector<8x32xf32>
    %589 = tpu.concatenate %519, %578, %586, %588 in 1 : vector<8x32xf32>, vector<8x32xf32>, vector<8x32xf32>, vector<8x32xf32> -> vector<8x128xf32>
    %590 = arith.index_cast %c4_i32 : i32 to index
    %c0_130 = arith.constant 0 : index
    %c0_131 = arith.constant 0 : index
    %591 = vector.load %arg11[%590, %c0_130, %c0_131] : memref<8x8x128xf32, #tpu.memory_space<vmem>>, vector<1x8x128xf32>
    %592 = vector.shape_cast %591 : vector<1x8x128xf32> to vector<8x128xf32>
    %593 = vector.shape_cast %589 : vector<8x128xf32> to vector<1x8x128xf32>
    tpu.vector_store %arg11[%590, %c0_130, %c0_131], %593 {strides = array<i32>} : memref<8x8x128xf32, #tpu.memory_space<vmem>>, vector<1x8x128xf32>,
    %c5_i32 = arith.constant 5 : i32
    %c8_i32_132 = arith.constant 8 : i32
    %594 = arith.muli %c5_i32, %c8_i32_132 : i32
    %595 = tpu.assume_multiple %594, 8 : i32
    %596 = vector.broadcast %525 : vector<8x1xf32> to vector<8x32xf32>
    %597 = arith.mulf %596, %578 : vector<8x32xf32>
    %598 = tpu.concatenate %519, %597 in 1 : vector<8x32xf32>, vector<8x32xf32> -> vector<8x64xf32>
    %599 = arith.index_cast %595 : i32 to index
    %c0_133 = arith.constant 0 : index
    %600 = vector.load %arg14[%599, %c0_133] : memref<64x128xf32, #tpu.memory_space<vmem>>, vector<8x128xf32>
    %cst_134 = arith.constant dense<0.000000e+00> : vector<8x128xf32>
    %601 = tpu.matmul %598, %3, %cst_134 {dimension_numbers = #tpu.dot_dimension_numbers<[1], [0], [0], [1], [0, 0, 1, 1], [], []>} : vector<8x64xf32>, vector<64x128xf32>, vector<8x128xf32> -> vector<8x128xf32>
    %602 = arith.addf %600, %601 : vector<8x128xf32>
    %603 = arith.index_cast %595 : i32 to index
    %c0_135 = arith.constant 0 : index
    %604 = vector.load %arg15[%603, %c0_135] : memref<64x1xf32, #tpu.memory_space<vmem>>, vector<8x1xf32>
    %605 = vector.broadcast %8 : vector<1x64xf32> to vector<8x64xf32>
    %606 = arith.mulf %598, %605 : vector<8x64xf32>
    %cst_136 = arith.constant dense<0.000000e+00> : vector<8xf32>
    %607 = vector.multi_reduction <add>, %606, %cst_136 [1] : vector<8x64xf32> to vector<8xf32>
    %608 = vector.shape_cast %607 : vector<8xf32> to vector<8x1xf32>
    %609 = arith.addf %604, %608 : vector<8x1xf32>
    %610 = arith.negf %602 : vector<8x128xf32>
    %611 = math.exp %610 : vector<8x128xf32>
    %cst_137 = arith.constant 1.000000e+00 : f32
    %612 = vector.broadcast %cst_137 : f32 to vector<8x128xf32>
    %613 = arith.addf %612, %611 : vector<8x128xf32>
    %614 = arith.divf %612, %613 : vector<8x128xf32>
    %615 = math.tanh %602 : vector<8x128xf32>
    %616 = vector.extract_strided_slice %614 {offsets = [0, 0], sizes = [8, 32], strides = [1, 1]} : vector<8x128xf32> to vector<8x32xf32>
    %617 = vector.extract_strided_slice %614 {offsets = [0, 32], sizes = [8, 32], strides = [1, 1]} : vector<8x128xf32> to vector<8x32xf32>
    %618 = vector.extract_strided_slice %614 {offsets = [0, 64], sizes = [8, 32], strides = [1, 1]} : vector<8x128xf32> to vector<8x32xf32>
    %619 = vector.extract_strided_slice %615 {offsets = [0, 96], sizes = [8, 32], strides = [1, 1]} : vector<8x128xf32> to vector<8x32xf32>
    %620 = arith.mulf %617, %619 : vector<8x32xf32>
    %621 = vector.broadcast %525 : vector<8x1xf32> to vector<8x32xf32>
    %622 = arith.mulf %621, %620 : vector<8x32xf32>
    %cst_138 = arith.constant 1.000000e+00 : f32
    %623 = vector.broadcast %cst_138 : f32 to vector<8x1xf32>
    %624 = arith.subf %623, %525 : vector<8x1xf32>
    %625 = arith.mulf %616, %517 : vector<8x32xf32>
    %626 = arith.addf %625, %620 : vector<8x32xf32>
    %627 = vector.broadcast %624 : vector<8x1xf32> to vector<8x32xf32>
    %628 = arith.mulf %627, %626 : vector<8x32xf32>
    %629 = arith.addf %622, %628 : vector<8x32xf32>
    %630 = math.tanh %629 : vector<8x32xf32>
    %631 = arith.mulf %618, %630 : vector<8x32xf32>
    %cst_139 = arith.constant 1.000000e+00 : f32
    %632 = vector.broadcast %cst_139 : f32 to vector<8x1xf32>
    %633 = arith.mulf %632, %609 : vector<8x1xf32>
    %cst_140 = arith.constant 0.000000e+00 : f32
    %634 = vector.broadcast %cst_140 : f32 to vector<8x1xf32>
    %635 = arith.cmpf ogt, %633, %634 : vector<8x1xf32>
    %636 = arith.extui %635 : vector<8x1xi1> to vector<8x1xi32>
    %637 = arith.sitofp %636 : vector<8x1xi32> to vector<8x1xf32>
    %638 = vector.broadcast %637 : vector<8x1xf32> to vector<8x32xf32>
    %639 = arith.mulf %638, %578 : vector<8x32xf32>
    %640 = tpu.concatenate %631, %639 in 1 : vector<8x32xf32>, vector<8x32xf32> -> vector<8x64xf32>
    %cst_141 = arith.constant dense<0.000000e+00> : vector<8x128xf32>
    %641 = tpu.matmul %640, %4, %cst_141 {dimension_numbers = #tpu.dot_dimension_numbers<[1], [0], [0], [1], [0, 0, 1, 1], [], []>} : vector<8x64xf32>, vector<64x128xf32>, vector<8x128xf32> -> vector<8x128xf32>
    %642 = vector.broadcast %5 : vector<1x128xf32> to vector<8x128xf32>
    %643 = arith.addf %641, %642 : vector<8x128xf32>
    %644 = vector.broadcast %9 : vector<1x64xf32> to vector<8x64xf32>
    %645 = arith.mulf %640, %644 : vector<8x64xf32>
    %cst_142 = arith.constant dense<0.000000e+00> : vector<8xf32>
    %646 = vector.multi_reduction <add>, %645, %cst_142 [1] : vector<8x64xf32> to vector<8xf32>
    %647 = vector.shape_cast %646 : vector<8xf32> to vector<8x1xf32>
    %648 = vector.broadcast %11 : vector<1x1xf32> to vector<8x1xf32>
    %649 = arith.addf %647, %648 : vector<8x1xf32>
    %650 = arith.negf %643 : vector<8x128xf32>
    %651 = math.exp %650 : vector<8x128xf32>
    %cst_143 = arith.constant 1.000000e+00 : f32
    %652 = vector.broadcast %cst_143 : f32 to vector<8x128xf32>
    %653 = arith.addf %652, %651 : vector<8x128xf32>
    %654 = arith.divf %652, %653 : vector<8x128xf32>
    %655 = math.tanh %643 : vector<8x128xf32>
    %656 = vector.extract_strided_slice %654 {offsets = [0, 0], sizes = [8, 32], strides = [1, 1]} : vector<8x128xf32> to vector<8x32xf32>
    %657 = vector.extract_strided_slice %654 {offsets = [0, 32], sizes = [8, 32], strides = [1, 1]} : vector<8x128xf32> to vector<8x32xf32>
    %658 = vector.extract_strided_slice %654 {offsets = [0, 64], sizes = [8, 32], strides = [1, 1]} : vector<8x128xf32> to vector<8x32xf32>
    %659 = vector.extract_strided_slice %655 {offsets = [0, 96], sizes = [8, 32], strides = [1, 1]} : vector<8x128xf32> to vector<8x32xf32>
    %660 = arith.mulf %657, %659 : vector<8x32xf32>
    %cst_144 = arith.constant 1.000000e+00 : f32
    %661 = vector.broadcast %cst_144 : f32 to vector<8x1xf32>
    %662 = arith.subf %661, %584 : vector<8x1xf32>
    %663 = vector.broadcast %584 : vector<8x1xf32> to vector<8x32xf32>
    %664 = arith.mulf %663, %660 : vector<8x32xf32>
    %cst_145 = arith.constant 1.000000e+00 : f32
    %665 = vector.broadcast %cst_145 : f32 to vector<8x1xf32>
    %666 = arith.subf %665, %637 : vector<8x1xf32>
    %667 = arith.mulf %662, %666 : vector<8x1xf32>
    %668 = vector.broadcast %667 : vector<8x1xf32> to vector<8x32xf32>
    %669 = arith.mulf %668, %564 : vector<8x32xf32>
    %670 = arith.addf %664, %669 : vector<8x32xf32>
    %671 = arith.mulf %662, %637 : vector<8x1xf32>
    %672 = arith.mulf %656, %564 : vector<8x32xf32>
    %673 = arith.addf %672, %660 : vector<8x32xf32>
    %674 = vector.broadcast %671 : vector<8x1xf32> to vector<8x32xf32>
    %675 = arith.mulf %674, %673 : vector<8x32xf32>
    %676 = arith.addf %670, %675 : vector<8x32xf32>
    %677 = math.tanh %676 : vector<8x32xf32>
    %678 = arith.mulf %658, %677 : vector<8x32xf32>
    %679 = vector.broadcast %584 : vector<8x1xf32> to vector<8x32xf32>
    %680 = arith.mulf %679, %678 : vector<8x32xf32>
    %cst_146 = arith.constant 1.000000e+00 : f32
    %681 = vector.broadcast %cst_146 : f32 to vector<8x1xf32>
    %682 = arith.subf %681, %637 : vector<8x1xf32>
    %683 = arith.mulf %662, %682 : vector<8x1xf32>
    %684 = vector.broadcast %683 : vector<8x1xf32> to vector<8x32xf32>
    %685 = arith.mulf %684, %578 : vector<8x32xf32>
    %686 = arith.addf %680, %685 : vector<8x32xf32>
    %687 = arith.mulf %662, %637 : vector<8x1xf32>
    %688 = vector.broadcast %687 : vector<8x1xf32> to vector<8x32xf32>
    %689 = arith.mulf %688, %678 : vector<8x32xf32>
    %690 = arith.addf %686, %689 : vector<8x32xf32>
    %cst_147 = arith.constant 1.000000e+00 : f32
    %691 = vector.broadcast %cst_147 : f32 to vector<8x1xf32>
    %692 = arith.mulf %691, %649 : vector<8x1xf32>
    %cst_148 = arith.constant 0.000000e+00 : f32
    %693 = vector.broadcast %cst_148 : f32 to vector<8x1xf32>
    %694 = arith.cmpf ogt, %692, %693 : vector<8x1xf32>
    %695 = arith.extui %694 : vector<8x1xi1> to vector<8x1xi32>
    %696 = arith.sitofp %695 : vector<8x1xi32> to vector<8x1xf32>
    %697 = vector.shape_cast %637 : vector<8x1xf32> to vector<8x1xf32>
    %698 = vector.broadcast %697 : vector<8x1xf32> to vector<8x32xf32>
    %699 = vector.shape_cast %696 : vector<8x1xf32> to vector<8x1xf32>
    %700 = vector.broadcast %699 : vector<8x1xf32> to vector<8x32xf32>
    %701 = tpu.concatenate %631, %690, %698, %700 in 1 : vector<8x32xf32>, vector<8x32xf32>, vector<8x32xf32>, vector<8x32xf32> -> vector<8x128xf32>
    %702 = arith.index_cast %c5_i32 : i32 to index
    %c0_149 = arith.constant 0 : index
    %c0_150 = arith.constant 0 : index
    %703 = vector.load %arg11[%702, %c0_149, %c0_150] : memref<8x8x128xf32, #tpu.memory_space<vmem>>, vector<1x8x128xf32>
    %704 = vector.shape_cast %703 : vector<1x8x128xf32> to vector<8x128xf32>
    %705 = vector.shape_cast %701 : vector<8x128xf32> to vector<1x8x128xf32>
    tpu.vector_store %arg11[%702, %c0_149, %c0_150], %705 {strides = array<i32>} : memref<8x8x128xf32, #tpu.memory_space<vmem>>, vector<1x8x128xf32>,
    %c6_i32 = arith.constant 6 : i32
    %c8_i32_151 = arith.constant 8 : i32
    %706 = arith.muli %c6_i32, %c8_i32_151 : i32
    %707 = tpu.assume_multiple %706, 8 : i32
    %708 = vector.broadcast %637 : vector<8x1xf32> to vector<8x32xf32>
    %709 = arith.mulf %708, %690 : vector<8x32xf32>
    %710 = tpu.concatenate %631, %709 in 1 : vector<8x32xf32>, vector<8x32xf32> -> vector<8x64xf32>
    %711 = arith.index_cast %707 : i32 to index
    %c0_152 = arith.constant 0 : index
    %712 = vector.load %arg14[%711, %c0_152] : memref<64x128xf32, #tpu.memory_space<vmem>>, vector<8x128xf32>
    %cst_153 = arith.constant dense<0.000000e+00> : vector<8x128xf32>
    %713 = tpu.matmul %710, %3, %cst_153 {dimension_numbers = #tpu.dot_dimension_numbers<[1], [0], [0], [1], [0, 0, 1, 1], [], []>} : vector<8x64xf32>, vector<64x128xf32>, vector<8x128xf32> -> vector<8x128xf32>
    %714 = arith.addf %712, %713 : vector<8x128xf32>
    %715 = arith.index_cast %707 : i32 to index
    %c0_154 = arith.constant 0 : index
    %716 = vector.load %arg15[%715, %c0_154] : memref<64x1xf32, #tpu.memory_space<vmem>>, vector<8x1xf32>
    %717 = vector.broadcast %8 : vector<1x64xf32> to vector<8x64xf32>
    %718 = arith.mulf %710, %717 : vector<8x64xf32>
    %cst_155 = arith.constant dense<0.000000e+00> : vector<8xf32>
    %719 = vector.multi_reduction <add>, %718, %cst_155 [1] : vector<8x64xf32> to vector<8xf32>
    %720 = vector.shape_cast %719 : vector<8xf32> to vector<8x1xf32>
    %721 = arith.addf %716, %720 : vector<8x1xf32>
    %722 = arith.negf %714 : vector<8x128xf32>
    %723 = math.exp %722 : vector<8x128xf32>
    %cst_156 = arith.constant 1.000000e+00 : f32
    %724 = vector.broadcast %cst_156 : f32 to vector<8x128xf32>
    %725 = arith.addf %724, %723 : vector<8x128xf32>
    %726 = arith.divf %724, %725 : vector<8x128xf32>
    %727 = math.tanh %714 : vector<8x128xf32>
    %728 = vector.extract_strided_slice %726 {offsets = [0, 0], sizes = [8, 32], strides = [1, 1]} : vector<8x128xf32> to vector<8x32xf32>
    %729 = vector.extract_strided_slice %726 {offsets = [0, 32], sizes = [8, 32], strides = [1, 1]} : vector<8x128xf32> to vector<8x32xf32>
    %730 = vector.extract_strided_slice %726 {offsets = [0, 64], sizes = [8, 32], strides = [1, 1]} : vector<8x128xf32> to vector<8x32xf32>
    %731 = vector.extract_strided_slice %727 {offsets = [0, 96], sizes = [8, 32], strides = [1, 1]} : vector<8x128xf32> to vector<8x32xf32>
    %732 = arith.mulf %729, %731 : vector<8x32xf32>
    %733 = vector.broadcast %637 : vector<8x1xf32> to vector<8x32xf32>
    %734 = arith.mulf %733, %732 : vector<8x32xf32>
    %cst_157 = arith.constant 1.000000e+00 : f32
    %735 = vector.broadcast %cst_157 : f32 to vector<8x1xf32>
    %736 = arith.subf %735, %637 : vector<8x1xf32>
    %737 = arith.mulf %728, %629 : vector<8x32xf32>
    %738 = arith.addf %737, %732 : vector<8x32xf32>
    %739 = vector.broadcast %736 : vector<8x1xf32> to vector<8x32xf32>
    %740 = arith.mulf %739, %738 : vector<8x32xf32>
    %741 = arith.addf %734, %740 : vector<8x32xf32>
    %742 = math.tanh %741 : vector<8x32xf32>
    %743 = arith.mulf %730, %742 : vector<8x32xf32>
    %cst_158 = arith.constant 1.000000e+00 : f32
    %744 = vector.broadcast %cst_158 : f32 to vector<8x1xf32>
    %745 = arith.mulf %744, %721 : vector<8x1xf32>
    %cst_159 = arith.constant 0.000000e+00 : f32
    %746 = vector.broadcast %cst_159 : f32 to vector<8x1xf32>
    %747 = arith.cmpf ogt, %745, %746 : vector<8x1xf32>
    %748 = arith.extui %747 : vector<8x1xi1> to vector<8x1xi32>
    %749 = arith.sitofp %748 : vector<8x1xi32> to vector<8x1xf32>
    %750 = vector.broadcast %749 : vector<8x1xf32> to vector<8x32xf32>
    %751 = arith.mulf %750, %690 : vector<8x32xf32>
    %752 = tpu.concatenate %743, %751 in 1 : vector<8x32xf32>, vector<8x32xf32> -> vector<8x64xf32>
    %cst_160 = arith.constant dense<0.000000e+00> : vector<8x128xf32>
    %753 = tpu.matmul %752, %4, %cst_160 {dimension_numbers = #tpu.dot_dimension_numbers<[1], [0], [0], [1], [0, 0, 1, 1], [], []>} : vector<8x64xf32>, vector<64x128xf32>, vector<8x128xf32> -> vector<8x128xf32>
    %754 = vector.broadcast %5 : vector<1x128xf32> to vector<8x128xf32>
    %755 = arith.addf %753, %754 : vector<8x128xf32>
    %756 = vector.broadcast %9 : vector<1x64xf32> to vector<8x64xf32>
    %757 = arith.mulf %752, %756 : vector<8x64xf32>
    %cst_161 = arith.constant dense<0.000000e+00> : vector<8xf32>
    %758 = vector.multi_reduction <add>, %757, %cst_161 [1] : vector<8x64xf32> to vector<8xf32>
    %759 = vector.shape_cast %758 : vector<8xf32> to vector<8x1xf32>
    %760 = vector.broadcast %11 : vector<1x1xf32> to vector<8x1xf32>
    %761 = arith.addf %759, %760 : vector<8x1xf32>
    %762 = arith.negf %755 : vector<8x128xf32>
    %763 = math.exp %762 : vector<8x128xf32>
    %cst_162 = arith.constant 1.000000e+00 : f32
    %764 = vector.broadcast %cst_162 : f32 to vector<8x128xf32>
    %765 = arith.addf %764, %763 : vector<8x128xf32>
    %766 = arith.divf %764, %765 : vector<8x128xf32>
    %767 = math.tanh %755 : vector<8x128xf32>
    %768 = vector.extract_strided_slice %766 {offsets = [0, 0], sizes = [8, 32], strides = [1, 1]} : vector<8x128xf32> to vector<8x32xf32>
    %769 = vector.extract_strided_slice %766 {offsets = [0, 32], sizes = [8, 32], strides = [1, 1]} : vector<8x128xf32> to vector<8x32xf32>
    %770 = vector.extract_strided_slice %766 {offsets = [0, 64], sizes = [8, 32], strides = [1, 1]} : vector<8x128xf32> to vector<8x32xf32>
    %771 = vector.extract_strided_slice %767 {offsets = [0, 96], sizes = [8, 32], strides = [1, 1]} : vector<8x128xf32> to vector<8x32xf32>
    %772 = arith.mulf %769, %771 : vector<8x32xf32>
    %cst_163 = arith.constant 1.000000e+00 : f32
    %773 = vector.broadcast %cst_163 : f32 to vector<8x1xf32>
    %774 = arith.subf %773, %696 : vector<8x1xf32>
    %775 = vector.broadcast %696 : vector<8x1xf32> to vector<8x32xf32>
    %776 = arith.mulf %775, %772 : vector<8x32xf32>
    %cst_164 = arith.constant 1.000000e+00 : f32
    %777 = vector.broadcast %cst_164 : f32 to vector<8x1xf32>
    %778 = arith.subf %777, %749 : vector<8x1xf32>
    %779 = arith.mulf %774, %778 : vector<8x1xf32>
    %780 = vector.broadcast %779 : vector<8x1xf32> to vector<8x32xf32>
    %781 = arith.mulf %780, %676 : vector<8x32xf32>
    %782 = arith.addf %776, %781 : vector<8x32xf32>
    %783 = arith.mulf %774, %749 : vector<8x1xf32>
    %784 = arith.mulf %768, %676 : vector<8x32xf32>
    %785 = arith.addf %784, %772 : vector<8x32xf32>
    %786 = vector.broadcast %783 : vector<8x1xf32> to vector<8x32xf32>
    %787 = arith.mulf %786, %785 : vector<8x32xf32>
    %788 = arith.addf %782, %787 : vector<8x32xf32>
    %789 = math.tanh %788 : vector<8x32xf32>
    %790 = arith.mulf %770, %789 : vector<8x32xf32>
    %791 = vector.broadcast %696 : vector<8x1xf32> to vector<8x32xf32>
    %792 = arith.mulf %791, %790 : vector<8x32xf32>
    %cst_165 = arith.constant 1.000000e+00 : f32
    %793 = vector.broadcast %cst_165 : f32 to vector<8x1xf32>
    %794 = arith.subf %793, %749 : vector<8x1xf32>
    %795 = arith.mulf %774, %794 : vector<8x1xf32>
    %796 = vector.broadcast %795 : vector<8x1xf32> to vector<8x32xf32>
    %797 = arith.mulf %796, %690 : vector<8x32xf32>
    %798 = arith.addf %792, %797 : vector<8x32xf32>
    %799 = arith.mulf %774, %749 : vector<8x1xf32>
    %800 = vector.broadcast %799 : vector<8x1xf32> to vector<8x32xf32>
    %801 = arith.mulf %800, %790 : vector<8x32xf32>
    %802 = arith.addf %798, %801 : vector<8x32xf32>
    %cst_166 = arith.constant 1.000000e+00 : f32
    %803 = vector.broadcast %cst_166 : f32 to vector<8x1xf32>
    %804 = arith.mulf %803, %761 : vector<8x1xf32>
    %cst_167 = arith.constant 0.000000e+00 : f32
    %805 = vector.broadcast %cst_167 : f32 to vector<8x1xf32>
    %806 = arith.cmpf ogt, %804, %805 : vector<8x1xf32>
    %807 = arith.extui %806 : vector<8x1xi1> to vector<8x1xi32>
    %808 = arith.sitofp %807 : vector<8x1xi32> to vector<8x1xf32>
    %809 = vector.shape_cast %749 : vector<8x1xf32> to vector<8x1xf32>
    %810 = vector.broadcast %809 : vector<8x1xf32> to vector<8x32xf32>
    %811 = vector.shape_cast %808 : vector<8x1xf32> to vector<8x1xf32>
    %812 = vector.broadcast %811 : vector<8x1xf32> to vector<8x32xf32>
    %813 = tpu.concatenate %743, %802, %810, %812 in 1 : vector<8x32xf32>, vector<8x32xf32>, vector<8x32xf32>, vector<8x32xf32> -> vector<8x128xf32>
    %814 = arith.index_cast %c6_i32 : i32 to index
    %c0_168 = arith.constant 0 : index
    %c0_169 = arith.constant 0 : index
    %815 = vector.load %arg11[%814, %c0_168, %c0_169] : memref<8x8x128xf32, #tpu.memory_space<vmem>>, vector<1x8x128xf32>
    %816 = vector.shape_cast %815 : vector<1x8x128xf32> to vector<8x128xf32>
    %817 = vector.shape_cast %813 : vector<8x128xf32> to vector<1x8x128xf32>
    tpu.vector_store %arg11[%814, %c0_168, %c0_169], %817 {strides = array<i32>} : memref<8x8x128xf32, #tpu.memory_space<vmem>>, vector<1x8x128xf32>,
    %c7_i32 = arith.constant 7 : i32
    %c8_i32_170 = arith.constant 8 : i32
    %818 = arith.muli %c7_i32, %c8_i32_170 : i32
    %819 = tpu.assume_multiple %818, 8 : i32
    %820 = vector.broadcast %749 : vector<8x1xf32> to vector<8x32xf32>
    %821 = arith.mulf %820, %802 : vector<8x32xf32>
    %822 = tpu.concatenate %743, %821 in 1 : vector<8x32xf32>, vector<8x32xf32> -> vector<8x64xf32>
    %823 = arith.index_cast %819 : i32 to index
    %c0_171 = arith.constant 0 : index
    %824 = vector.load %arg14[%823, %c0_171] : memref<64x128xf32, #tpu.memory_space<vmem>>, vector<8x128xf32>
    %cst_172 = arith.constant dense<0.000000e+00> : vector<8x128xf32>
    %825 = tpu.matmul %822, %3, %cst_172 {dimension_numbers = #tpu.dot_dimension_numbers<[1], [0], [0], [1], [0, 0, 1, 1], [], []>} : vector<8x64xf32>, vector<64x128xf32>, vector<8x128xf32> -> vector<8x128xf32>
    %826 = arith.addf %824, %825 : vector<8x128xf32>
    %827 = arith.index_cast %819 : i32 to index
    %c0_173 = arith.constant 0 : index
    %828 = vector.load %arg15[%827, %c0_173] : memref<64x1xf32, #tpu.memory_space<vmem>>, vector<8x1xf32>
    %829 = vector.broadcast %8 : vector<1x64xf32> to vector<8x64xf32>
    %830 = arith.mulf %822, %829 : vector<8x64xf32>
    %cst_174 = arith.constant dense<0.000000e+00> : vector<8xf32>
    %831 = vector.multi_reduction <add>, %830, %cst_174 [1] : vector<8x64xf32> to vector<8xf32>
    %832 = vector.shape_cast %831 : vector<8xf32> to vector<8x1xf32>
    %833 = arith.addf %828, %832 : vector<8x1xf32>
    %834 = arith.negf %826 : vector<8x128xf32>
    %835 = math.exp %834 : vector<8x128xf32>
    %cst_175 = arith.constant 1.000000e+00 : f32
    %836 = vector.broadcast %cst_175 : f32 to vector<8x128xf32>
    %837 = arith.addf %836, %835 : vector<8x128xf32>
    %838 = arith.divf %836, %837 : vector<8x128xf32>
    %839 = math.tanh %826 : vector<8x128xf32>
    %840 = vector.extract_strided_slice %838 {offsets = [0, 0], sizes = [8, 32], strides = [1, 1]} : vector<8x128xf32> to vector<8x32xf32>
    %841 = vector.extract_strided_slice %838 {offsets = [0, 32], sizes = [8, 32], strides = [1, 1]} : vector<8x128xf32> to vector<8x32xf32>
    %842 = vector.extract_strided_slice %838 {offsets = [0, 64], sizes = [8, 32], strides = [1, 1]} : vector<8x128xf32> to vector<8x32xf32>
    %843 = vector.extract_strided_slice %839 {offsets = [0, 96], sizes = [8, 32], strides = [1, 1]} : vector<8x128xf32> to vector<8x32xf32>
    %844 = arith.mulf %841, %843 : vector<8x32xf32>
    %845 = vector.broadcast %749 : vector<8x1xf32> to vector<8x32xf32>
    %846 = arith.mulf %845, %844 : vector<8x32xf32>
    %cst_176 = arith.constant 1.000000e+00 : f32
    %847 = vector.broadcast %cst_176 : f32 to vector<8x1xf32>
    %848 = arith.subf %847, %749 : vector<8x1xf32>
    %849 = arith.mulf %840, %741 : vector<8x32xf32>
    %850 = arith.addf %849, %844 : vector<8x32xf32>
    %851 = vector.broadcast %848 : vector<8x1xf32> to vector<8x32xf32>
    %852 = arith.mulf %851, %850 : vector<8x32xf32>
    %853 = arith.addf %846, %852 : vector<8x32xf32>
    %854 = math.tanh %853 : vector<8x32xf32>
    %855 = arith.mulf %842, %854 : vector<8x32xf32>
    %cst_177 = arith.constant 1.000000e+00 : f32
    %856 = vector.broadcast %cst_177 : f32 to vector<8x1xf32>
    %857 = arith.mulf %856, %833 : vector<8x1xf32>
    %cst_178 = arith.constant 0.000000e+00 : f32
    %858 = vector.broadcast %cst_178 : f32 to vector<8x1xf32>
    %859 = arith.cmpf ogt, %857, %858 : vector<8x1xf32>
    %860 = arith.extui %859 : vector<8x1xi1> to vector<8x1xi32>
    %861 = arith.sitofp %860 : vector<8x1xi32> to vector<8x1xf32>
    %862 = vector.broadcast %861 : vector<8x1xf32> to vector<8x32xf32>
    %863 = arith.mulf %862, %802 : vector<8x32xf32>
    %864 = tpu.concatenate %855, %863 in 1 : vector<8x32xf32>, vector<8x32xf32> -> vector<8x64xf32>
    %cst_179 = arith.constant dense<0.000000e+00> : vector<8x128xf32>
    %865 = tpu.matmul %864, %4, %cst_179 {dimension_numbers = #tpu.dot_dimension_numbers<[1], [0], [0], [1], [0, 0, 1, 1], [], []>} : vector<8x64xf32>, vector<64x128xf32>, vector<8x128xf32> -> vector<8x128xf32>
    %866 = vector.broadcast %5 : vector<1x128xf32> to vector<8x128xf32>
    %867 = arith.addf %865, %866 : vector<8x128xf32>
    %868 = vector.broadcast %9 : vector<1x64xf32> to vector<8x64xf32>
    %869 = arith.mulf %864, %868 : vector<8x64xf32>
    %cst_180 = arith.constant dense<0.000000e+00> : vector<8xf32>
    %870 = vector.multi_reduction <add>, %869, %cst_180 [1] : vector<8x64xf32> to vector<8xf32>
    %871 = vector.shape_cast %870 : vector<8xf32> to vector<8x1xf32>
    %872 = vector.broadcast %11 : vector<1x1xf32> to vector<8x1xf32>
    %873 = arith.addf %871, %872 : vector<8x1xf32>
    %874 = arith.negf %867 : vector<8x128xf32>
    %875 = math.exp %874 : vector<8x128xf32>
    %cst_181 = arith.constant 1.000000e+00 : f32
    %876 = vector.broadcast %cst_181 : f32 to vector<8x128xf32>
    %877 = arith.addf %876, %875 : vector<8x128xf32>
    %878 = arith.divf %876, %877 : vector<8x128xf32>
    %879 = math.tanh %867 : vector<8x128xf32>
    %880 = vector.extract_strided_slice %878 {offsets = [0, 0], sizes = [8, 32], strides = [1, 1]} : vector<8x128xf32> to vector<8x32xf32>
    %881 = vector.extract_strided_slice %878 {offsets = [0, 32], sizes = [8, 32], strides = [1, 1]} : vector<8x128xf32> to vector<8x32xf32>
    %882 = vector.extract_strided_slice %878 {offsets = [0, 64], sizes = [8, 32], strides = [1, 1]} : vector<8x128xf32> to vector<8x32xf32>
    %883 = vector.extract_strided_slice %879 {offsets = [0, 96], sizes = [8, 32], strides = [1, 1]} : vector<8x128xf32> to vector<8x32xf32>
    %884 = arith.mulf %881, %883 : vector<8x32xf32>
    %cst_182 = arith.constant 1.000000e+00 : f32
    %885 = vector.broadcast %cst_182 : f32 to vector<8x1xf32>
    %886 = arith.subf %885, %808 : vector<8x1xf32>
    %887 = vector.broadcast %808 : vector<8x1xf32> to vector<8x32xf32>
    %888 = arith.mulf %887, %884 : vector<8x32xf32>
    %cst_183 = arith.constant 1.000000e+00 : f32
    %889 = vector.broadcast %cst_183 : f32 to vector<8x1xf32>
    %890 = arith.subf %889, %861 : vector<8x1xf32>
    %891 = arith.mulf %886, %890 : vector<8x1xf32>
    %892 = vector.broadcast %891 : vector<8x1xf32> to vector<8x32xf32>
    %893 = arith.mulf %892, %788 : vector<8x32xf32>
    %894 = arith.addf %888, %893 : vector<8x32xf32>
    %895 = arith.mulf %886, %861 : vector<8x1xf32>
    %896 = arith.mulf %880, %788 : vector<8x32xf32>
    %897 = arith.addf %896, %884 : vector<8x32xf32>
    %898 = vector.broadcast %895 : vector<8x1xf32> to vector<8x32xf32>
    %899 = arith.mulf %898, %897 : vector<8x32xf32>
    %900 = arith.addf %894, %899 : vector<8x32xf32>
    %901 = math.tanh %900 : vector<8x32xf32>
    %902 = arith.mulf %882, %901 : vector<8x32xf32>
    %903 = vector.broadcast %808 : vector<8x1xf32> to vector<8x32xf32>
    %904 = arith.mulf %903, %902 : vector<8x32xf32>
    %cst_184 = arith.constant 1.000000e+00 : f32
    %905 = vector.broadcast %cst_184 : f32 to vector<8x1xf32>
    %906 = arith.subf %905, %861 : vector<8x1xf32>
    %907 = arith.mulf %886, %906 : vector<8x1xf32>
    %908 = vector.broadcast %907 : vector<8x1xf32> to vector<8x32xf32>
    %909 = arith.mulf %908, %802 : vector<8x32xf32>
    %910 = arith.addf %904, %909 : vector<8x32xf32>
    %911 = arith.mulf %886, %861 : vector<8x1xf32>
    %912 = vector.broadcast %911 : vector<8x1xf32> to vector<8x32xf32>
    %913 = arith.mulf %912, %902 : vector<8x32xf32>
    %914 = arith.addf %910, %913 : vector<8x32xf32>
    %cst_185 = arith.constant 1.000000e+00 : f32
    %915 = vector.broadcast %cst_185 : f32 to vector<8x1xf32>
    %916 = arith.mulf %915, %873 : vector<8x1xf32>
    %cst_186 = arith.constant 0.000000e+00 : f32
    %917 = vector.broadcast %cst_186 : f32 to vector<8x1xf32>
    %918 = arith.cmpf ogt, %916, %917 : vector<8x1xf32>
    %919 = arith.extui %918 : vector<8x1xi1> to vector<8x1xi32>
    %920 = arith.sitofp %919 : vector<8x1xi32> to vector<8x1xf32>
    %921 = vector.shape_cast %861 : vector<8x1xf32> to vector<8x1xf32>
    %922 = vector.broadcast %921 : vector<8x1xf32> to vector<8x32xf32>
    %923 = vector.shape_cast %920 : vector<8x1xf32> to vector<8x1xf32>
    %924 = vector.broadcast %923 : vector<8x1xf32> to vector<8x32xf32>
    %925 = tpu.concatenate %855, %914, %922, %924 in 1 : vector<8x32xf32>, vector<8x32xf32>, vector<8x32xf32>, vector<8x32xf32> -> vector<8x128xf32>
    %926 = arith.index_cast %c7_i32 : i32 to index
    %c0_187 = arith.constant 0 : index
    %c0_188 = arith.constant 0 : index
    %927 = vector.load %arg11[%926, %c0_187, %c0_188] : memref<8x8x128xf32, #tpu.memory_space<vmem>>, vector<1x8x128xf32>
    %928 = vector.shape_cast %927 : vector<1x8x128xf32> to vector<8x128xf32>
    %929 = vector.shape_cast %925 : vector<8x128xf32> to vector<1x8x128xf32>
    tpu.vector_store %arg11[%926, %c0_187, %c0_188], %929 {strides = array<i32>} : memref<8x8x128xf32, #tpu.memory_space<vmem>>, vector<1x8x128xf32>,
    %c8_i32_189 = arith.constant 8 : i32
    %c0_190 = arith.constant 0 : index
    %c0_191 = arith.constant 0 : index
    %930 = vector.load %arg16[%c0_190, %c0_191] : memref<8x32xf32, #tpu.memory_space<vmem>>, vector<8x32xf32>
    tpu.vector_store %arg16[%c0_190, %c0_191], %855 {strides = array<i32>} : memref<8x32xf32, #tpu.memory_space<vmem>>, vector<8x32xf32>,
    %c0_192 = arith.constant 0 : index
    %c0_193 = arith.constant 0 : index
    %931 = vector.load %arg17[%c0_192, %c0_193] : memref<8x32xf32, #tpu.memory_space<vmem>>, vector<8x32xf32>
    tpu.vector_store %arg17[%c0_192, %c0_193], %853 {strides = array<i32>} : memref<8x32xf32, #tpu.memory_space<vmem>>, vector<8x32xf32>,
    %c0_194 = arith.constant 0 : index
    %c0_195 = arith.constant 0 : index
    %932 = vector.load %arg18[%c0_194, %c0_195] : memref<8x1xf32, #tpu.memory_space<vmem>>, vector<8x1xf32>
    tpu.vector_store %arg18[%c0_194, %c0_195], %861 {strides = array<i32>} : memref<8x1xf32, #tpu.memory_space<vmem>>, vector<8x1xf32>,
    %c0_196 = arith.constant 0 : index
    %c0_197 = arith.constant 0 : index
    %933 = vector.load %arg19[%c0_196, %c0_197] : memref<8x32xf32, #tpu.memory_space<vmem>>, vector<8x32xf32>
    tpu.vector_store %arg19[%c0_196, %c0_197], %914 {strides = array<i32>} : memref<8x32xf32, #tpu.memory_space<vmem>>, vector<8x32xf32>,
    %c0_198 = arith.constant 0 : index
    %c0_199 = arith.constant 0 : index
    %934 = vector.load %arg20[%c0_198, %c0_199] : memref<8x32xf32, #tpu.memory_space<vmem>>, vector<8x32xf32>
    tpu.vector_store %arg20[%c0_198, %c0_199], %900 {strides = array<i32>} : memref<8x32xf32, #tpu.memory_space<vmem>>, vector<8x32xf32>,
    %c0_200 = arith.constant 0 : index
    %c0_201 = arith.constant 0 : index
    %935 = vector.load %arg21[%c0_200, %c0_201] : memref<8x1xf32, #tpu.memory_space<vmem>>, vector<8x1xf32>
    tpu.vector_store %arg21[%c0_200, %c0_201], %920 {strides = array<i32>} : memref<8x1xf32, #tpu.memory_space<vmem>>, vector<8x1xf32>,
    %c0_i32_202 = arith.constant 0 : i32
    %936 = arith.cmpi eq, %arg1, %c0_i32_202 : i32
    %937 = arith.extui %936 : i1 to i32
    %c0_i32_203 = arith.constant 0 : i32
    %938 = arith.cmpi ne, %937, %c0_i32_203 : i32
    scf.if %938 {
      %c0_204 = arith.constant 0 : index
      %c0_205 = arith.constant 0 : index
      %939 = vector.load %arg12[%c0_204, %c0_205] : memref<8x32xf32, #tpu.memory_space<vmem>>, vector<8x32xf32>
      tpu.vector_store %arg12[%c0_204, %c0_205], %853 {strides = array<i32>} : memref<8x32xf32, #tpu.memory_space<vmem>>, vector<8x32xf32>,
      %c0_206 = arith.constant 0 : index
      %c0_207 = arith.constant 0 : index
      %940 = vector.load %arg13[%c0_206, %c0_207] : memref<8x32xf32, #tpu.memory_space<vmem>>, vector<8x32xf32>
      tpu.vector_store %arg13[%c0_206, %c0_207], %900 {strides = array<i32>} : memref<8x32xf32, #tpu.memory_space<vmem>>, vector<8x32xf32>,
    } else {
    }
    return
  }
  func.func @transform_0(%arg0: i32, %arg1: i32) -> (i32, i32, i32, i32) {
    %c0_i32 = arith.constant 0 : i32
    %c0_i32_0 = arith.constant 0 : i32
    %c0_i32_1 = arith.constant 0 : i32
    return %arg0, %arg1, %c0_i32, %c0_i32_0 : i32, i32, i32, i32
  }
  func.func @transform_1(%arg0: i32, %arg1: i32) -> (i32, i32) {
    %c0_i32 = arith.constant 0 : i32
    %c0_i32_0 = arith.constant 0 : i32
    %c0_i32_1 = arith.constant 0 : i32
    return %c0_i32, %c0_i32_0 : i32, i32
  }
  func.func @transform_2(%arg0: i32, %arg1: i32) -> (i32, i32) {
    %c0_i32 = arith.constant 0 : i32
    %c0_i32_0 = arith.constant 0 : i32
    %c0_i32_1 = arith.constant 0 : i32
    return %c0_i32, %c0_i32_0 : i32, i32
  }
  func.func @transform_3(%arg0: i32, %arg1: i32) -> (i32, i32) {
    %c0_i32 = arith.constant 0 : i32
    %c0_i32_0 = arith.constant 0 : i32
    %c0_i32_1 = arith.constant 0 : i32
    return %c0_i32, %c0_i32_0 : i32, i32
  }
  func.func @transform_4(%arg0: i32, %arg1: i32) -> (i32, i32) {
    %c0_i32 = arith.constant 0 : i32
    %c0_i32_0 = arith.constant 0 : i32
    %c0_i32_1 = arith.constant 0 : i32
    return %c0_i32, %c0_i32_0 : i32, i32
  }
  func.func @transform_5(%arg0: i32, %arg1: i32) -> (i32, i32) {
    %c0_i32 = arith.constant 0 : i32
    %c0_i32_0 = arith.constant 0 : i32
    %c0_i32_1 = arith.constant 0 : i32
    return %c0_i32, %c0_i32_0 : i32, i32
  }
  func.func @transform_6(%arg0: i32, %arg1: i32) -> (i32, i32) {
    %c0_i32 = arith.constant 0 : i32
    %c0_i32_0 = arith.constant 0 : i32
    %c0_i32_1 = arith.constant 0 : i32
    return %c0_i32, %c0_i32_0 : i32, i32
  }
  func.func @transform_7(%arg0: i32, %arg1: i32) -> (i32, i32) {
    %c0_i32 = arith.constant 0 : i32
    %c0_i32_0 = arith.constant 0 : i32
    %c0_i32_1 = arith.constant 0 : i32
    return %c0_i32, %c0_i32_0 : i32, i32
  }
  func.func @transform_8(%arg0: i32, %arg1: i32) -> (i32, i32) {
    %c0_i32 = arith.constant 0 : i32
    %c0_i32_0 = arith.constant 0 : i32
    %c0_i32_1 = arith.constant 0 : i32
    return %c0_i32, %c0_i32_0 : i32, i32
  }
  func.func @transform_9(%arg0: i32, %arg1: i32) -> (i32, i32, i32) {
    %c0_i32 = arith.constant 0 : i32
    %c0_i32_0 = arith.constant 0 : i32
    return %arg1, %arg0, %c0_i32 : i32, i32, i32
  }
  func.func @transform_10(%arg0: i32, %arg1: i32) -> (i32, i32) {
    %c0_i32 = arith.constant 0 : i32
    %c0_i32_0 = arith.constant 0 : i32
    return %arg0, %c0_i32 : i32, i32
  }
  func.func @transform_11(%arg0: i32, %arg1: i32) -> (i32, i32) {
    %c0_i32 = arith.constant 0 : i32
    %c0_i32_0 = arith.constant 0 : i32
    return %arg0, %c0_i32 : i32, i32
  }
}

</mosaic_0001>

<bundles_post_ra>
// kernel: hm_lstm_forward.1
= control target key start
LH: loop header
LB: loop body
LE: loop exit
PB: predicated region body
PF: predicated region fallthrough
CT: control target
= control target key end

     0   :  { %vm42_vm0 = vcmask 7168   ;;  %vm39_vm1 = vcmask 261120   ;;  %v3677_v0 = vmov 0   ;;  %v3678_v1 = vmov 0.0   ;;  %s3682_s23 = smov 64   ;;  %s3683_s26 = smov 96   ;;  %s4806_s4 = inlined_call_operand.vmem [shape: f32[64,128], index: 4, kind: input, shape index: {}]   ;;  %s4807_s1 = inlined_call_operand.vmem [shape: f32[16,128], index: 1, kind: input, shape index: {}]   ;;  %s4808_s0 = inlined_call_operand.vmem [shape: f32[1,1,64,16], index: 0, kind: input, shape index: {}]   ;;  %s4809_s2 = inlined_call_operand.vmem [shape: f32[1,128], index: 2, kind: input, shape index: {}]   ;;  %s4810_s3 = inlined_call_operand.vmem [shape: f32[1,16], index: 3, kind: input, shape index: {}]   ;;  %s4811_s7 = inlined_call_operand.vmem [shape: f32[2,64], index: 7, kind: input, shape index: {}]   ;;  %s4812_s8 = inlined_call_operand.vmem [shape: f32[1,2], index: 8, kind: input, shape index: {}]   ;;  %s4813_s5 = inlined_call_operand.vmem [shape: f32[64,128], index: 5, kind: input, shape index: {}]   ;;  %s4814_s6 = inlined_call_operand.vmem [shape: f32[1,128], index: 6, kind: input, shape index: {}]   ;;  %s4815_s9 = inlined_call_operand.vmem [shape: f32[8,8,128], index: 9, kind: output, shape index: {0}]   ;;  %s4816_s10 = inlined_call_operand.vmem [shape: f32[8,32], index: 10, kind: output, shape index: {1}]   ;;  %s4817_s11 = inlined_call_operand.vmem [shape: f32[8,32], index: 11, kind: output, shape index: {2}]  }
   0x1   :  { %3525 = vset.pattern.permute.xlu0 %v3677_v0  ;;  %43 = vst.msk [vmem:[#allocation6] sm:$0xff] %vm42_vm0, %v3678_v1  ;;  %46 = vst.msk [vmem:[#allocation9] sm:$0xff] %vm42_vm0, %v3678_v1  ;;  %3526 = vset.pattern.permute.xlu1 %v3677_v0  ;;  %v3679_v3 = vmov 0.0|0.0   ;;  %v47_v4 = vld [vmem:[%s4806_s4] sm:$0xff]  ;;  %v48_v5 = vld [vmem:[%s4806_s4 + $0x8] sm:$0xff]  ;;  %vm83_vm2 = vcmask 130048   ;;  %v378_v45 = vlaneseq }
   0x2   :  { %44 = vst.msk [vmem:[#allocation7] sm:$0xff] %vm39_vm1, %v3678_v1  ;;  %40 = vst.msk [vmem:[#allocation4] sm:$0xff] %vm39_vm1, %v3678_v1  ;;  %3323 = vmatprep.subr.bf16.mxu1 %v3679_v3  ;;  %v49_v6 = vld [vmem:[%s4806_s4 + $0x10] sm:$0xff]  ;;  %v3774_v7 = vpack.c.bf16 %v48_v5, %v47_v4  ;;  %v50_v8 = vld [vmem:[%s4806_s4 + $0x18] sm:$0xff]  ;;  %vm3680_vm3 = vmmov 0   ;;  %vm302_vm4 = vcmask 523264  }
   0x3   :  { %41 = vst.msk [vmem:[#allocation5] sm:$0xff] %vm39_vm1, %v3678_v1  ;;  %45 = vst.msk [vmem:[#allocation8] sm:$0xff] %vm39_vm1, %v3678_v1  ;;  %v74_v9 = vld [vmem:[%s4807_s1] sm:$0xff]  ;;  %v75_v10 = vld [vmem:[%s4807_s1 + $0x8] sm:$0xff]  ;;  %v3789_v13 = vpack.c.bf16 %v50_v8, %v49_v6  ;;  %3031 = vmatprep.mubr.msk.f32.mxu1 %vm3680_vm3, %v3678_v1  ;;  %v3865_v46 = vshrl.u32 %v378_v45, 7  ;;  %s3684_s20 = smov 1  }
   0x4   :  { %v3319_v11 = vpack.c.bf16 %v75_v10, %v74_v9  ;;  %v66_v12 = vld [vmem:[%s4808_s0] sm:$0xff]  ;;  %3325 = vmatpush3.bf16.msra.mxu1 %v3774_v7  ;;  %v52_v15 = vld [vmem:[%s4806_s4 + $0x28] sm:$0xff]  ;;  %v53_v18 = vld [vmem:[%s4806_s4 + $0x30] sm:$0xff] }
   0x5   :  { %3003 = vmatprep.mubr.msk.f32.mxu0 %vm83_vm2, %v66_v12  ;;  %3326 = vmatprep.subr.bf16.mxu1 %v3679_v3  ;;  %v51_v14 = vld [vmem:[%s4806_s4 + $0x20] sm:$0xff]  ;;  %v3802_v16 = vld [vmem:[%s4808_s0 + $0x8] sm:$0xff]  ;;  %v54_v19 = vld [vmem:[%s4806_s4 + $0x38] sm:$0xff]  ;;  %s3681_s4 = smov 32   ;;  %v380_v47 = vsub.s32 0, %v3865_v46 }
   0x6   :  { %3320 = vmatprep.subr.bf16.mxu0 %v3319_v11  ;;  %v3806_v17 = vpack.c.bf16 %v52_v15, %v51_v14  ;;  %v3818_v20 = vpack.c.bf16 %v54_v19, %v53_v18  ;;  %v3849_v29 = vld [vmem:[%s4809_s2] ss:$0 sm:$0xff]  ;;  %v3913_v19 = vld [vmem:[%s4808_s0 + $0x10] sm:$0xff] }
   0x7   :  { %3322 = vmatpush3.bf16.msra.mxu0 %v3319_v11  ;;  %v3857_v36 = vld [vmem:[%s4810_s3] ss:$0 sm:$0xff] }
   0x8   :  { %v3761_v2 = vld [vmem:[#allocation6] sm:$0xff]  ;;  %3335 = vmatprep.subr.bf16.mxu0 %v3679_v3  ;;  %3328 = vmatpush3.bf16.msra.mxu1 %v3789_v13  ;;  %v228_v37 = vmul.f32 %v3857_v36, %v66_v12  ;;  %v3871_v48 = vld [vmem:[%s4811_s7] sm:$0x3]  ;;  %v3887_v62 = vld [vmem:[#allocation9] sm:$0xff] }
   0x9   :  { %291 = vperm.xlu0 %3525, %v3761_v2   ;;  %3329 = vmatprep.subr.bf16.mxu1 %v3679_v3  ;;  %v3825_v21 = vld [vmem:[#allocation7] sm:$0xff]  ;;  %v283_v26 = vld [vmem:[#allocation4] sm:$0xff]  ;;  %v400_v35 = vsub.f32 1.0, %v3761_v2  ;;  %v3874_v49 = vrot.slane %v3871_v48, %v380_v47  ;;  %v542_v4 = vsub.f32 1.0, %v3887_v62 }
   0xa   :  { %3004 = vmatmul.mubr.msk.f32.vlgmr.msra.gmra.mrb[0].mxu0 %vm83_vm2, %v3802_v16  ;;  %v236_v38 = vsel %vm83_vm2, %v228_v37, 0.0  ;;  %v3881_v53 = vld [vmem:[%s4812_s8] ss:$0 sm:$0xff]  ;;  %v284_v56 = vld [vmem:[#allocation5] sm:$0xff]  ;;  %v73_v37 = vld [vmem:[%s4808_s0 + $0x38] sm:$0xff] }
   0xb   :  { %3006 = vmatprep.mubr.msk.f32.mxu0 %vm83_vm2, %v3913_v19 }
   0xc   :  { %3331 = vmatpush3.bf16.msra.mxu1 %v3806_v17 }
   0xd   :  { %3332 = vmatprep.subr.bf16.mxu1 %v3679_v3 }
  0x10   :  { %3334 = vmatpush3.bf16.msra.mxu1 %v3818_v20 }
  0x11   :  { %3347 = vmatprep.subr.bf16.mxu1 %v3679_v3 }
  0x88   :  { %v3827_v22 = vpop.permute.xlu0 %291 }
  0x89   :  { %v294_v23 = vmul.f32 %v3827_v22, %v3825_v21 }
  0x8b   :  { %296 = vrot.lane.b32.xlu0 %v294_v23, %s3681_s4  ;;  %v70_v23 = vld [vmem:[%s4808_s0 + $0x20] sm:$0xff] }
  0xdd   :  { %v3832_v24 = vpop.f32.mrb[0].mxu0 }
  0xde   :  { %v174_v25 = vpop.f32.mrb[1].mxu0 }
  0xdf   :  { %v175_v30 = vadd.f32 %v3849_v29, %v174_v25  ;;  %v55_v25 = vld [vmem:[%s4813_s5] sm:$0xff] }
  0xfd   :  { %v297_v27 = vpop.permute.xlu0 %296 }
  0xfe   :  { %v300_v28 = vsel %vm39_vm1, %v283_v26, %v297_v27  ;;  %v56_v26 = vld [vmem:[%s4813_s5 + $0x8] sm:$0xff]  ;;  %v57_v27 = vld [vmem:[%s4813_s5 + $0x10] sm:$0xff] }
  0xff   :  { %3032 = vmatmul.mubr.msk.f32.vlgmr.msra.gmra.mrb[0].mxu1 %vm302_vm4, %v300_v28  ;;  %v382_v50 = vmul.f32 %v3874_v49, %v300_v28  ;;  %v3934_v28 = vpack.c.bf16 %v56_v26, %v55_v25 }
 0x100   :  { %3349 = vmatpush3.bf16.msra.mxu1 %v3774_v7  ;;  %3069 = vmatprep.mubr.msk.f32.mxu1 %vm3680_vm3, %v3678_v1 }
 0x101   :  { %3350 = vmatprep.subr.bf16.mxu1 %v3679_v3  ;;  %v383_v51 = vsel %vm302_vm4, %v382_v50, 0.0  ;;  %3337 = vmatpush3.bf16.msra.mxu0 %v3934_v28 }
 0x102   :  { %3338 = vmatprep.subr.bf16.mxu0 %v3679_v3 }
 0x104   :  { %3352 = vmatpush3.bf16.msra.mxu1 %v3789_v13 }
 0x105   :  { %3353 = vmatprep.subr.bf16.mxu1 %v3679_v3 }
 0x108   :  { %3355 = vmatpush3.bf16.msra.mxu1 %v3806_v17 }
 0x109   :  { %3356 = vmatprep.subr.bf16.mxu1 %v3679_v3 }
 0x10c   :  { %3358 = vmatpush3.bf16.msra.mxu1 %v3818_v20 }
 0x10d   :  { %3371 = vmatprep.subr.bf16.mxu1 %v3679_v3 }
 0x1d2   :  { %v372_v31 = vpop.f32.mrb[0].mxu1 }
 0x1d3   :  { %v376_v32 = vadd.f32 %v372_v31, %v175_v30  ;;  %v3033_v33 = vpop.f32.mrb[1].mxu1  ;;  %v58_v30 = vld [vmem:[%s4813_s5 + $0x18] sm:$0xff]  ;;  %v71_v31 = vld [vmem:[%s4808_s0 + $0x28] sm:$0xff] }
 0x1d4   :  { %v72_v33 = vld [vmem:[%s4808_s0 + $0x30] sm:$0xff] }
 0x1d5   :  { %3541 = vtanh.f32 %v376_v32  ;;  %v2790_v39 = vmul.f32 -1.442695, %v376_v32  ;;  %v3946_v32 = vpack.c.bf16 %v58_v30, %v57_v27 }
 0x1d7   :  { %3543 = vpow2.f32 %v2790_v39  ;;  %3340 = vmatpush3.bf16.msra.mxu0 %v3946_v32  ;;  %v61_v39 = vld [vmem:[%s4813_s5 + $0x30] sm:$0xff] }
 0x1d8   :  { %3341 = vmatprep.subr.bf16.mxu0 %v3679_v3 }
 0x1df   :  { %v3542_v34 = vpop.eup %3541 }
 0x1e0   :  { %395 = vrot.lane.b32.xlu1 %v3542_v34, %s3682_s23  ;;  %v59_v34 = vld [vmem:[%s4813_s5 + $0x20] sm:$0xff] }
 0x1e1   :  { %v3544_v40 = vpop.eup %3543 }
 0x1e2   :  { %v390_v41 = vadd.f32 1.0, %v3544_v40  ;;  %v62_v40 = vld [vmem:[%s4813_s5 + $0x38] sm:$0xff] }
 0x1e4   :  { %409 = vperm.xlu1 %3526, %v400_v35   ;;  %3545 = vrcp.f32 %v390_v41  ;;  %v60_v35 = vld [vmem:[%s4813_s5 + $0x28] sm:$0xff]  ;;  %v3977_v41 = vpack.c.bf16 %v62_v40, %v61_v39 }
 0x1ee   :  { %v3861_v42 = vpop.eup %3545 }
 0x1ef   :  { %v401_v57 = vmul.f32 %v3861_v42, %v284_v56 }
 0x208   :  { %237 = vadd.xlane.f32.xlu1 %v236_v38  ;;  %v3964_v38 = vpack.c.bf16 %v60_v35, %v59_v34 }
 0x20a   :  { %3343 = vmatpush3.bf16.msra.mxu0 %v3964_v38 }
 0x20b   :  { %3344 = vmatprep.subr.bf16.mxu0 %v3679_v3 }
 0x20e   :  { %3346 = vmatpush3.bf16.msra.mxu0 %v3977_v41 }
 0x20f   :  { %3359 = vmatprep.subr.bf16.mxu0 %v3679_v3 }
 0x252   :  { %v396_v43 = vpop.permute.xlu1 %395 }
 0x253   :  { %v398_v44 = vmul.f32 %v3861_v42, %v396_v43 }
 0x255   :  { %403 = vrot.lane.b32.xlu0 %v398_v44, %s3683_s26  ;;  %v399_v8 = vmul.f32 %v398_v44, %v3827_v22  ;;  %v3918_v22 = vld [vmem:[%s4808_s0 + $0x18] sm:$0xff] }
 0x256   :  { %3007 = vmatmul.mubr.msk.f32.gmra.mrb[2].mxu0 %vm83_vm2, %v3918_v22 }
 0x257   :  { %3009 = vmatprep.mubr.msk.f32.mxu0 %vm83_vm2, %v70_v23 }
 0x25a   :  { %3010 = vmatmul.mubr.msk.f32.gmra.mrb[4].mxu0 %vm83_vm2, %v71_v31 }
 0x25b   :  { %3012 = vmatprep.mubr.msk.f32.mxu0 %vm83_vm2, %v72_v33 }
 0x25e   :  { %3013 = vmatmul.mubr.msk.f32.gmra.mrb[6].mxu0 %vm83_vm2, %v73_v37 }
 0x25f   :  { %3050 = vmatprep.mubr.msk.f32.mxu0 %vm3680_vm3, %v3678_v1 }
 0x263   :  { %v410_v52 = vpop.permute.xlu1 %409 }
 0x274   :  { %384 = vadd.xlane.f32.xlu0 %v383_v51 }
 0x295   :  { %v238_v54 = vpop.xlane.xlu1 %237 }
 0x296   :  { %v266_v55 = vadd.f32 %v3881_v53, %v238_v54 }
 0x298   :  { %275 = vst.msk [vmem:[#allocation3] sm:$0xff] %vm42_vm0, %v266_v55 }
 0x29f   :  { %v377_v61 = vld [vmem:[#allocation3] sm:$0xff] }
 0x2c7   :  { %v404_v58 = vpop.permute.xlu0 %403 }
 0x2c8   :  { %v406_v59 = vadd.f32 %v404_v58, %v401_v57  ;;  %v4017_v57 = vld [vmem:[%s4814_s6] ss:$0 sm:$0xff] }
 0x2ca   :  { %v412_v60 = vmul.f32 %v410_v52, %v406_v59 }
 0x2cc   :  { %414 = vrot.lane.b32.xlu0 %v412_v60, %s3681_s4 }
 0x301   :  { %v385_v63 = vpop.xlane.xlu0 %384 }
 0x302   :  { %v386_v2 = vadd.f32 %v385_v63, %v377_v61 }
 0x304   :  { %vm424_vm5 = vcmp.gt.f32.partialorder %v386_v2, 0.0 }
 0x305   :  { %v3891_v5 = vsel %vm424_vm5, 1.0, %v3678_v1 }
 0x306   :  { %429 = vperm.xlu1 %3526, %v3891_v5   ;;  %v3895_v6 = vmul.f32 %v3891_v5, %v542_v4  ;;  %v549_v14 = vsub.f32 1.0, %v3891_v5  ;;  %v180_v5 = vadd.f32 %v3832_v24, %v3849_v29 }
 0x308   :  { %v550_v18 = vmul.f32 %v549_v14, %v542_v4 }
 0x33e   :  { %v415_v9 = vpop.permute.xlu0 %414 }
 0x33f   :  { %v3898_v10 = vadd.f32 %v415_v9, %v399_v8 }
 0x341   :  { %3547 = vtanh.f32 %v3898_v10 }
 0x34b   :  { %v3548_v11 = vpop.eup %3547 }
 0x34c   :  { %420 = vrot.lane.b32.xlu1 %v3548_v11, %s3681_s4 }
 0x385   :  { %v3902_v12 = vpop.permute.xlu1 %429 }
 0x386   :  { %v432_v15 = vmul.f32 %v3902_v12, %v3825_v21 }
 0x388   :  { %438 = vrot.lane.b32.xlu1 %v432_v15, %s3681_s4  ;;  %v287_v15 = vld [vmem:[#allocation8] sm:$0xff] }
 0x38c   :  { %553 = vperm.xlu1 %3526, %v550_v18  }
 0x3be   :  { %v421_v43 = vpop.permute.xlu1 %420 }
 0x3bf   :  { %v423_v44 = vmul.f32 %v3861_v42, %v421_v43  ;;  %v4002_v42 = vpop.f32.mrb[2].mxu0 }
 0x3c0   :  { %v4004_v51 = vpop.f32.mrb[3].mxu0 }
 0x3c1   :  { %434 = vrot.lane.b32.xlu0 %v423_v44, %s3682_s23  ;;  %v4006_v52 = vpop.f32.mrb[4].mxu0 }
 0x3c2   :  { %v4008_v54 = vpop.f32.mrb[5].mxu0 }
 0x3c3   :  { %v4010_v55 = vpop.f32.mrb[6].mxu0 }
 0x3c4   :  { %v4012_v56 = vpop.f32.mrb[7].mxu0 }
 0x3fa   :  { %v439_v45 = vpop.permute.xlu1 %438 }
 0x40b   :  { %v554_v18 = vpop.permute.xlu1 %553 }
 0x40c   :  { %v556_v23 = vmul.f32 %v554_v18, %v287_v15  ;;  %v587_v30 = vmul.f32 %v554_v18, %v3825_v21 }
 0x433   :  { %v3984_v47 = vpop.permute.xlu0 %434 }
 0x434   :  { %v3988_v50 = vsel %vm39_vm1, %v3984_v47, %v439_v45 }
 0x435   :  { %3051 = vmatmul.mubr.msk.f32.vlgmr.msra.gmra.mrb[8].mxu0 %vm302_vm4, %v3988_v50 }
 0x436   :  { %3361 = vmatpush3.bf16.msra.mxu0 %v3934_v28  ;;  %3088 = vmatprep.mubr.msk.f32.mxu0 %vm3680_vm3, %v3678_v1 }
 0x437   :  { %3362 = vmatprep.subr.bf16.mxu0 %v3679_v3 }
 0x43a   :  { %3364 = vmatpush3.bf16.msra.mxu0 %v3946_v32 }
 0x43b   :  { %3365 = vmatprep.subr.bf16.mxu0 %v3679_v3 }
 0x43e   :  { %3367 = vmatpush3.bf16.msra.mxu0 %v3964_v38 }
 0x43f   :  { %3368 = vmatprep.subr.bf16.mxu0 %v3679_v3 }
 0x442   :  { %3370 = vmatpush3.bf16.msra.mxu0 %v3977_v41 }
 0x443   :  { %3383 = vmatprep.subr.bf16.mxu0 %v3679_v3 }
 0x508   :  { %v517_v58 = vpop.f32.mrb[8].mxu0 }
 0x509   :  { %v518_v59 = vadd.f32 %v4017_v57, %v517_v58  ;;  %v3052_v60 = vpop.f32.mrb[9].mxu0 }
 0x50b   :  { %3549 = vtanh.f32 %v518_v59  ;;  %v2794_v63 = vmul.f32 -1.442695, %v518_v59 }
 0x50d   :  { %3551 = vpow2.f32 %v2794_v63 }
 0x515   :  { %v3550_v61 = vpop.eup %3549 }
 0x516   :  { %538 = vrot.lane.b32.xlu0 %v3550_v61, %s3682_s23 }
 0x517   :  { %v3552_v2 = vpop.eup %3551 }
 0x518   :  { %v533_v4 = vadd.f32 1.0, %v3552_v2 }
 0x51a   :  { %571 = vperm.xlu0 %3525, %v3895_v6   ;;  %3553 = vrcp.f32 %v533_v4 }
 0x51e   :  { %545 = vperm.xlu0 %3525, %v3887_v62  }
 0x524   :  { %v3554_v8 = vpop.eup %3553 }
 0x525   :  { %v563_v25 = vmul.f32 %v3554_v8, %v287_v15 }
 0x588   :  { %v539_v9 = vpop.permute.xlu0 %538 }
 0x589   :  { %v541_v11 = vmul.f32 %v3554_v8, %v539_v9 }
 0x58b   :  { %565 = vrot.lane.b32.xlu1 %v541_v11, %s3683_s26 }
 0x58f   :  { %558 = vrot.lane.b32.xlu1 %v556_v23, %s3681_s4 }
 0x599   :  { %v572_v27 = vpop.permute.xlu0 %571 }
 0x59d   :  { %v546_v31 = vpop.permute.xlu0 %545 }
 0x59e   :  { %v548_v34 = vmul.f32 %v546_v31, %v541_v11  ;;  %v229_v11 = vmul.f32 %v3857_v36, %v3802_v16 }
 0x5a0   :  { %v239_v15 = vsel %vm83_vm2, %v229_v11, 0.0 }
 0x5fd   :  { %v566_v26 = vpop.permute.xlu1 %565 }
 0x5fe   :  { %v568_v6 = vadd.f32 %v566_v26, %v563_v25 }
 0x600   :  { %v574_v62 = vmul.f32 %v572_v27, %v568_v6 }
 0x601   :  { %v559_v33 = vpop.permute.xlu1 %558 }
 0x602   :  { %576 = vrot.lane.b32.xlu0 %v574_v62, %s3681_s4  ;;  %v561_v35 = vadd.f32 %v559_v33, %v548_v34 }
 0x606   :  { %589 = vrot.lane.b32.xlu0 %v587_v30, %s3682_s23 }
 0x674   :  { %v577_v37 = vpop.permute.xlu0 %576 }
 0x675   :  { %v4028_v39 = vadd.f32 %v577_v37, %v561_v35 }
 0x677   :  { %3555 = vtanh.f32 %v4028_v39 }
 0x678   :  { %v590_v58 = vpop.permute.xlu0 %589 }
 0x681   :  { %v3556_v40 = vpop.eup %3555 }
 0x682   :  { %582 = vrot.lane.b32.xlu1 %v3556_v40, %s3681_s4 }
 0x6f4   :  { %v583_v43 = vpop.permute.xlu1 %582 }
 0x6f5   :  { %v585_v44 = vmul.f32 %v3554_v8, %v583_v43 }
 0x6f7   :  { %v586_v45 = vmul.f32 %v585_v44, %v546_v31  ;;  %v593_v21 = vmul.f32 %v585_v44, %v572_v27 }
 0x6f9   :  { %v592_v59 = vadd.f32 %v590_v58, %v586_v45 }
 0x6fb   :  { %v4032_v60 = vadd.f32 %v593_v21, %v592_v59 }
 0x6fd   :  { %v612_v61 = vmul.f32 %v4032_v60, %v3902_v12 }
 0x6ff   :  { %614 = vrot.lane.b32.xlu1 %v612_v61, %s3683_s26 }
 0x703   :  { %726 = vperm.xlu1 %3526, %v549_v14  }
 0x771   :  { %v615_v63 = vpop.permute.xlu1 %614 }
 0x772   :  { %v617_v2 = vsel %vm39_vm1, %v3984_v47, %v615_v63 }
 0x773   :  { %3070 = vmatmul.mubr.msk.f32.vlgmr.msra.gmra.mrb[2].mxu1 %vm302_vm4, %v617_v2  ;;  %v696_v27 = vmul.f32 %v617_v2, %v3874_v49 }
 0x774   :  { %3373 = vmatpush3.bf16.msra.mxu1 %v3774_v7  ;;  %3107 = vmatprep.mubr.msk.f32.mxu1 %vm3680_vm3, %v3678_v1 }
 0x775   :  { %3374 = vmatprep.subr.bf16.mxu1 %v3679_v3 }
 0x778   :  { %3376 = vmatpush3.bf16.msra.mxu1 %v3789_v13 }
 0x779   :  { %3377 = vmatprep.subr.bf16.mxu1 %v3679_v3 }
 0x77c   :  { %3379 = vmatpush3.bf16.msra.mxu1 %v3806_v17 }
 0x77d   :  { %3380 = vmatprep.subr.bf16.mxu1 %v3679_v3 }
 0x780   :  { %3382 = vmatpush3.bf16.msra.mxu1 %v3818_v20 }
 0x781   :  { %3395 = vmatprep.subr.bf16.mxu1 %v3679_v3 }
 0x782   :  { %v727_v31 = vpop.permute.xlu1 %726 }
 0x846   :  { %v689_v14 = vpop.f32.mrb[2].mxu1 }
 0x847   :  { %v693_v4 = vadd.f32 %v689_v14, %v180_v5  ;;  %v3071_v8 = vpop.f32.mrb[3].mxu1 }
 0x849   :  { %3557 = vtanh.f32 %v693_v4  ;;  %v2797_v18 = vmul.f32 -1.442695, %v693_v4  ;;  %v523_v4 = vsub.s32 1, %v3865_v46  ;;  %v3685_v46 = vmov 1  }
 0x84a   :  { %3527 = vset.pattern.permute.xlu0 %v3685_v46 }
 0x84b   :  { %3559 = vpow2.f32 %v2797_v18  ;;  %v4085_v8 = vrot.slane %v3871_v48, %v523_v4 }
 0x853   :  { %v3558_v9 = vpop.eup %3557 }
 0x854   :  { %709 = vrot.lane.b32.xlu0 %v3558_v9, %s3682_s23  ;;  %v525_v9 = vmul.f32 %v4085_v8, %v3988_v50 }
 0x855   :  { %v3560_v23 = vpop.eup %3559 }
 0x856   :  { %v704_v24 = vadd.f32 1.0, %v3560_v23  ;;  %v526_v11 = vsel %vm302_vm4, %v525_v9, 0.0 }
 0x858   :  { %715 = vrot.lane.b32.xlu0 %v3898_v10, %s3683_s26  ;;  %3561 = vrcp.f32 %v704_v24  ;;  %v697_v10 = vsel %vm302_vm4, %v696_v27, 0.0 }
 0x862   :  { %v3562_v25 = vpop.eup %3561 }
 0x877   :  { %240 = vadd.xlane.f32.xlu0 %v239_v15 }
 0x8c6   :  { %v710_v26 = vpop.permute.xlu0 %709 }
 0x8c7   :  { %v712_v6 = vmul.f32 %v3562_v25, %v710_v26 }
 0x8c9   :  { %720 = vrot.lane.b32.xlu1 %v712_v6, %s3683_s26  ;;  %v713_v58 = vmul.f32 %v712_v6, %v3902_v12 }
 0x8ca   :  { %v716_v62 = vpop.permute.xlu0 %715 }
 0x8cb   :  { %v718_v33 = vmul.f32 %v3562_v25, %v716_v62 }
 0x8ed   :  { %698 = vadd.xlane.f32.xlu1 %v697_v10 }
 0x904   :  { %v241_v16 = vpop.xlane.xlu0 %240 }
 0x905   :  { %v267_v30 = vadd.f32 %v3881_v53, %v241_v16 }
 0x907   :  { %276 = vst.msk [vmem:[#allocation3 + $0x8] sm:$0xff] %vm42_vm0, %v267_v30 }
 0x90e   :  { %v695_v40 = vld [vmem:[#allocation3 + $0x8] sm:$0xff] }
 0x93b   :  { %v721_v34 = vpop.permute.xlu1 %720 }
 0x93c   :  { %v723_v35 = vadd.f32 %v721_v34, %v718_v33 }
 0x93e   :  { %v729_v37 = vmul.f32 %v727_v31, %v723_v35 }
 0x940   :  { %731 = vrot.lane.b32.xlu0 %v729_v37, %s3681_s4 }
 0x97a   :  { %v699_v43 = vpop.xlane.xlu1 %698 }
 0x97b   :  { %v700_v44 = vadd.f32 %v699_v43, %v695_v40 }
 0x97d   :  { %vm741_vm6 = vcmp.gt.f32.partialorder %v700_v44, 0.0 }
 0x97e   :  { %v4067_v45 = vsel %vm741_vm6, 1.0, %v3678_v1 }
 0x97f   :  { %746 = vperm.xlu1 %3526, %v4067_v45   ;;  %v851_v62 = vsub.f32 1.0, %v4067_v45 }
 0x9b2   :  { %v732_v59 = vpop.permute.xlu0 %731 }
 0x9b3   :  { %v4071_v21 = vadd.f32 %v732_v59, %v713_v58 }
 0x9b5   :  { %3563 = vtanh.f32 %v4071_v21 }
 0x9bf   :  { %v3564_v61 = vpop.eup %3563 }
 0x9c0   :  { %737 = vrot.lane.b32.xlu0 %v3564_v61, %s3681_s4 }
 0x9fe   :  { %v4075_v63 = vpop.permute.xlu1 %746 }
 0x9ff   :  { %v749_v2 = vmul.f32 %v4075_v63, %v4032_v60 }
 0xa01   :  { %755 = vrot.lane.b32.xlu0 %v749_v2, %s3683_s26 }
 0xa05   :  { %864 = vrot.lane.b32.xlu0 %v4067_v45, %s3684_s20 }
 0xa32   :  { %v738_v5 = vpop.permute.xlu0 %737 }
 0xa33   :  { %v740_v14 = vmul.f32 %v3562_v25, %v738_v5 }
 0xa35   :  { %751 = vrot.lane.b32.xlu1 %v740_v14, %s3682_s23 }
 0xa59   :  { %527 = vadd.xlane.f32.xlu1 %v526_v11 }
 0xa73   :  { %v756_v15 = vpop.permute.xlu0 %755 }
 0xa77   :  { %v865_v16 = vpop.permute.xlu0 %864 }
 0xaa7   :  { %v4090_v18 = vpop.permute.xlu1 %751 }
 0xaa8   :  { %v4094_v23 = vsel %vm39_vm1, %v4090_v18, %v756_v15 }
 0xaa9   :  { %3089 = vmatmul.mubr.msk.f32.vlgmr.msra.gmra.mrb[10].mxu0 %vm302_vm4, %v4094_v23 }
 0xaaa   :  { %3385 = vmatpush3.bf16.msra.mxu0 %v3934_v28  ;;  %3126 = vmatprep.mubr.msk.f32.mxu0 %vm3680_vm3, %v3678_v1 }
 0xaab   :  { %3386 = vmatprep.subr.bf16.mxu0 %v3679_v3 }
 0xaae   :  { %3388 = vmatpush3.bf16.msra.mxu0 %v3946_v32 }
 0xaaf   :  { %3389 = vmatprep.subr.bf16.mxu0 %v3679_v3 }
 0xab2   :  { %3391 = vmatpush3.bf16.msra.mxu0 %v3964_v38 }
 0xab3   :  { %3392 = vmatprep.subr.bf16.mxu0 %v3679_v3 }
 0xab6   :  { %3394 = vmatpush3.bf16.msra.mxu0 %v3977_v41 }
 0xab7   :  { %3407 = vmatprep.subr.bf16.mxu0 %v3679_v3 }
 0xae6   :  { %v528_v25 = vpop.xlane.xlu1 %527 }
 0xae7   :  { %v529_v26 = vadd.f32 %v3881_v53, %v528_v25 }
 0xae9   :  { %vm595_vm7 = vcmp.gt.f32.partialorder %v529_v26, 0.0 }
 0xaea   :  { %v2795_v27 = vsel %vm595_vm7, 1.0, %v3678_v1  ;;  %vm609_vm7 = vcmask 785408  }
 0xaeb   :  { %v849_v10 = vsub.f32 1.0, %v2795_v27 }
 0xaed   :  { %v867_v30 = vmul.f32 %v865_v16, %v849_v10 }
 0xb7c   :  { %v828_v48 = vpop.f32.mrb[10].mxu0 }
 0xb7d   :  { %v829_v50 = vadd.f32 %v4017_v57, %v828_v48  ;;  %v3090_v24 = vpop.f32.mrb[11].mxu0 }
 0xb7f   :  { %3565 = vtanh.f32 %v829_v50  ;;  %v2800_v31 = vmul.f32 -1.442695, %v829_v50 }
 0xb81   :  { %3567 = vpow2.f32 %v2800_v31 }
 0xb89   :  { %v3566_v6 = vpop.eup %3565 }
 0xb8a   :  { %845 = vrot.lane.b32.xlu0 %v3566_v6, %s3682_s23 }
 0xb8b   :  { %v3568_v33 = vpop.eup %3567 }
 0xb8c   :  { %v840_v34 = vadd.f32 1.0, %v3568_v33 }
 0xb8e   :  { %853 = vrot.lane.b32.xlu0 %v851_v62, %s3684_s20  ;;  %3569 = vrcp.f32 %v840_v34  ;;  %v185_v34 = vadd.f32 %v3849_v29, %v4004_v51 }
 0xb92   :  { %880 = vperm.xlu0 %3527, %v867_v30  }
 0xb96   :  { %869 = vrot.lane.b32.xlu0 %v4028_v39, %s3683_s26 }
 0xb98   :  { %v3570_v35 = vpop.eup %3569 }
 0xbfc   :  { %v846_v37 = vpop.permute.xlu0 %845 }
 0xbfd   :  { %v848_v40 = vmul.f32 %v3570_v35, %v846_v37 }
 0xbff   :  { %874 = vrot.lane.b32.xlu0 %v848_v40, %s3683_s26 }
 0xc00   :  { %v854_v43 = vpop.permute.xlu0 %853 }
 0xc01   :  { %v856_v44 = vmul.f32 %v854_v43, %v849_v10 }
 0xc03   :  { %600 = vperm.xlu0 %3527, %v2795_v27  }
 0xc07   :  { %859 = vperm.xlu0 %3527, %v856_v44   ;;  %v230_v44 = vmul.f32 %v3857_v36, %v3913_v19 }
 0xc0b   :  { %3528 = vset.pattern.permute.xlu0 %v3677_v0 }
 0xc11   :  { %v881_v58 = vpop.permute.xlu0 %880 }
 0xc15   :  { %v870_v59 = vpop.permute.xlu0 %869 }
 0xc16   :  { %v872_v61 = vmul.f32 %v3570_v35, %v870_v59 }
 0xc71   :  { %v875_v2 = vpop.permute.xlu0 %874 }
 0xc72   :  { %v877_v5 = vadd.f32 %v875_v2, %v872_v61 }
 0xc74   :  { %v883_v14 = vmul.f32 %v881_v58, %v877_v5 }
 0xc76   :  { %885 = vrot.lane.b32.xlu1 %v883_v14, %s3681_s4 }
 0xc7a   :  { %1020 = vrot.lane.b32.xlu1 %v4071_v21, %s3683_s26 }
 0xc82   :  { %v4124_v4 = vpop.permute.xlu0 %600 }
 0xc83   :  { %v850_v15 = vmul.f32 %v848_v40, %v4124_v4 }
 0xc86   :  { %v860_v9 = vpop.permute.xlu0 %859 }
 0xc87   :  { %v862_v11 = vmul.f32 %v860_v9, %v4028_v39  ;;  %v896_v21 = vmul.f32 %v860_v9, %v4032_v60 }
 0xc89   :  { %v863_v48 = vadd.f32 %v862_v11, %v850_v15 }
 0xce8   :  { %v886_v50 = vpop.permute.xlu1 %885 }
 0xce9   :  { %v4128_v24 = vadd.f32 %v886_v50, %v863_v48 }
 0xceb   :  { %3571 = vtanh.f32 %v4128_v24 }
 0xcec   :  { %v1021_v15 = vpop.permute.xlu1 %1020 }
 0xcf5   :  { %v3572_v25 = vpop.eup %3571 }
 0xcf6   :  { %891 = vrot.lane.b32.xlu0 %v3572_v25, %s3681_s4 }
 0xd68   :  { %v892_v26 = vpop.permute.xlu0 %891 }
 0xd69   :  { %v894_v6 = vmul.f32 %v3570_v35, %v892_v26 }
 0xd6b   :  { %v895_v27 = vmul.f32 %v894_v6, %v4124_v4  ;;  %v898_v16 = vmul.f32 %v894_v6, %v881_v58  ;;  %v242_v58 = vsel %vm83_vm2, %v230_v44, 0.0 }
 0xd6d   :  { %v897_v10 = vadd.f32 %v896_v21, %v895_v27 }
 0xd6f   :  { %v4134_v39 = vadd.f32 %v898_v16, %v897_v10 }
 0xd71   :  { %v917_v30 = vmul.f32 %v4134_v39, %v4075_v63 }
 0xd73   :  { %919 = vrot.lane.b32.xlu0 %v917_v30, %s3683_s26 }
 0xde5   :  { %v920_v31 = vpop.permute.xlu0 %919 }
 0xde6   :  { %v922_v33 = vsel %vm39_vm1, %v4090_v18, %v920_v31 }
 0xde7   :  { %3108 = vmatmul.mubr.msk.f32.vlgmr.msra.gmra.mrb[4].mxu1 %vm302_vm4, %v922_v33  ;;  %v1001_v45 = vmul.f32 %v922_v33, %v3874_v49 }
 0xde8   :  { %3397 = vmatpush3.bf16.msra.mxu1 %v3774_v7  ;;  %3145 = vmatprep.mubr.msk.f32.mxu1 %vm3680_vm3, %v3678_v1 }
 0xde9   :  { %3398 = vmatprep.subr.bf16.mxu1 %v3679_v3 }
 0xdec   :  { %3400 = vmatpush3.bf16.msra.mxu1 %v3789_v13 }
 0xded   :  { %3401 = vmatprep.subr.bf16.mxu1 %v3679_v3 }
 0xdf0   :  { %3403 = vmatpush3.bf16.msra.mxu1 %v3806_v17 }
 0xdf1   :  { %3404 = vmatprep.subr.bf16.mxu1 %v3679_v3 }
 0xdf4   :  { %3406 = vmatpush3.bf16.msra.mxu1 %v3818_v20 }
 0xdf5   :  { %3419 = vmatprep.subr.bf16.mxu1 %v3679_v3 }
 0xeba   :  { %v994_v35 = vpop.f32.mrb[4].mxu1 }
 0xebb   :  { %v998_v37 = vadd.f32 %v994_v35, %v185_v34  ;;  %v3109_v40 = vpop.f32.mrb[5].mxu1 }
 0xebd   :  { %3573 = vtanh.f32 %v998_v37  ;;  %v2804_v59 = vmul.f32 -1.442695, %v998_v37 }
 0xebf   :  { %3575 = vpow2.f32 %v2804_v59 }
 0xec7   :  { %v3574_v43 = vpop.eup %3573 }
 0xec8   :  { %1014 = vrot.lane.b32.xlu0 %v3574_v43, %s3682_s23  ;;  %v832_v43 = vmul.f32 %v4094_v23, %v4085_v8 }
 0xec9   :  { %v3576_v51 = vpop.eup %3575 }
 0xeca   :  { %v1009_v61 = vadd.f32 1.0, %v3576_v51  ;;  %v833_v44 = vsel %vm302_vm4, %v832_v43, 0.0 }
 0xecc   :  { %1030 = vperm.xlu0 %3528, %v851_v62   ;;  %3577 = vrcp.f32 %v1009_v61  ;;  %v1002_v62 = vsel %vm302_vm4, %v1001_v45, 0.0 }
 0xed0   :  { %3529 = vset.pattern.permute.xlu0 %v3685_v46 }
 0xed6   :  { %v3578_v2 = vpop.eup %3577 }
 0xed7   :  { %v1023_v48 = vmul.f32 %v3578_v2, %v1021_v15 }
 0xeeb   :  { %243 = vadd.xlane.f32.xlu0 %v242_v58 }
 0xf3a   :  { %v1015_v5 = vpop.permute.xlu0 %1014 }
 0xf3b   :  { %v1017_v14 = vmul.f32 %v3578_v2, %v1015_v5 }
 0xf3d   :  { %1025 = vrot.lane.b32.xlu1 %v1017_v14, %s3683_s26  ;;  %v1018_v16 = vmul.f32 %v1017_v14, %v4075_v63 }
 0xf4b   :  { %v1031_v9 = vpop.permute.xlu0 %1030 }
 0xf61   :  { %1003 = vadd.xlane.f32.xlu1 %v1002_v62 }
 0xf78   :  { %v244_v19 = vpop.xlane.xlu0 %243 }
 0xf79   :  { %v268_v11 = vadd.f32 %v3881_v53, %v244_v19 }
 0xf7b   :  { %277 = vst.msk [vmem:[#allocation3 + $0x10] sm:$0xff] %vm42_vm0, %v268_v11 }
 0xf82   :  { %v1000_v6 = vld [vmem:[#allocation3 + $0x10] sm:$0xff] }
 0xfaf   :  { %v1026_v50 = vpop.permute.xlu1 %1025 }
 0xfb0   :  { %v1028_v25 = vadd.f32 %v1026_v50, %v1023_v48 }
 0xfb2   :  { %v1033_v26 = vmul.f32 %v1031_v9, %v1028_v25 }
 0xfb4   :  { %1035 = vrot.lane.b32.xlu0 %v1033_v26, %s3681_s4 }
 0xfee   :  { %v1004_v21 = vpop.xlane.xlu1 %1003 }
 0xfef   :  { %v1005_v27 = vadd.f32 %v1004_v21, %v1000_v6 }
 0xff1   :  { %vm1045_vm8 = vcmp.gt.f32.partialorder %v1005_v27, 0.0 }
 0xff2   :  { %v4168_v10 = vsel %vm1045_vm8, 1.0, %v3678_v1 }
 0xff3   :  { %1050 = vperm.xlu1 %3526, %v4168_v10   ;;  %v1155_v19 = vsub.f32 1.0, %v4168_v10 }
0x1026   :  { %v1036_v30 = vpop.permute.xlu0 %1035 }
0x1027   :  { %v4172_v31 = vadd.f32 %v1036_v30, %v1018_v16 }
0x1029   :  { %3579 = vtanh.f32 %v4172_v31 }
0x1033   :  { %v3580_v33 = vpop.eup %3579 }
0x1034   :  { %1041 = vrot.lane.b32.xlu0 %v3580_v33, %s3681_s4 }
0x1072   :  { %v4176_v34 = vpop.permute.xlu1 %1050 }
0x1073   :  { %v1053_v35 = vmul.f32 %v4176_v34, %v4134_v39 }
0x1075   :  { %1059 = vrot.lane.b32.xlu0 %v1053_v35, %s3683_s26 }
0x1079   :  { %1168 = vrot.lane.b32.xlu0 %v4168_v10, %s3684_s20 }
0x10a6   :  { %v1042_v37 = vpop.permute.xlu0 %1041 }
0x10a7   :  { %v1044_v40 = vmul.f32 %v3578_v2, %v1042_v37 }
0x10a9   :  { %1055 = vrot.lane.b32.xlu1 %v1044_v40, %s3682_s23 }
0x10cd   :  { %834 = vadd.xlane.f32.xlu1 %v833_v44 }
0x10e7   :  { %v1060_v58 = vpop.permute.xlu0 %1059 }
0x10eb   :  { %v1169_v11 = vpop.permute.xlu0 %1168 }
0x111b   :  { %v4187_v59 = vpop.permute.xlu1 %1055 }
0x111c   :  { %v4191_v51 = vsel %vm39_vm1, %v4187_v59, %v1060_v58 }
0x111d   :  { %3127 = vmatmul.mubr.msk.f32.vlgmr.msra.gmra.mrb[12].mxu0 %vm302_vm4, %v4191_v51 }
0x111e   :  { %3409 = vmatpush3.bf16.msra.mxu0 %v3934_v28  ;;  %3164 = vmatprep.mubr.msk.f32.mxu0 %vm3680_vm3, %v3678_v1 }
0x111f   :  { %3410 = vmatprep.subr.bf16.mxu0 %v3679_v3 }
0x1122   :  { %3412 = vmatpush3.bf16.msra.mxu0 %v3946_v32 }
0x1123   :  { %3413 = vmatprep.subr.bf16.mxu0 %v3679_v3 }
0x1126   :  { %3415 = vmatpush3.bf16.msra.mxu0 %v3964_v38 }
0x1127   :  { %3416 = vmatprep.subr.bf16.mxu0 %v3679_v3 }
0x112a   :  { %3418 = vmatpush3.bf16.msra.mxu0 %v3977_v41 }
0x112b   :  { %3431 = vmatprep.subr.bf16.mxu0 %v3679_v3 }
0x115a   :  { %v835_v5 = vpop.xlane.xlu1 %834 }
0x115b   :  { %v836_v14 = vadd.f32 %v3881_v53, %v835_v5 }
0x115d   :  { %vm900_vm9 = vcmp.gt.f32.partialorder %v836_v14, 0.0 }
0x115e   :  { %v2801_v62 = vsel %vm900_vm9, 1.0, %v3678_v1 }
0x115f   :  { %v1153_v9 = vsub.f32 1.0, %v2801_v62 }
0x1161   :  { %v1171_v15 = vmul.f32 %v1169_v11, %v1153_v9 }
0x11f0   :  { %v1132_v23 = vpop.f32.mrb[12].mxu0 }
0x11f1   :  { %v1133_v61 = vadd.f32 %v4017_v57, %v1132_v23  ;;  %v3128_v2 = vpop.f32.mrb[13].mxu0 }
0x11f3   :  { %3581 = vtanh.f32 %v1133_v61  ;;  %v2807_v48 = vmul.f32 -1.442695, %v1133_v61 }
0x11f5   :  { %3583 = vpow2.f32 %v2807_v48 }
0x11fd   :  { %v3582_v45 = vpop.eup %3581 }
0x11fe   :  { %1149 = vrot.lane.b32.xlu0 %v3582_v45, %s3682_s23 }
0x11ff   :  { %v3584_v50 = vpop.eup %3583 }
0x1200   :  { %v1144_v25 = vadd.f32 1.0, %v3584_v50 }
0x1202   :  { %1157 = vrot.lane.b32.xlu0 %v1155_v19, %s3684_s20  ;;  %3585 = vrcp.f32 %v1144_v25 }
0x1206   :  { %1184 = vperm.xlu0 %3529, %v1171_v15  }
0x120a   :  { %1173 = vrot.lane.b32.xlu0 %v4128_v24, %s3683_s26 }
0x120c   :  { %v3586_v26 = vpop.eup %3585 }
0x1270   :  { %v1150_v6 = vpop.permute.xlu0 %1149 }
0x1271   :  { %v1152_v21 = vmul.f32 %v3586_v26, %v1150_v6 }
0x1273   :  { %1178 = vrot.lane.b32.xlu0 %v1152_v21, %s3683_s26 }
0x1274   :  { %v1158_v27 = vpop.permute.xlu0 %1157 }
0x1275   :  { %v1160_v16 = vmul.f32 %v1158_v27, %v1153_v9 }
0x1277   :  { %905 = vperm.xlu0 %3529, %v2801_v62  }
0x127b   :  { %1163 = vperm.xlu0 %3529, %v1160_v16  }
0x127f   :  { %3530 = vset.pattern.permute.xlu0 %v3677_v0 }
0x1285   :  { %v1185_v30 = vpop.permute.xlu0 %1184 }
0x1289   :  { %v1174_v33 = vpop.permute.xlu0 %1173 }
0x128a   :  { %v1176_v35 = vmul.f32 %v3586_v26, %v1174_v33  ;;  %v231_v33 = vmul.f32 %v3857_v36, %v3918_v22 }
0x12e5   :  { %v1179_v37 = vpop.permute.xlu0 %1178 }
0x12e6   :  { %v1181_v40 = vadd.f32 %v1179_v37, %v1176_v35  ;;  %v245_v35 = vsel %vm83_vm2, %v231_v33, 0.0 }
0x12e8   :  { %v1187_v43 = vmul.f32 %v1185_v30, %v1181_v40 }
0x12ea   :  { %1189 = vrot.lane.b32.xlu1 %v1187_v43, %s3681_s4 }
0x12ee   :  { %1324 = vrot.lane.b32.xlu1 %v4172_v31, %s3683_s26 }
0x12f6   :  { %v4220_v44 = vpop.permute.xlu0 %905 }
0x12f7   :  { %v1154_v61 = vmul.f32 %v1152_v21, %v4220_v44 }
0x12fa   :  { %v1164_v58 = vpop.permute.xlu0 %1163 }
0x12fb   :  { %v1166_v23 = vmul.f32 %v1164_v58, %v4128_v24  ;;  %v1200_v31 = vmul.f32 %v1164_v58, %v4134_v39 }
0x12fd   :  { %v1167_v2 = vadd.f32 %v1166_v23, %v1154_v61 }
0x135c   :  { %v1190_v5 = vpop.permute.xlu1 %1189 }
0x135d   :  { %v4224_v14 = vadd.f32 %v1190_v5, %v1167_v2 }
0x135f   :  { %3587 = vtanh.f32 %v4224_v14 }
0x1360   :  { %v1325_v61 = vpop.permute.xlu1 %1324 }
0x1369   :  { %v3588_v45 = vpop.eup %3587 }
0x136a   :  { %1195 = vrot.lane.b32.xlu0 %v3588_v45, %s3681_s4 }
0x13dc   :  { %v1196_v62 = vpop.permute.xlu0 %1195 }
0x13dd   :  { %v1198_v9 = vmul.f32 %v3586_v26, %v1196_v62  ;;  %v190_v26 = vadd.f32 %v4002_v42, %v3849_v29 }
0x13df   :  { %v1199_v11 = vmul.f32 %v1198_v9, %v4220_v44  ;;  %v1202_v48 = vmul.f32 %v1198_v9, %v1185_v30 }
0x13e1   :  { %v1201_v15 = vadd.f32 %v1200_v31, %v1199_v11 }
0x13e3   :  { %v4230_v24 = vadd.f32 %v1202_v48, %v1201_v15 }
0x13e5   :  { %v1221_v50 = vmul.f32 %v4230_v24, %v4176_v34 }
0x13e7   :  { %1223 = vrot.lane.b32.xlu0 %v1221_v50, %s3683_s26 }
0x1459   :  { %v1224_v25 = vpop.permute.xlu0 %1223 }
0x145a   :  { %v1226_v6 = vsel %vm39_vm1, %v4187_v59, %v1224_v25 }
0x145b   :  { %3146 = vmatmul.mubr.msk.f32.vlgmr.msra.gmra.mrb[6].mxu1 %vm302_vm4, %v1226_v6  ;;  %v1305_v10 = vmul.f32 %v1226_v6, %v3874_v49 }
0x145c   :  { %3421 = vmatpush3.bf16.msra.mxu1 %v3774_v7  ;;  %3183 = vmatprep.mubr.msk.f32.mxu1 %vm3680_vm3, %v3678_v1 }
0x145d   :  { %3422 = vmatprep.subr.bf16.mxu1 %v3679_v3 }
0x1460   :  { %3424 = vmatpush3.bf16.msra.mxu1 %v3789_v13 }
0x1461   :  { %3425 = vmatprep.subr.bf16.mxu1 %v3679_v3 }
0x1464   :  { %3427 = vmatpush3.bf16.msra.mxu1 %v3806_v17 }
0x1465   :  { %3428 = vmatprep.subr.bf16.mxu1 %v3679_v3 }
0x1468   :  { %3430 = vmatpush3.bf16.msra.mxu1 %v3818_v20 }
0x1469   :  { %3443 = vmatprep.subr.bf16.mxu1 %v3679_v3 }
0x152e   :  { %v1298_v21 = vpop.f32.mrb[6].mxu1 }
0x152f   :  { %v1302_v27 = vadd.f32 %v1298_v21, %v190_v26  ;;  %v3147_v16 = vpop.f32.mrb[7].mxu1 }
0x1531   :  { %3589 = vtanh.f32 %v1302_v27  ;;  %v2811_v37 = vmul.f32 -1.442695, %v1302_v27 }
0x1533   :  { %3591 = vpow2.f32 %v2811_v37 }
0x153b   :  { %v3590_v30 = vpop.eup %3589 }
0x153c   :  { %1318 = vrot.lane.b32.xlu0 %v3590_v30, %s3682_s23  ;;  %v1136_v30 = vmul.f32 %v4191_v51, %v4085_v8 }
0x153d   :  { %v3592_v29 = vpop.eup %3591 }
0x153e   :  { %v1313_v42 = vadd.f32 1.0, %v3592_v29  ;;  %v1137_v33 = vsel %vm302_vm4, %v1136_v30, 0.0 }
0x1540   :  { %1334 = vperm.xlu0 %3530, %v1155_v19   ;;  %3593 = vrcp.f32 %v1313_v42  ;;  %v1306_v19 = vsel %vm302_vm4, %v1305_v10, 0.0 }
0x1544   :  { %3531 = vset.pattern.permute.xlu0 %v3685_v46 }
0x154a   :  { %v3594_v40 = vpop.eup %3593 }
0x154b   :  { %v1327_v2 = vmul.f32 %v3594_v40, %v1325_v61 }
0x155f   :  { %246 = vadd.xlane.f32.xlu0 %v245_v35 }
0x15ae   :  { %v1319_v43 = vpop.permute.xlu0 %1318 }
0x15af   :  { %v1321_v58 = vmul.f32 %v3594_v40, %v1319_v43 }
0x15b1   :  { %1329 = vrot.lane.b32.xlu1 %v1321_v58, %s3683_s26  ;;  %v1322_v48 = vmul.f32 %v1321_v58, %v4176_v34 }
0x15bf   :  { %v1335_v23 = vpop.permute.xlu0 %1334 }
0x15d5   :  { %1307 = vadd.xlane.f32.xlu1 %v1306_v19 }
0x15ec   :  { %v247_v36 = vpop.xlane.xlu0 %246 }
0x15ed   :  { %v269_v22 = vadd.f32 %v3881_v53, %v247_v36 }
0x15ef   :  { %278 = vst.msk [vmem:[#allocation3 + $0x18] sm:$0xff] %vm42_vm0, %v269_v22 }
0x15f6   :  { %v1304_v9 = vld [vmem:[#allocation3 + $0x18] sm:$0xff] }
0x1623   :  { %v1330_v5 = vpop.permute.xlu1 %1329 }
0x1624   :  { %v1332_v45 = vadd.f32 %v1330_v5, %v1327_v2 }
0x1626   :  { %v1337_v62 = vmul.f32 %v1335_v23, %v1332_v45 }
0x1628   :  { %1339 = vrot.lane.b32.xlu0 %v1337_v62, %s3681_s4 }
0x1662   :  { %v1308_v31 = vpop.xlane.xlu1 %1307 }
0x1663   :  { %v1309_v11 = vadd.f32 %v1308_v31, %v1304_v9 }
0x1665   :  { %vm1349_vm10 = vcmp.gt.f32.partialorder %v1309_v11, 0.0 }
0x1666   :  { %v4264_v15 = vsel %vm1349_vm10, 1.0, %v3678_v1 }
0x1667   :  { %1354 = vperm.xlu1 %3526, %v4264_v15   ;;  %v1459_v23 = vsub.f32 1.0, %v4264_v15 }
0x169a   :  { %v1340_v50 = vpop.permute.xlu0 %1339 }
0x169b   :  { %v4268_v25 = vadd.f32 %v1340_v50, %v1322_v48 }
0x169d   :  { %3595 = vtanh.f32 %v4268_v25 }
0x16a7   :  { %v3596_v6 = vpop.eup %3595 }
0x16a8   :  { %1345 = vrot.lane.b32.xlu0 %v3596_v6, %s3681_s4 }
0x16e6   :  { %v4272_v26 = vpop.permute.xlu1 %1354 }
0x16e7   :  { %v1357_v21 = vmul.f32 %v4272_v26, %v4230_v24 }
0x16e9   :  { %1363 = vrot.lane.b32.xlu0 %v1357_v21, %s3683_s26 }
0x16ed   :  { %1472 = vrot.lane.b32.xlu0 %v4264_v15, %s3684_s20 }
0x171a   :  { %v1346_v27 = vpop.permute.xlu0 %1345 }
0x171b   :  { %v1348_v16 = vmul.f32 %v3594_v40, %v1346_v27 }
0x171d   :  { %1359 = vrot.lane.b32.xlu1 %v1348_v16, %s3682_s23 }
0x1741   :  { %1138 = vadd.xlane.f32.xlu1 %v1137_v33 }
0x175b   :  { %v1364_v35 = vpop.permute.xlu0 %1363 }
0x175f   :  { %v1473_v22 = vpop.permute.xlu0 %1472 }
0x178f   :  { %v4283_v37 = vpop.permute.xlu1 %1359 }
0x1790   :  { %v4287_v29 = vsel %vm39_vm1, %v4283_v37, %v1364_v35 }
0x1791   :  { %3165 = vmatmul.mubr.msk.f32.vlgmr.msra.gmra.mrb[14].mxu0 %vm302_vm4, %v4287_v29 }
0x1792   :  { %3433 = vmatpush3.bf16.msra.mxu0 %v3934_v28  ;;  %3202 = vmatprep.mubr.msk.f32.mxu0 %vm3680_vm3, %v3678_v1 }
0x1793   :  { %3434 = vmatprep.subr.bf16.mxu0 %v3679_v3 }
0x1796   :  { %3436 = vmatpush3.bf16.msra.mxu0 %v3946_v32 }
0x1797   :  { %3437 = vmatprep.subr.bf16.mxu0 %v3679_v3 }
0x179a   :  { %3439 = vmatpush3.bf16.msra.mxu0 %v3964_v38 }
0x179b   :  { %3440 = vmatprep.subr.bf16.mxu0 %v3679_v3 }
0x179e   :  { %3442 = vmatpush3.bf16.msra.mxu0 %v3977_v41 }
0x179f   :  { %3455 = vmatprep.subr.bf16.mxu0 %v3679_v3 }
0x17ce   :  { %v1139_v43 = vpop.xlane.xlu1 %1138 }
0x17cf   :  { %v1140_v58 = vadd.f32 %v3881_v53, %v1139_v43 }
0x17d1   :  { %vm1204_vm11 = vcmp.gt.f32.partialorder %v1140_v58, 0.0 }
0x17d2   :  { %v2808_v19 = vsel %vm1204_vm11, 1.0, %v3678_v1 }
0x17d3   :  { %v1457_v36 = vsub.f32 1.0, %v2808_v19 }
0x1864   :  { %v1436_v51 = vpop.f32.mrb[14].mxu0 }
0x1865   :  { %v1437_v42 = vadd.f32 %v4017_v57, %v1436_v51  ;;  %v3166_v40 = vpop.f32.mrb[15].mxu0  ;;  %v1475_v57 = vmul.f32 %v1473_v22, %v1457_v36 }
0x1867   :  { %3597 = vtanh.f32 %v1437_v42  ;;  %v2814_v53 = vmul.f32 -1.442695, %v1437_v42 }
0x1869   :  { %3599 = vpow2.f32 %v2814_v53 }
0x1871   :  { %v3598_v10 = vpop.eup %3597 }
0x1872   :  { %1453 = vrot.lane.b32.xlu0 %v3598_v10, %s3682_s23 }
0x1873   :  { %v3600_v61 = vpop.eup %3599 }
0x1874   :  { %v1448_v2 = vadd.f32 1.0, %v3600_v61 }
0x1876   :  { %1461 = vrot.lane.b32.xlu0 %v1459_v23, %s3684_s20  ;;  %3601 = vrcp.f32 %v1448_v2  ;;  %v4347_v2 = vld [vmem:[%s4809_s2] ss:$0 sm:$0xff] }
0x187a   :  { %1488 = vperm.xlu0 %3531, %v1475_v57  }
0x187e   :  { %1477 = vrot.lane.b32.xlu0 %v4224_v14, %s3683_s26 }
0x1880   :  { %v3602_v5 = vpop.eup %3601 }
0x18e4   :  { %v1454_v45 = vpop.permute.xlu0 %1453 }
0x18e5   :  { %v1456_v62 = vmul.f32 %v3602_v5, %v1454_v45 }
0x18e7   :  { %1482 = vrot.lane.b32.xlu0 %v1456_v62, %s3683_s26 }
0x18e8   :  { %v1462_v9 = vpop.permute.xlu0 %1461 }
0x18e9   :  { %v1464_v31 = vmul.f32 %v1462_v9, %v1457_v36 }
0x18eb   :  { %1209 = vperm.xlu0 %3531, %v2808_v19  }
0x18ef   :  { %1467 = vperm.xlu0 %3531, %v1464_v31  }
0x18f3   :  { %3532 = vset.pattern.permute.xlu0 %v3677_v0 }
0x18f9   :  { %v1489_v11 = vpop.permute.xlu0 %1488 }
0x18fd   :  { %v1478_v48 = vpop.permute.xlu0 %1477 }
0x18fe   :  { %v1480_v50 = vmul.f32 %v3602_v5, %v1478_v48 }
0x1959   :  { %v1483_v6 = vpop.permute.xlu0 %1482 }
0x195a   :  { %v1485_v21 = vadd.f32 %v1483_v6, %v1480_v50 }
0x195c   :  { %v1491_v27 = vmul.f32 %v1489_v11, %v1485_v21 }
0x195e   :  { %1493 = vrot.lane.b32.xlu1 %v1491_v27, %s3681_s4 }
0x1962   :  { %1628 = vrot.lane.b32.xlu1 %v4268_v25, %s3683_s26 }
0x196a   :  { %v4316_v16 = vpop.permute.xlu0 %1209 }
0x196b   :  { %v1458_v35 = vmul.f32 %v1456_v62, %v4316_v16 }
0x196e   :  { %v1468_v30 = vpop.permute.xlu0 %1467 }
0x196f   :  { %v1470_v33 = vmul.f32 %v1468_v30, %v4224_v14  ;;  %v1504_v25 = vmul.f32 %v1468_v30, %v4230_v24 }
0x1971   :  { %v1471_v51 = vadd.f32 %v1470_v33, %v1458_v35 }
0x19d0   :  { %v1494_v42 = vpop.permute.xlu1 %1493 }
0x19d1   :  { %v4320_v40 = vadd.f32 %v1494_v42, %v1471_v51 }
0x19d3   :  { %3603 = vtanh.f32 %v4320_v40 }
0x19dd   :  { %v3604_v43 = vpop.eup %3603 }
0x19de   :  { %1499 = vrot.lane.b32.xlu0 %v3604_v43, %s3681_s4  ;;  %v4371_v43 = vld [vmem:[%s4812_s8] ss:$0 sm:$0xff] }
0x1a50   :  { %v1500_v58 = vpop.permute.xlu0 %1499 }
0x1a51   :  { %v1502_v10 = vmul.f32 %v3602_v5, %v1500_v58  ;;  %v195_v5 = vadd.f32 %v4347_v2, %v4008_v54  ;;  %v3671_v54 = vld [vmem:[%s4808_s0 + $0x20] sm:$0xff] }
0x1a53   :  { %v1503_v19 = vmul.f32 %v1502_v10, %v4316_v16  ;;  %v1506_v22 = vmul.f32 %v1502_v10, %v1489_v11  ;;  %v4358_v11 = vld [vmem:[%s4810_s3] ss:$0 sm:$0xff]  ;;  %v1629_v10 = vpop.permute.xlu1 %1628 }
0x1a54   :  { %v232_v48 = vmul.f32 %v3671_v54, %v4358_v11 }
0x1a55   :  { %v1505_v36 = vadd.f32 %v1504_v25, %v1503_v19 }
0x1a56   :  { %v248_v50 = vsel %vm83_vm2, %v232_v48, 0.0 }
0x1a57   :  { %v4326_v14 = vadd.f32 %v1506_v22, %v1505_v36 }
0x1a59   :  { %v1525_v57 = vmul.f32 %v4326_v14, %v4272_v26 }
0x1a5b   :  { %1527 = vrot.lane.b32.xlu0 %v1525_v57, %s3683_s26 }
0x1acd   :  { %v1528_v53 = vpop.permute.xlu0 %1527 }
0x1ace   :  { %v1530_v61 = vsel %vm39_vm1, %v4283_v37, %v1528_v53 }
0x1acf   :  { %3184 = vmatmul.mubr.msk.f32.vlgmr.msra.gmra.mrb[8].mxu1 %vm302_vm4, %v1530_v61  ;;  %v1609_v33 = vmul.f32 %v1530_v61, %v3874_v49 }
0x1ad0   :  { %3445 = vmatpush3.bf16.msra.mxu1 %v3774_v7  ;;  %3221 = vmatprep.mubr.msk.f32.mxu1 %vm3680_vm3, %v3678_v1 }
0x1ad1   :  { %3446 = vmatprep.subr.bf16.mxu1 %v3679_v3  ;;  %v1610_v35 = vsel %vm302_vm4, %v1609_v33, 0.0 }
0x1ad4   :  { %3448 = vmatpush3.bf16.msra.mxu1 %v3789_v13 }
0x1ad5   :  { %3449 = vmatprep.subr.bf16.mxu1 %v3679_v3 }
0x1ad8   :  { %3451 = vmatpush3.bf16.msra.mxu1 %v3806_v17 }
0x1ad9   :  { %3452 = vmatprep.subr.bf16.mxu1 %v3679_v3 }
0x1adc   :  { %3454 = vmatpush3.bf16.msra.mxu1 %v3818_v20 }
0x1add   :  { %3467 = vmatprep.subr.bf16.mxu1 %v3679_v3 }
0x1ba2   :  { %v1602_v45 = vpop.f32.mrb[8].mxu1 }
0x1ba3   :  { %v1606_v62 = vadd.f32 %v1602_v45, %v195_v5  ;;  %v3185_v9 = vpop.f32.mrb[9].mxu1 }
0x1ba5   :  { %3605 = vtanh.f32 %v1606_v62  ;;  %v2818_v6 = vmul.f32 -1.442695, %v1606_v62 }
0x1ba7   :  { %3607 = vpow2.f32 %v2818_v6 }
0x1baf   :  { %v3606_v31 = vpop.eup %3605 }
0x1bb0   :  { %1622 = vrot.lane.b32.xlu0 %v3606_v31, %s3682_s23 }
0x1bb1   :  { %v3608_v15 = vpop.eup %3607 }
0x1bb4   :  { %1638 = vperm.xlu0 %3532, %v1459_v23   ;;  %v1617_v23 = vadd.f32 1.0, %v3608_v15  ;;  %v1440_v15 = vmul.f32 %v4287_v29, %v4085_v8 }
0x1bb6   :  { %3609 = vrcp.f32 %v1617_v23  ;;  %v1441_v23 = vsel %vm302_vm4, %v1440_v15, 0.0 }
0x1bb8   :  { %3533 = vset.pattern.permute.xlu0 %v3685_v46 }
0x1bc0   :  { %v3610_v21 = vpop.eup %3609 }
0x1bc1   :  { %v1631_v25 = vmul.f32 %v3610_v21, %v1629_v10 }
0x1bd3   :  { %249 = vadd.xlane.f32.xlu0 %v248_v50 }
0x1c22   :  { %v1623_v27 = vpop.permute.xlu0 %1622 }
0x1c23   :  { %v1625_v30 = vmul.f32 %v3610_v21, %v1623_v27 }
0x1c25   :  { %1633 = vrot.lane.b32.xlu1 %v1625_v30, %s3683_s26  ;;  %v1626_v45 = vmul.f32 %v1625_v30, %v4272_v26 }
0x1c33   :  { %v1639_v51 = vpop.permute.xlu0 %1638 }
0x1c49   :  { %1611 = vadd.xlane.f32.xlu1 %v1610_v35 }
0x1c60   :  { %v250_v42 = vpop.xlane.xlu0 %249 }
0x1c61   :  { %v270_v58 = vadd.f32 %v4371_v43, %v250_v42 }
0x1c63   :  { %279 = vst.msk [vmem:[#allocation3 + $0x20] sm:$0xff] %vm42_vm0, %v270_v58 }
0x1c6a   :  { %v1608_v57 = vld [vmem:[#allocation3 + $0x20] sm:$0xff] }
0x1c97   :  { %v1634_v19 = vpop.permute.xlu1 %1633 }
0x1c98   :  { %v1636_v36 = vadd.f32 %v1634_v19, %v1631_v25 }
0x1c9a   :  { %v1641_v22 = vmul.f32 %v1639_v51, %v1636_v36 }
0x1c9c   :  { %1643 = vrot.lane.b32.xlu0 %v1641_v22, %s3681_s4 }
0x1cd6   :  { %v1612_v53 = vpop.xlane.xlu1 %1611 }
0x1cd7   :  { %v1613_v61 = vadd.f32 %v1612_v53, %v1608_v57 }
0x1cd9   :  { %vm1653_vm12 = vcmp.gt.f32.partialorder %v1613_v61, 0.0 }
0x1cda   :  { %v4377_v5 = vsel %vm1653_vm12, 1.0, %v3678_v1 }
0x1cdb   :  { %1658 = vperm.xlu1 %3526, %v4377_v5   ;;  %v1763_v19 = vsub.f32 1.0, %v4377_v5 }
0x1d0e   :  { %v1644_v62 = vpop.permute.xlu0 %1643 }
0x1d0f   :  { %v4381_v9 = vadd.f32 %v1644_v62, %v1626_v45 }
0x1d11   :  { %3611 = vtanh.f32 %v4381_v9 }
0x1d1b   :  { %v3612_v31 = vpop.eup %3611 }
0x1d1c   :  { %1649 = vrot.lane.b32.xlu0 %v3612_v31, %s3681_s4 }
0x1d5a   :  { %v4385_v54 = vpop.permute.xlu1 %1658 }
0x1d5b   :  { %v1661_v48 = vmul.f32 %v4385_v54, %v4326_v14 }
0x1d5d   :  { %1667 = vrot.lane.b32.xlu0 %v1661_v48, %s3683_s26 }
0x1d61   :  { %1776 = vrot.lane.b32.xlu0 %v4377_v5, %s3684_s20 }
0x1d8e   :  { %v1650_v50 = vpop.permute.xlu0 %1649 }
0x1d8f   :  { %v1652_v6 = vmul.f32 %v3610_v21, %v1650_v50  ;;  %v4417_v21 = vld [vmem:[%s4814_s6] ss:$0 sm:$0xff] }
0x1d91   :  { %1663 = vrot.lane.b32.xlu1 %v1652_v6, %s3682_s23 }
0x1db5   :  { %1442 = vadd.xlane.f32.xlu1 %v1441_v23 }
0x1dcf   :  { %v1668_v27 = vpop.permute.xlu0 %1667 }
0x1dd3   :  { %v1777_v22 = vpop.permute.xlu0 %1776 }
0x1e03   :  { %v4396_v30 = vpop.permute.xlu1 %1663 }
0x1e04   :  { %v4400_v33 = vsel %vm39_vm1, %v4396_v30, %v1668_v27 }
0x1e05   :  { %3203 = vmatmul.mubr.msk.f32.vlgmr.msra.gmra.mrb[16].mxu0 %vm302_vm4, %v4400_v33 }
0x1e06   :  { %3457 = vmatpush3.bf16.msra.mxu0 %v3934_v28  ;;  %3240 = vmatprep.mubr.msk.f32.mxu0 %vm3680_vm3, %v3678_v1 }
0x1e07   :  { %3458 = vmatprep.subr.bf16.mxu0 %v3679_v3 }
0x1e0a   :  { %3460 = vmatpush3.bf16.msra.mxu0 %v3946_v32 }
0x1e0b   :  { %3461 = vmatprep.subr.bf16.mxu0 %v3679_v3 }
0x1e0e   :  { %3463 = vmatpush3.bf16.msra.mxu0 %v3964_v38 }
0x1e0f   :  { %3464 = vmatprep.subr.bf16.mxu0 %v3679_v3 }
0x1e12   :  { %3466 = vmatpush3.bf16.msra.mxu0 %v3977_v41 }
0x1e13   :  { %3479 = vmatprep.subr.bf16.mxu0 %v3679_v3 }
0x1e42   :  { %v1443_v42 = vpop.xlane.xlu1 %1442 }
0x1e43   :  { %v1444_v58 = vadd.f32 %v4371_v43, %v1443_v42 }
0x1e45   :  { %vm1508_vm13 = vcmp.gt.f32.partialorder %v1444_v58, 0.0 }
0x1e46   :  { %v2815_v25 = vsel %vm1508_vm13, 1.0, %v3678_v1 }
0x1e47   :  { %v1761_v36 = vsub.f32 1.0, %v2815_v25 }
0x1e49   :  { %v1779_v57 = vmul.f32 %v1777_v22, %v1761_v36 }
0x1ed8   :  { %v1740_v29 = vpop.f32.mrb[16].mxu0 }
0x1ed9   :  { %v1741_v35 = vadd.f32 %v4417_v21, %v1740_v29  ;;  %v3204_v51 = vpop.f32.mrb[17].mxu0 }
0x1edb   :  { %3613 = vtanh.f32 %v1741_v35  ;;  %v2821_v53 = vmul.f32 -1.442695, %v1741_v35 }
0x1edd   :  { %3615 = vpow2.f32 %v2821_v53 }
0x1ee5   :  { %v3614_v10 = vpop.eup %3613 }
0x1ee6   :  { %1757 = vrot.lane.b32.xlu0 %v3614_v10, %s3682_s23 }
0x1ee7   :  { %v3616_v61 = vpop.eup %3615 }
0x1ee8   :  { %v1752_v45 = vadd.f32 1.0, %v3616_v61 }
0x1eea   :  { %1765 = vrot.lane.b32.xlu0 %v1763_v19, %s3684_s20  ;;  %3617 = vrcp.f32 %v1752_v45 }
0x1eee   :  { %1792 = vperm.xlu0 %3533, %v1779_v57  }
0x1ef2   :  { %1781 = vrot.lane.b32.xlu0 %v4320_v40, %s3683_s26 }
0x1ef4   :  { %v3618_v62 = vpop.eup %3617 }
0x1f58   :  { %v1758_v31 = vpop.permute.xlu0 %1757 }
0x1f59   :  { %v1760_v48 = vmul.f32 %v3618_v62, %v1758_v31 }
0x1f5b   :  { %1786 = vrot.lane.b32.xlu0 %v1760_v48, %s3683_s26 }
0x1f5c   :  { %v1766_v50 = vpop.permute.xlu0 %1765 }
0x1f5d   :  { %v1768_v6 = vmul.f32 %v1766_v50, %v1761_v36 }
0x1f5f   :  { %1513 = vperm.xlu0 %3533, %v2815_v25  }
0x1f63   :  { %1771 = vperm.xlu0 %3533, %v1768_v6  }
0x1f67   :  { %3534 = vset.pattern.permute.xlu0 %v3677_v0 }
0x1f6d   :  { %v1793_v15 = vpop.permute.xlu0 %1792 }
0x1f71   :  { %v1782_v23 = vpop.permute.xlu0 %1781 }
0x1f72   :  { %v1784_v27 = vmul.f32 %v3618_v62, %v1782_v23 }
0x1fcd   :  { %v1787_v29 = vpop.permute.xlu0 %1786 }
0x1fce   :  { %v1789_v35 = vadd.f32 %v1787_v29, %v1784_v27 }
0x1fd0   :  { %v1795_v51 = vmul.f32 %v1793_v15, %v1789_v35 }
0x1fd2   :  { %1797 = vrot.lane.b32.xlu1 %v1795_v51, %s3681_s4 }
0x1fd6   :  { %1932 = vrot.lane.b32.xlu1 %v4381_v9, %s3683_s26 }
0x1fde   :  { %v4434_v42 = vpop.permute.xlu0 %1513 }
0x1fdf   :  { %v1762_v25 = vmul.f32 %v1760_v48, %v4434_v42 }
0x1fe2   :  { %v1772_v58 = vpop.permute.xlu0 %1771 }
0x1fe3   :  { %v1774_v10 = vmul.f32 %v1772_v58, %v4320_v40  ;;  %v1808_v9 = vmul.f32 %v1772_v58, %v4326_v14  ;;  %v3674_v58 = vld [vmem:[%s4808_s0 + $0x28] sm:$0xff] }
0x1fe5   :  { %v1775_v36 = vadd.f32 %v1774_v10, %v1762_v25  ;;  %v233_v10 = vmul.f32 %v3674_v58, %v4358_v11 }
0x1fe7   :  { %v251_v25 = vsel %vm83_vm2, %v233_v10, 0.0 }
0x1ffa   :  { %252 = vadd.xlane.f32.xlu1 %v251_v25 }
0x2044   :  { %v1798_v22 = vpop.permute.xlu1 %1797 }
0x2045   :  { %v4438_v57 = vadd.f32 %v1798_v22, %v1775_v36 }
0x2047   :  { %3619 = vtanh.f32 %v4438_v57 }
0x2051   :  { %v3620_v53 = vpop.eup %3619 }
0x2052   :  { %1803 = vrot.lane.b32.xlu0 %v3620_v53, %s3681_s4 }
0x20c4   :  { %v1804_v61 = vpop.permute.xlu0 %1803 }
0x20c5   :  { %v1806_v45 = vmul.f32 %v3618_v62, %v1804_v61  ;;  %v200_v62 = vadd.f32 %v4347_v2, %v4006_v52 }
0x20c7   :  { %v1807_v31 = vmul.f32 %v1806_v45, %v4434_v42  ;;  %v1810_v6 = vmul.f32 %v1806_v45, %v1793_v15 }
0x20c9   :  { %v1809_v50 = vadd.f32 %v1808_v9, %v1807_v31  ;;  %v1933_v9 = vpop.permute.xlu1 %1932 }
0x20cb   :  { %v4444_v40 = vadd.f32 %v1810_v6, %v1809_v50 }
0x20cd   :  { %v1829_v48 = vmul.f32 %v4444_v40, %v4385_v54 }
0x20cf   :  { %1831 = vrot.lane.b32.xlu0 %v1829_v48, %s3683_s26 }
0x2141   :  { %v1832_v23 = vpop.permute.xlu0 %1831 }
0x2142   :  { %v1834_v27 = vsel %vm39_vm1, %v4396_v30, %v1832_v23 }
0x2143   :  { %3222 = vmatmul.mubr.msk.f32.vlgmr.msra.gmra.mrb[10].mxu1 %vm302_vm4, %v1834_v27  ;;  %v1913_v31 = vmul.f32 %v1834_v27, %v3874_v49 }
0x2144   :  { %3469 = vmatpush3.bf16.msra.mxu1 %v3774_v7  ;;  %3259 = vmatprep.mubr.msk.f32.mxu1 %vm3680_vm3, %v3678_v1 }
0x2145   :  { %3470 = vmatprep.subr.bf16.mxu1 %v3679_v3  ;;  %v1914_v5 = vsel %vm302_vm4, %v1913_v31, 0.0 }
0x2148   :  { %3472 = vmatpush3.bf16.msra.mxu1 %v3789_v13 }
0x2149   :  { %3473 = vmatprep.subr.bf16.mxu1 %v3679_v3 }
0x214c   :  { %3475 = vmatpush3.bf16.msra.mxu1 %v3806_v17 }
0x214d   :  { %3476 = vmatprep.subr.bf16.mxu1 %v3679_v3 }
0x2150   :  { %3478 = vmatpush3.bf16.msra.mxu1 %v3818_v20 }
0x2151   :  { %3491 = vmatprep.subr.bf16.mxu1 %v3679_v3 }
0x2216   :  { %v1906_v15 = vpop.f32.mrb[10].mxu1 }
0x2217   :  { %v1910_v29 = vadd.f32 %v1906_v15, %v200_v62  ;;  %v3223_v35 = vpop.f32.mrb[11].mxu1 }
0x2219   :  { %3621 = vtanh.f32 %v1910_v29  ;;  %v2825_v52 = vmul.f32 -1.442695, %v1910_v29 }
0x221b   :  { %3623 = vpow2.f32 %v2825_v52 }
0x2223   :  { %v3622_v51 = vpop.eup %3621 }
0x2224   :  { %1926 = vrot.lane.b32.xlu0 %v3622_v51, %s3682_s23 }
0x2225   :  { %v3624_v36 = vpop.eup %3623 }
0x2226   :  { %v1921_v22 = vadd.f32 1.0, %v3624_v36 }
0x2228   :  { %1942 = vperm.xlu0 %3534, %v1763_v19   ;;  %3625 = vrcp.f32 %v1921_v22  ;;  %v253_v19 = vpop.xlane.xlu1 %252 }
0x2229   :  { %v271_v50 = vadd.f32 %v4371_v43, %v253_v19 }
0x222b   :  { %280 = vst.msk [vmem:[#allocation3 + $0x28] sm:$0xff] %vm42_vm0, %v271_v50 }
0x222c   :  { %3537 = vset.pattern.permute.xlu0 %v3685_v46 }
0x2232   :  { %v3626_v53 = vpop.eup %3625  ;;  %v1912_v29 = vld [vmem:[#allocation3 + $0x28] sm:$0xff] }
0x2233   :  { %v1935_v48 = vmul.f32 %v3626_v53, %v1933_v9  ;;  %v1744_v9 = vmul.f32 %v4400_v33, %v4085_v8 }
0x2235   :  { %v1745_v31 = vsel %vm302_vm4, %v1744_v9, 0.0 }
0x2296   :  { %v1927_v61 = vpop.permute.xlu0 %1926 }
0x2297   :  { %v1929_v45 = vmul.f32 %v3626_v53, %v1927_v61 }
0x2299   :  { %1937 = vrot.lane.b32.xlu0 %v1929_v45, %s3683_s26  ;;  %v1930_v58 = vmul.f32 %v1929_v45, %v4385_v54 }
0x22a7   :  { %v1943_v6 = vpop.permute.xlu0 %1942 }
0x22b8   :  { %1915 = vadd.xlane.f32.xlu0 %v1914_v5 }
0x230b   :  { %v1938_v23 = vpop.permute.xlu0 %1937 }
0x230c   :  { %v1940_v62 = vadd.f32 %v1938_v23, %v1935_v48 }
0x230e   :  { %v1945_v15 = vmul.f32 %v1943_v6, %v1940_v62 }
0x2310   :  { %1947 = vrot.lane.b32.xlu0 %v1945_v15, %s3681_s4 }
0x2345   :  { %v1916_v35 = vpop.xlane.xlu0 %1915 }
0x2346   :  { %v1917_v51 = vadd.f32 %v1916_v35, %v1912_v29 }
0x2348   :  { %vm1957_vm14 = vcmp.gt.f32.partialorder %v1917_v51, 0.0 }
0x2349   :  { %v4480_v27 = vsel %vm1957_vm14, 1.0, %v3678_v1 }
0x234a   :  { %1962 = vperm.xlu1 %3526, %v4480_v27   ;;  %v2067_v35 = vsub.f32 1.0, %v4480_v27 }
0x234e   :  { %3535 = vset.pattern.permute.xlu1 %v3685_v46 }
0x2382   :  { %v1948_v10 = vpop.permute.xlu0 %1947 }
0x2383   :  { %v4485_v25 = vadd.f32 %v1948_v10, %v1930_v58 }
0x2385   :  { %3627 = vtanh.f32 %v4485_v25 }
0x238f   :  { %v3628_v52 = vpop.eup %3627 }
0x2390   :  { %1953 = vrot.lane.b32.xlu1 %v3628_v52, %s3681_s4 }
0x23c9   :  { %v4489_v36 = vpop.permute.xlu1 %1962 }
0x23ca   :  { %v1965_v22 = vmul.f32 %v4489_v36, %v4444_v40 }
0x23cc   :  { %1971 = vrot.lane.b32.xlu1 %v1965_v22, %s3683_s26 }
0x23d0   :  { %2080 = vrot.lane.b32.xlu1 %v4480_v27, %s3684_s20 }
0x2402   :  { %v1954_v61 = vpop.permute.xlu1 %1953 }
0x2403   :  { %v1956_v45 = vmul.f32 %v3626_v53, %v1954_v61 }
0x2405   :  { %1967 = vrot.lane.b32.xlu0 %v1956_v45, %s3682_s23 }
0x2424   :  { %1746 = vadd.xlane.f32.xlu0 %v1745_v31 }
0x243e   :  { %v1972_v5 = vpop.permute.xlu1 %1971 }
0x2442   :  { %v2081_v51 = vpop.permute.xlu1 %2080 }
0x2477   :  { %v4500_v19 = vpop.permute.xlu0 %1967 }
0x2478   :  { %v4504_v50 = vsel %vm39_vm1, %v4500_v19, %v1972_v5 }
0x2479   :  { %3241 = vmatmul.mubr.msk.f32.vlgmr.msra.gmra.mrb[18].mxu0 %vm302_vm4, %v4504_v50 }
0x247a   :  { %3481 = vmatpush3.bf16.msra.mxu0 %v3934_v28  ;;  %3278 = vmatprep.mubr.msk.f32.mxu0 %vm3680_vm3, %v3678_v1 }
0x247b   :  { %3482 = vmatprep.subr.bf16.mxu0 %v3679_v3 }
0x247e   :  { %3484 = vmatpush3.bf16.msra.mxu0 %v3946_v32 }
0x247f   :  { %3485 = vmatprep.subr.bf16.mxu0 %v3679_v3 }
0x2482   :  { %3487 = vmatpush3.bf16.msra.mxu0 %v3964_v38 }
0x2483   :  { %3488 = vmatprep.subr.bf16.mxu0 %v3679_v3 }
0x2486   :  { %3490 = vmatpush3.bf16.msra.mxu0 %v3977_v41 }
0x2487   :  { %3503 = vmatprep.subr.bf16.mxu0 %v3679_v3 }
0x24b1   :  { %v1747_v48 = vpop.xlane.xlu0 %1746 }
0x24b2   :  { %v1748_v23 = vadd.f32 %v4371_v43, %v1747_v48 }
0x24b4   :  { %vm1812_vm15 = vcmp.gt.f32.partialorder %v1748_v23, 0.0 }
0x24b5   :  { %v2822_v15 = vsel %vm1812_vm15, 1.0, %v3678_v1 }
0x24b6   :  { %v2065_v29 = vsub.f32 1.0, %v2822_v15 }
0x24b8   :  { %v2083_v58 = vmul.f32 %v2081_v51, %v2065_v29 }
0x254c   :  { %v2044_v33 = vpop.f32.mrb[18].mxu0 }
0x254d   :  { %v2045_v53 = vadd.f32 %v4417_v21, %v2044_v33  ;;  %v3242_v6 = vpop.f32.mrb[19].mxu0 }
0x254f   :  { %3629 = vtanh.f32 %v2045_v53  ;;  %v2828_v10 = vmul.f32 -1.442695, %v2045_v53 }
0x2551   :  { %3631 = vpow2.f32 %v2828_v10 }
0x2559   :  { %v3630_v62 = vpop.eup %3629 }
0x255a   :  { %2061 = vrot.lane.b32.xlu1 %v3630_v62, %s3682_s23 }
0x255b   :  { %v3632_v52 = vpop.eup %3631 }
0x255c   :  { %v2056_v22 = vadd.f32 1.0, %v3632_v52 }
0x255e   :  { %2069 = vrot.lane.b32.xlu1 %v2067_v35, %s3684_s20  ;;  %3633 = vrcp.f32 %v2056_v22 }
0x2562   :  { %2096 = vperm.xlu1 %3535, %v2083_v58  }
0x2566   :  { %2085 = vrot.lane.b32.xlu1 %v4438_v57, %s3683_s26 }
0x2568   :  { %v3634_v61 = vpop.eup %3633 }
0x25cc   :  { %v2062_v45 = vpop.permute.xlu1 %2061 }
0x25cd   :  { %v2064_v9 = vmul.f32 %v3634_v61, %v2062_v45 }
0x25cf   :  { %2090 = vrot.lane.b32.xlu1 %v2064_v9, %s3683_s26 }
0x25d0   :  { %v2070_v31 = vpop.permute.xlu1 %2069 }
0x25d1   :  { %v2072_v5 = vmul.f32 %v2070_v31, %v2065_v29 }
0x25d3   :  { %1817 = vperm.xlu1 %3535, %v2822_v15  }
0x25d7   :  { %2075 = vperm.xlu1 %3535, %v2072_v5  }
0x25db   :  { %3536 = vset.pattern.permute.xlu1 %v3677_v0 }
0x25e1   :  { %v2097_v33 = vpop.permute.xlu1 %2096 }
0x25e5   :  { %v2086_v6 = vpop.permute.xlu1 %2085 }
0x25e6   :  { %v2088_v48 = vmul.f32 %v3634_v61, %v2086_v6 }
0x2641   :  { %v2091_v23 = vpop.permute.xlu1 %2090 }
0x2642   :  { %v2093_v53 = vadd.f32 %v2091_v23, %v2088_v48 }
0x2644   :  { %v2099_v62 = vmul.f32 %v2097_v33, %v2093_v53 }
0x2646   :  { %2101 = vrot.lane.b32.xlu0 %v2099_v62, %s3681_s4 }
0x2652   :  { %v4531_v51 = vpop.permute.xlu1 %1817 }
0x2653   :  { %v2066_v52 = vmul.f32 %v2064_v9, %v4531_v51 }
0x2656   :  { %v2076_v58 = vpop.permute.xlu1 %2075 }
0x2657   :  { %v2078_v10 = vmul.f32 %v2076_v58, %v4438_v57  ;;  %v2112_v6 = vmul.f32 %v2076_v58, %v4444_v40 }
0x2659   :  { %v2079_v15 = vadd.f32 %v2078_v10, %v2066_v52 }
0x26b8   :  { %v2102_v29 = vpop.permute.xlu0 %2101 }
0x26b9   :  { %v4535_v22 = vadd.f32 %v2102_v29, %v2079_v15 }
0x26bb   :  { %3635 = vtanh.f32 %v4535_v22 }
0x26c5   :  { %v3636_v45 = vpop.eup %3635 }
0x26c6   :  { %2107 = vrot.lane.b32.xlu1 %v3636_v45, %s3681_s4 }
0x2738   :  { %v2108_v31 = vpop.permute.xlu1 %2107 }
0x2739   :  { %v2110_v5 = vmul.f32 %v3634_v61, %v2108_v31  ;;  %v205_v61 = vadd.f32 %v4347_v2, %v4012_v56 }
0x273b   :  { %v2111_v48 = vmul.f32 %v2110_v5, %v4531_v51  ;;  %v2114_v53 = vmul.f32 %v2110_v5, %v2097_v33 }
0x273d   :  { %v2113_v23 = vadd.f32 %v2112_v6, %v2111_v48 }
0x273f   :  { %v4541_v57 = vadd.f32 %v2114_v53, %v2113_v23 }
0x2741   :  { %v2133_v9 = vmul.f32 %v4541_v57, %v4489_v36 }
0x2743   :  { %2135 = vrot.lane.b32.xlu1 %v2133_v9, %s3683_s26 }
0x27b5   :  { %v2136_v62 = vpop.permute.xlu1 %2135 }
0x27b6   :  { %v2138_v10 = vsel %vm39_vm1, %v4500_v19, %v2136_v62 }
0x27b7   :  { %3260 = vmatmul.mubr.msk.f32.vlgmr.msra.gmra.mrb[12].mxu1 %vm302_vm4, %v2138_v10 }
0x27b8   :  { %3493 = vmatpush3.bf16.msra.mxu1 %v3774_v7  ;;  %3297 = vmatprep.mubr.msk.f32.mxu1 %vm3680_vm3, %v3678_v1 }
0x27b9   :  { %3494 = vmatprep.subr.bf16.mxu1 %v3679_v3 }
0x27bc   :  { %3496 = vmatpush3.bf16.msra.mxu1 %v3789_v13  ;;  %v3675_v13 = vld [vmem:[%s4808_s0 + $0x30] sm:$0xff] }
0x27bd   :  { %3497 = vmatprep.subr.bf16.mxu1 %v3679_v3 }
0x27c0   :  { %3499 = vmatpush3.bf16.msra.mxu1 %v3806_v17  ;;  %v234_v17 = vmul.f32 %v3675_v13, %v4358_v11 }
0x27c1   :  { %3500 = vmatprep.subr.bf16.mxu1 %v3679_v3 }
0x27c4   :  { %3502 = vmatpush3.bf16.msra.mxu1 %v3818_v20  ;;  %v254_v20 = vsel %vm83_vm2, %v234_v17, 0.0 }
0x27c5   :  { %255 = vadd.xlane.f32.xlu0 %v254_v20 }
0x2852   :  { %v256_v5 = vpop.xlane.xlu0 %255 }
0x2853   :  { %v272_v6 = vadd.f32 %v4371_v43, %v256_v5 }
0x2855   :  { %281 = vst.msk [vmem:[#allocation3 + $0x30] sm:$0xff] %vm42_vm0, %v272_v6 }
0x288a   :  { %v2210_v33 = vpop.f32.mrb[12].mxu1 }
0x288b   :  { %v2214_v7 = vadd.f32 %v2210_v33, %v205_v61  ;;  %v3261_v58 = vpop.f32.mrb[13].mxu1  ;;  %v2216_v33 = vld [vmem:[#allocation3 + $0x30] sm:$0xff] }
0x288d   :  { %3637 = vtanh.f32 %v2214_v7  ;;  %v2832_v56 = vmul.f32 -1.442695, %v2214_v7 }
0x288f   :  { %3639 = vpow2.f32 %v2832_v56 }
0x2897   :  { %v3638_v52 = vpop.eup %3637 }
0x2898   :  { %2230 = vrot.lane.b32.xlu1 %v3638_v52, %s3682_s23 }
0x2899   :  { %v3640_v15 = vpop.eup %3639 }
0x289a   :  { %v2225_v29 = vadd.f32 1.0, %v3640_v15 }
0x289c   :  { %2246 = vperm.xlu1 %3536, %v2067_v35   ;;  %3641 = vrcp.f32 %v2225_v29 }
0x28a0   :  { %2236 = vrot.lane.b32.xlu1 %v4485_v25, %s3683_s26  ;;  %v2217_v25 = vmul.f32 %v2138_v10, %v3874_v49 }
0x28a2   :  { %v2218_v31 = vsel %vm302_vm4, %v2217_v25, 0.0 }
0x28a6   :  { %v3642_v45 = vpop.eup %3641 }
0x290a   :  { %v2231_v27 = vpop.permute.xlu1 %2230 }
0x290b   :  { %v2233_v35 = vmul.f32 %v3642_v45, %v2231_v27 }
0x290d   :  { %2241 = vrot.lane.b32.xlu1 %v2233_v35, %s3683_s26  ;;  %v2234_v52 = vmul.f32 %v2233_v35, %v4489_v36  ;;  %v2048_v35 = vmul.f32 %v4504_v50, %v4085_v8 }
0x290f   :  { %v2049_v25 = vsel %vm302_vm4, %v2048_v35, 0.0 }
0x291b   :  { %v2247_v48 = vpop.permute.xlu1 %2246 }
0x291f   :  { %v2237_v23 = vpop.permute.xlu1 %2236 }
0x2920   :  { %v2239_v53 = vmul.f32 %v3642_v45, %v2237_v23 }
0x2931   :  { %2219 = vadd.xlane.f32.xlu1 %v2218_v31 }
0x297f   :  { %v2242_v9 = vpop.permute.xlu1 %2241 }
0x2980   :  { %v2244_v62 = vadd.f32 %v2242_v9, %v2239_v53 }
0x2982   :  { %v2249_v61 = vmul.f32 %v2247_v48, %v2244_v62 }
0x2984   :  { %2251 = vrot.lane.b32.xlu0 %v2249_v61, %s3681_s4 }
0x29be   :  { %v2220_v7 = vpop.xlane.xlu1 %2219 }
0x29bf   :  { %v2221_v58 = vadd.f32 %v2220_v7, %v2216_v33 }
0x29c1   :  { %vm2261_vm5 = vcmp.gt.f32.partialorder %v2221_v58, 0.0 }
0x29c2   :  { %v4577_v10 = vsel %vm2261_vm5, 1.0, %v3678_v1 }
0x29c3   :  { %2266 = vperm.xlu1 %3536, %v4577_v10  }
0x29f6   :  { %v2252_v13 = vpop.permute.xlu0 %2251 }
0x29f7   :  { %v4581_v17 = vadd.f32 %v2252_v13, %v2234_v52 }
0x29f9   :  { %3643 = vtanh.f32 %v4581_v17 }
0x2a03   :  { %v3644_v20 = vpop.eup %3643 }
0x2a04   :  { %2257 = vrot.lane.b32.xlu0 %v3644_v20, %s3681_s4 }
0x2a42   :  { %v4585_v56 = vpop.permute.xlu1 %2266 }
0x2a43   :  { %v2269_v15 = vmul.f32 %v4585_v56, %v4541_v57 }
0x2a45   :  { %2275 = vrot.lane.b32.xlu0 %v2269_v15, %s3683_s26 }
0x2a49   :  { %2384 = vrot.lane.b32.xlu0 %v4577_v10, %s3684_s20 }
0x2a76   :  { %v2258_v29 = vpop.permute.xlu0 %2257 }
0x2a77   :  { %v2260_v27 = vmul.f32 %v3642_v45, %v2258_v29 }
0x2a79   :  { %2271 = vrot.lane.b32.xlu1 %v2260_v27, %s3682_s23 }
0x2a9d   :  { %2050 = vadd.xlane.f32.xlu1 %v2049_v25 }
0x2ab7   :  { %v2276_v31 = vpop.permute.xlu0 %2275 }
0x2aeb   :  { %v4596_v5 = vpop.permute.xlu1 %2271 }
0x2aec   :  { %v4600_v6 = vsel %vm39_vm1, %v4596_v5, %v2276_v31 }
0x2aed   :  { %3279 = vmatmul.mubr.msk.f32.vlgmr.msra.gmra.mrb[20].mxu0 %vm302_vm4, %v4600_v6 }
0x2aee   :  { %3505 = vmatpush3.bf16.msra.mxu0 %v3934_v28  ;;  %3316 = vmatprep.mubr.msk.f32.mxu0 %vm3680_vm3, %v3678_v1 }
0x2aef   :  { %3506 = vmatprep.subr.bf16.mxu0 %v3679_v3 }
0x2af2   :  { %3508 = vmatpush3.bf16.msra.mxu0 %v3946_v32 }
0x2af3   :  { %3509 = vmatprep.subr.bf16.mxu0 %v3679_v3 }
0x2af6   :  { %3511 = vmatpush3.bf16.msra.mxu0 %v3964_v38  ;;  %v2371_v38 = vsub.f32 1.0, %v4577_v10 }
0x2af7   :  { %3512 = vmatprep.subr.bf16.mxu0 %v3679_v3  ;;  %v2385_v3 = vpop.permute.xlu0 %2384 }
0x2afa   :  { %3514 = vmatpush3.bf16.msra.mxu0 %v3977_v41 }
0x2b2a   :  { %v2051_v28 = vpop.xlane.xlu1 %2050 }
0x2b2b   :  { %v2052_v23 = vadd.f32 %v4371_v43, %v2051_v28 }
0x2b2d   :  { %vm2116_vm3 = vcmp.gt.f32.partialorder %v2052_v23, 0.0 }
0x2b2e   :  { %v2829_v32 = vsel %vm2116_vm3, 1.0, %v3678_v1 }
0x2b2f   :  { %v2369_v9 = vsub.f32 1.0, %v2829_v32 }
0x2b31   :  { %v2387_v41 = vmul.f32 %v2385_v3, %v2369_v9 }
0x2bc0   :  { %v2348_v50 = vpop.f32.mrb[20].mxu0 }
0x2bc1   :  { %v2349_v45 = vadd.f32 %v4417_v21, %v2348_v50  ;;  %v3280_v48 = vpop.f32.mrb[21].mxu0 }
0x2bc3   :  { %3645 = vtanh.f32 %v2349_v45  ;;  %v2835_v62 = vmul.f32 -1.442695, %v2349_v45 }
0x2bc5   :  { %3647 = vpow2.f32 %v2835_v62 }
0x2bcd   :  { %v3646_v53 = vpop.eup %3645 }
0x2bce   :  { %2365 = vrot.lane.b32.xlu0 %v3646_v53, %s3682_s23 }
0x2bcf   :  { %v3648_v61 = vpop.eup %3647 }
0x2bd0   :  { %v2360_v33 = vadd.f32 1.0, %v3648_v61 }
0x2bd2   :  { %2373 = vrot.lane.b32.xlu0 %v2371_v38, %s3684_s20  ;;  %3649 = vrcp.f32 %v2360_v33 }
0x2bd6   :  { %2400 = vperm.xlu0 %3537, %v2387_v41  }
0x2bda   :  { %2389 = vrot.lane.b32.xlu0 %v4535_v22, %s3683_s26 }
0x2bdc   :  { %v3650_v7 = vpop.eup %3649 }
0x2c40   :  { %v2366_v58 = vpop.permute.xlu0 %2365 }
0x2c41   :  { %v2368_v52 = vmul.f32 %v3650_v7, %v2366_v58 }
0x2c43   :  { %2394 = vrot.lane.b32.xlu0 %v2368_v52, %s3683_s26 }
0x2c44   :  { %v2374_v10 = vpop.permute.xlu0 %2373 }
0x2c45   :  { %v2376_v13 = vmul.f32 %v2374_v10, %v2369_v9 }
0x2c47   :  { %2121 = vperm.xlu0 %3537, %v2829_v32  }
0x2c4b   :  { %2379 = vperm.xlu0 %3537, %v2376_v13  }
0x2c4f   :  { %3538 = vset.pattern.permute.xlu0 %v3677_v0 }
0x2c55   :  { %v2401_v20 = vpop.permute.xlu0 %2400 }
0x2c59   :  { %v2390_v15 = vpop.permute.xlu0 %2389 }
0x2c5a   :  { %v2392_v29 = vmul.f32 %v3650_v7, %v2390_v15  ;;  %v3676_v15 = vld [vmem:[%s4808_s0 + $0x38] sm:$0xff] }
0x2cb5   :  { %v2395_v27 = vpop.permute.xlu0 %2394 }
0x2cb6   :  { %v2397_v35 = vadd.f32 %v2395_v27, %v2392_v29  ;;  %v235_v29 = vmul.f32 %v3676_v15, %v4358_v11  ;;  %v2352_v15 = vmul.f32 %v4600_v6, %v4085_v8 }
0x2cb8   :  { %v2403_v25 = vmul.f32 %v2401_v20, %v2397_v35  ;;  %v257_v27 = vsel %vm83_vm2, %v235_v29, 0.0  ;;  %v2353_v29 = vsel %vm302_vm4, %v2352_v15, 0.0 }
0x2cba   :  { %2405 = vrot.lane.b32.xlu1 %v2403_v25, %s3681_s4 }
0x2cbe   :  { %2540 = vrot.lane.b32.xlu1 %v4581_v17, %s3683_s26 }
0x2cc6   :  { %v4626_v31 = vpop.permute.xlu0 %2121 }
0x2cc7   :  { %v2370_v48 = vmul.f32 %v2368_v52, %v4626_v31 }
0x2cca   :  { %v2380_v50 = vpop.permute.xlu0 %2379 }
0x2ccb   :  { %v2382_v45 = vmul.f32 %v2380_v50, %v4535_v22  ;;  %v2416_v17 = vmul.f32 %v2380_v50, %v4541_v57 }
0x2ccd   :  { %v2383_v28 = vadd.f32 %v2382_v45, %v2370_v48 }
0x2ce2   :  { %258 = vadd.xlane.f32.xlu1 %v257_v27 }
0x2d2c   :  { %v2406_v0 = vpop.permute.xlu1 %2405 }
0x2d2d   :  { %v4630_v23 = vadd.f32 %v2406_v0, %v2383_v28 }
0x2d2f   :  { %3651 = vtanh.f32 %v4630_v23 }
0x2d30   :  { %v2541_v48 = vpop.permute.xlu1 %2540 }
0x2d39   :  { %v3652_v53 = vpop.eup %3651 }
0x2d3a   :  { %2411 = vrot.lane.b32.xlu0 %v3652_v53, %s3681_s4 }
0x2dac   :  { %v2412_v32 = vpop.permute.xlu0 %2411 }
0x2dad   :  { %v2414_v9 = vmul.f32 %v3650_v7, %v2412_v32  ;;  %v210_v7 = vadd.f32 %v4347_v2, %v4010_v55 }
0x2daf   :  { %v2415_v3 = vmul.f32 %v2414_v9, %v4626_v31  ;;  %v2418_v62 = vmul.f32 %v2414_v9, %v2401_v20 }
0x2db1   :  { %v2417_v41 = vadd.f32 %v2416_v17, %v2415_v3 }
0x2db3   :  { %v4636_v22 = vadd.f32 %v2418_v62, %v2417_v41 }
0x2db5   :  { %v2437_v61 = vmul.f32 %v4636_v22, %v4585_v56 }
0x2db7   :  { %2439 = vrot.lane.b32.xlu0 %v2437_v61, %s3683_s26 }
0x2e29   :  { %v2440_v33 = vpop.permute.xlu0 %2439 }
0x2e2a   :  { %v2442_v58 = vsel %vm39_vm1, %v4596_v5, %v2440_v33 }
0x2e2b   :  { %3298 = vmatmul.mubr.msk.f32.vlgmr.msra.gmra.mrb[14].mxu1 %vm302_vm4, %v2442_v58  ;;  %v2521_v28 = vmul.f32 %v2442_v58, %v3874_v49 }
0x2e2d   :  { %v2522_v11 = vsel %vm302_vm4, %v2521_v28, 0.0 }
0x2efe   :  { %v2514_v52 = vpop.f32.mrb[14].mxu1 }
0x2eff   :  { %v2518_v10 = vadd.f32 %v2514_v52, %v210_v7  ;;  %v3299_v13 = vpop.f32.mrb[15].mxu1 }
0x2f01   :  { %3653 = vtanh.f32 %v2518_v10  ;;  %v2839_v55 = vmul.f32 -1.442695, %v2518_v10 }
0x2f03   :  { %3655 = vpow2.f32 %v2839_v55 }
0x2f0b   :  { %v3654_v20 = vpop.eup %3653 }
0x2f0c   :  { %2534 = vrot.lane.b32.xlu0 %v3654_v20, %s3682_s23 }
0x2f0d   :  { %v3656_v2 = vpop.eup %3655 }
0x2f0e   :  { %v2529_v35 = vadd.f32 1.0, %v3656_v2 }
0x2f10   :  { %2550 = vperm.xlu0 %3538, %v2371_v38   ;;  %3657 = vrcp.f32 %v2529_v35  ;;  %v259_v38 = vpop.xlane.xlu1 %258 }
0x2f11   :  { %v273_v0 = vadd.f32 %v4371_v43, %v259_v38 }
0x2f13   :  { %282 = vst.msk [vmem:[#allocation3 + $0x38] sm:$0xff] %vm42_vm0, %v273_v0 }
0x2f14   :  { %3540 = vset.pattern.permute.xlu0 %v3685_v46 }
0x2f1a   :  { %v3658_v25 = vpop.eup %3657  ;;  %v2520_v41 = vld [vmem:[#allocation3 + $0x38] sm:$0xff] }
0x2f1b   :  { %v2543_v32 = vmul.f32 %v3658_v25, %v2541_v48 }
0x2f7e   :  { %v2535_v50 = vpop.permute.xlu0 %2534 }
0x2f7f   :  { %v2537_v45 = vmul.f32 %v3658_v25, %v2535_v50 }
0x2f81   :  { %2545 = vrot.lane.b32.xlu0 %v2537_v45, %s3683_s26  ;;  %v2538_v33 = vmul.f32 %v2537_v45, %v4585_v56 }
0x2f8f   :  { %v2551_v53 = vpop.permute.xlu0 %2550 }
0x2fa0   :  { %2523 = vadd.xlane.f32.xlu0 %v2522_v11 }
0x2ff3   :  { %v2546_v9 = vpop.permute.xlu0 %2545 }
0x2ff4   :  { %v2548_v17 = vadd.f32 %v2546_v9, %v2543_v32 }
0x2ff6   :  { %v2553_v3 = vmul.f32 %v2551_v53, %v2548_v17 }
0x2ff8   :  { %2555 = vrot.lane.b32.xlu0 %v2553_v3, %s3681_s4 }
0x302d   :  { %v2524_v62 = vpop.xlane.xlu0 %2523 }
0x302e   :  { %v2525_v61 = vadd.f32 %v2524_v62, %v2520_v41 }
0x3030   :  { %vm2565_vm2 = vcmp.gt.f32.partialorder %v2525_v61, 0.0 }
0x3031   :  { %v2840_v49 = vsel %vm2565_vm2, 1.0, %v3678_v1 }
0x3032   :  { %2747 = vst.msk [vmem:[#allocation6] sm:$0xff] %vm42_vm0, %v2840_v49  ;;  %2570 = vperm.xlu1 %3536, %v2840_v49   ;;  %v2675_v11 = vsub.f32 1.0, %v2840_v49 }
0x3036   :  { %3539 = vset.pattern.permute.xlu1 %v3685_v46 }
0x306a   :  { %v2556_v58 = vpop.permute.xlu0 %2555 }
0x306b   :  { %v4663_v7 = vadd.f32 %v2556_v58, %v2538_v33 }
0x306d   :  { %3659 = vtanh.f32 %v4663_v7 }
0x3077   :  { %v3660_v52 = vpop.eup %3659 }
0x3078   :  { %2561 = vrot.lane.b32.xlu1 %v3660_v52, %s3681_s4 }
0x30b1   :  { %v4667_v10 = vpop.permute.xlu1 %2570 }
0x30b2   :  { %v2573_v13 = vmul.f32 %v4667_v10, %v4636_v22 }
0x30b4   :  { %2579 = vrot.lane.b32.xlu1 %v2573_v13, %s3683_s26 }
0x30b8   :  { %2688 = vrot.lane.b32.xlu1 %v2840_v49, %s3684_s20 }
0x30ea   :  { %v2562_v46 = vpop.permute.xlu1 %2561 }
0x30eb   :  { %v2564_v20 = vmul.f32 %v3658_v25, %v2562_v46 }
0x30ed   :  { %2575 = vrot.lane.b32.xlu0 %v2564_v20, %s3682_s23 }
0x310c   :  { %2354 = vadd.xlane.f32.xlu0 %v2353_v29 }
0x3126   :  { %v2580_v27 = vpop.permute.xlu1 %2579 }
0x312a   :  { %v2689_v0 = vpop.permute.xlu1 %2688 }
0x315f   :  { %v4677_v55 = vpop.permute.xlu0 %2575 }
0x3160   :  { %v2582_v2 = vsel %vm39_vm1, %v4677_v55, %v2580_v27  ;;  %2741 = vst.msk [vmem:[#allocation4] sm:$0xff] %vm39_vm1, %v4677_v55 }
0x3161   :  { %3317 = vmatmul.mubr.msk.f32.vlgmr.msra.gmra.mrb[22].mxu0 %vm302_vm4, %v2582_v2  ;;  %v2656_v49 = vmul.f32 %v2582_v2, %v4085_v8 }
0x3163   :  { %v2657_v33 = vsel %vm302_vm4, %v2656_v49, 0.0 }
0x3199   :  { %v2355_v45 = vpop.xlane.xlu0 %2354 }
0x319a   :  { %v2356_v6 = vadd.f32 %v4371_v43, %v2355_v45 }
0x319c   :  { %vm2420_vm6 = vcmp.gt.f32.partialorder %v2356_v6, 0.0 }
0x319d   :  { %v2836_v28 = vsel %vm2420_vm6, 1.0, %v3678_v1 }
0x319e   :  { %v2673_v38 = vsub.f32 1.0, %v2836_v28 }
0x31a0   :  { %v2691_v53 = vmul.f32 %v2689_v0, %v2673_v38 }
0x3234   :  { %v2652_v35 = vpop.f32.mrb[22].mxu0 }
0x3235   :  { %v2653_v25 = vadd.f32 %v4417_v21, %v2652_v35  ;;  %v3318_v50 = vpop.f32.mrb[23].mxu0 }
0x3237   :  { %3661 = vtanh.f32 %v2653_v25  ;;  %v2842_v21 = vmul.f32 -1.442695, %v2653_v25 }
0x3239   :  { %3663 = vpow2.f32 %v2842_v21 }
0x3241   :  { %v3662_v48 = vpop.eup %3661 }
0x3242   :  { %2669 = vrot.lane.b32.xlu1 %v3662_v48, %s3682_s23 }
0x3243   :  { %v3664_v32 = vpop.eup %3663 }
0x3244   :  { %v2664_v9 = vadd.f32 1.0, %v3664_v32 }
0x3246   :  { %2677 = vrot.lane.b32.xlu1 %v2675_v11, %s3684_s20  ;;  %3665 = vrcp.f32 %v2664_v9 }
0x324a   :  { %2704 = vperm.xlu1 %3539, %v2691_v53  }
0x324e   :  { %2693 = vrot.lane.b32.xlu1 %v4630_v23, %s3683_s26 }
0x3250   :  { %v3666_v17 = vpop.eup %3665 }
0x32b4   :  { %v2670_v3 = vpop.permute.xlu1 %2669 }
0x32b5   :  { %v2672_v41 = vmul.f32 %v3666_v17, %v2670_v3 }
0x32b7   :  { %2698 = vrot.lane.b32.xlu1 %v2672_v41, %s3683_s26 }
0x32b8   :  { %v2678_v62 = vpop.permute.xlu1 %2677 }
0x32b9   :  { %v2680_v61 = vmul.f32 %v2678_v62, %v2673_v38 }
0x32bb   :  { %2425 = vperm.xlu1 %3539, %v2836_v28  }
0x32bf   :  { %2683 = vperm.xlu1 %3539, %v2680_v61  }
0x32c9   :  { %v2705_v58 = vpop.permute.xlu1 %2704 }
0x32cd   :  { %v2694_v52 = vpop.permute.xlu1 %2693 }
0x32ce   :  { %v2696_v13 = vmul.f32 %v3666_v17, %v2694_v52 }
0x32e3   :  { %2658 = vadd.xlane.f32.xlu1 %v2657_v33 }
0x32f4   :  { %909 = vrot.lane.b32.xlu1 %v4134_v39, %s3683_s26 }
0x3329   :  { %v2699_v46 = vpop.permute.xlu1 %2698 }
0x332a   :  { %v2701_v20 = vadd.f32 %v2699_v46, %v2696_v13 }
0x332c   :  { %v2707_v15 = vmul.f32 %v2705_v58, %v2701_v20 }
0x332e   :  { %2709 = vrot.lane.b32.xlu0 %v2707_v15, %s3681_s4 }
0x333a   :  { %v4697_v29 = vpop.permute.xlu1 %2425 }
0x333b   :  { %v2674_v45 = vmul.f32 %v2672_v41, %v4697_v29 }
0x333e   :  { %v2684_v27 = vpop.permute.xlu1 %2683 }
0x333f   :  { %v2686_v50 = vmul.f32 %v2684_v27, %v4630_v23 }
0x3341   :  { %v2687_v6 = vadd.f32 %v2686_v50, %v2674_v45 }
0x3370   :  { %v2659_v35 = vpop.xlane.xlu1 %2658 }
0x3374   :  { %v910_v8 = vpop.permute.xlu1 %909 }
0x3375   :  { %v912_v2 = vsel %vm39_vm1, %v4090_v18, %v910_v8  ;;  %v2660_v18 = vadd.f32 %v4371_v43, %v2659_v35 }
0x3376   :  { %v913_v39 = vsel %vm302_vm4, %v912_v2, %v4075_v63 }
0x3377   :  { %v914_v25 = vsel %vm609_vm7, %v913_v39, %v4220_v44  ;;  %vm2724_vm8 = vcmp.gt.f32.partialorder %v2660_v18, 0.0  ;;  %v2720_v44 = vmul.f32 %v2684_v27, %v4636_v22 }
0x3378   :  { %2802 = vst [vmem:[%s4815_s9 + $0x8] sm:$0xff] %v914_v25  ;;  %v2843_v63 = vsel %vm2724_vm8, 1.0, %v3678_v1 }
0x33a0   :  { %v2710_v48 = vpop.permute.xlu0 %2709 }
0x33a1   :  { %v2712_v28 = vadd.f32 %v2710_v48, %v2687_v6 }
0x33a3   :  { %3667 = vtanh.f32 %v2712_v28 }
0x33ad   :  { %v3668_v11 = vpop.eup %3667 }
0x33ae   :  { %2715 = vrot.lane.b32.xlu0 %v3668_v11, %s3681_s4  ;;  %s3686_s4 = smov 127  }
0x33b2   :  { %2729 = vperm.xlu0 %3540, %v2843_v63  }
0x33b6   :  { %604 = vrot.lane.b32.xlu0 %v4032_v60, %s3683_s26 }
0x33ba   :  { %1213 = vrot.lane.b32.xlu0 %v4230_v24, %s3683_s26 }
0x33be   :  { %1517 = vrot.lane.b32.xlu0 %v4326_v14, %s3683_s26 }
0x33c2   :  { %1821 = vrot.lane.b32.xlu0 %v4444_v40, %s3683_s26 }
0x33c6   :  { %2125 = vrot.lane.b32.xlu0 %v4541_v57, %s3683_s26 }
0x33ca   :  { %2429 = vrot.lane.b32.xlu0 %v4636_v22, %s3683_s26 }
0x33ce   :  { %2743 = vrot.lane.b32.xlu0 %v4663_v7, %s3683_s26 }
0x33d2   :  { %2753 = vrot.lane.b32.xlu0 %v2712_v28, %s3683_s26 }
0x3420   :  { %v2716_v1 = vpop.permute.xlu0 %2715 }
0x3421   :  { %v2718_v60 = vmul.f32 %v3666_v17, %v2716_v1 }
0x3423   :  { %v2719_v24 = vmul.f32 %v2718_v60, %v4697_v29  ;;  %v2722_v43 = vmul.f32 %v2718_v60, %v2705_v58 }
0x3425   :  { %v2721_v14 = vadd.f32 %v2720_v44, %v2719_v24 }
0x3427   :  { %v2723_v40 = vadd.f32 %v2722_v43, %v2721_v14 }
0x3429   :  { %2733 = vrot.lane.b32.xlu1 %v2723_v40, %s3683_s26 }
0x342d   :  { %2748 = vrot.lane.b32.xlu1 %v2723_v40, %s3682_s23 }
0x3431   :  { %2757 = vrot.lane.b32.xlu1 %v2843_v63, %s3686_s4  ;;  %v2730_v57 = vpop.permute.xlu0 %2729 }
0x3435   :  { %v605_v23 = vpop.permute.xlu0 %604 }
0x3436   :  { %v607_v7 = vsel %vm39_vm1, %v3984_v47, %v605_v23 }
0x3437   :  { %v608_v38 = vsel %vm302_vm4, %v607_v7, %v3902_v12 }
0x3438   :  { %v610_v22 = vsel %vm609_vm7, %v608_v38, %v4124_v4 }
0x3439   :  { %611 = vst [vmem:[%s4815_s9] sm:$0xff] %v610_v22  ;;  %v1214_v0 = vpop.permute.xlu0 %1213 }
0x343a   :  { %v1216_v53 = vsel %vm39_vm1, %v4187_v59, %v1214_v0 }
0x343b   :  { %v1217_v21 = vsel %vm302_vm4, %v1216_v53, %v4176_v34 }
0x343c   :  { %v1218_v47 = vsel %vm609_vm7, %v1217_v21, %v4316_v16 }
0x343d   :  { %2809 = vst [vmem:[%s4815_s9 + $0x10] sm:$0xff] %v1218_v47  ;;  %v1518_v12 = vpop.permute.xlu0 %1517 }
0x343e   :  { %v1520_v4 = vsel %vm39_vm1, %v4283_v37, %v1518_v12 }
0x343f   :  { %v1521_v32 = vsel %vm302_vm4, %v1520_v4, %v4272_v26 }
0x3440   :  { %v1522_v59 = vsel %vm609_vm7, %v1521_v32, %v4434_v42 }
0x3441   :  { %2816 = vst [vmem:[%s4815_s9 + $0x18] sm:$0xff] %v1522_v59  ;;  %v1822_v34 = vpop.permute.xlu0 %1821 }
0x3442   :  { %v1824_v16 = vsel %vm39_vm1, %v4396_v30, %v1822_v34 }
0x3443   :  { %v1825_v9 = vsel %vm302_vm4, %v1824_v16, %v4385_v54 }
0x3444   :  { %v1826_v37 = vsel %vm609_vm7, %v1825_v9, %v4531_v51 }
0x3445   :  { %2823 = vst [vmem:[%s4815_s9 + $0x20] sm:$0xff] %v1826_v37  ;;  %v2126_v26 = vpop.permute.xlu0 %2125 }
0x3446   :  { %v2128_v42 = vsel %vm39_vm1, %v4500_v19, %v2126_v26 }
0x3447   :  { %v2129_v17 = vsel %vm302_vm4, %v2128_v42, %v4489_v36 }
0x3448   :  { %v2130_v30 = vsel %vm609_vm7, %v2129_v17, %v4626_v31 }
0x3449   :  { %2830 = vst [vmem:[%s4815_s9 + $0x28] sm:$0xff] %v2130_v30  ;;  %v2430_v54 = vpop.permute.xlu0 %2429 }
0x344a   :  { %v2432_v51 = vsel %vm39_vm1, %v4596_v5, %v2430_v54 }
0x344b   :  { %v2433_v3 = vsel %vm302_vm4, %v2432_v51, %v4585_v56 }
0x344c   :  { %v2434_v19 = vsel %vm609_vm7, %v2433_v3, %v4697_v29 }
0x344d   :  { %2837 = vst [vmem:[%s4815_s9 + $0x30] sm:$0xff] %v2434_v19  ;;  %v2744_v36 = vpop.permute.xlu0 %2743 }
0x344e   :  { %2746 = vst.msk [vmem:[#allocation5] sm:$0xff] %vm39_vm1, %v2744_v36  ;;  %2764 = vst.msk [vmem:[%s4816_s10] sm:$0xff] %vm39_vm1, %v2744_v36 }
0x3451   :  { %v2754_v31 = vpop.permute.xlu0 %2753 }
0x3452   :  { %2756 = vst.msk [vmem:[#allocation8] sm:$0xff] %vm39_vm1, %v2754_v31  ;;  %2765 = vst.msk [vmem:[%s4817_s11] sm:$0xff] %vm39_vm1, %v2754_v31 }
0x349b   :  { %v2734_v56 = vpop.permute.xlu1 %2733 }
0x349c   :  { %v2736_v5 = vsel %vm39_vm1, %v4677_v55, %v2734_v56 }
0x349d   :  { %v2737_v41 = vsel %vm302_vm4, %v2736_v5, %v4667_v10 }
0x349e   :  { %v2738_v62 = vsel %vm609_vm7, %v2737_v41, %v2730_v57 }
0x349f   :  { %2844 = vst [vmem:[%s4815_s9 + $0x38] sm:$0xff] %v2738_v62  ;;  %v2749_v61 = vpop.permute.xlu1 %2748 }
0x34a0   :  { %2751 = vst.msk [vmem:[#allocation7] sm:$0xff] %vm39_vm1, %v2749_v61 }
0x34a3   :  { %v2758_v49 = vpop.permute.xlu1 %2757 }
0x34a4   :  { %2760 = vst.msk [vmem:[#allocation9] sm:$0xff] %vm42_vm0, %v2758_v49 }

</bundles_post_ra>
